<compile_context>
chip_gen: v7x
topology: tpu7x:2x2x1
jax: 0.10.0
libtpu: 0.0.40
codegen_flags: <defaults>
</compile_context>

<pallas_src>
import math
import functools

import jax
import jax.numpy as jnp
from jax import lax
from jax.experimental import pallas as pl
from jax.experimental.pallas import tpu as pltpu


# ----------------------------------------------------------------------------
# in-kernel helpers
# ----------------------------------------------------------------------------
def _layer_norm(x, gamma, beta, eps):
    mu = jnp.mean(x, axis=-1, keepdims=True)
    var = jnp.mean(jnp.square(x - mu), axis=-1, keepdims=True)
    return (x - mu) * lax.rsqrt(var + eps) * gamma + beta


# ----------------------------------------------------------------------------
# fused forward kernel: embedding+PE, all encoder layers, final norm, head
# ----------------------------------------------------------------------------
def fused_forward_kernel(tok_ref,                       # SMEM (B, S) int32
                         emb_ref, pe_ref,               # VMEM (V,E), (S,E)
                         wqkv_ref, wo_ref, w1_ref, w2_ref,   # stacked (L,...)
                         vec_ref,                       # packed 1-row params
                         wh_ref,                        # (S, 2) head weight
                         o_ref,                         # (B, 2) output
                         x_scr,                         # VMEM scratch (B*S, E)
                         *, num_heads, num_layers, eps, batch, seq,
                         emb_dim, ff_dim):
    E = emb_dim
    FF = ff_dim
    dh = E // num_heads
    BS = batch * seq

    # ---- fused embedding gather + positional encoding ----------------------
    # PyTorch quirk reproduced: x[b, s, :] += pe[b, :] (per-batch position,
    # broadcast over the sequence).
    for b in range(batch):
        pe_row = pe_ref[b:b + 1, :]                       # (1, E)
        for s in range(seq):
            tok = tok_ref[b, s]                           # SMEM scalar
            i = b * seq + s
            x_scr[i:i + 1, :] = emb_ref[pl.ds(tok, 1), :] + pe_row
    x = x_scr[...]                                        # (BS, E) f32

    def vrow(r, w):                                       # packed 1-row params
        return vec_ref[r:r + 1, :w]                       # (1, w)

    for l in range(num_layers):                           # unrolled (L is small)
        base = 8 * l
        wqkv = wqkv_ref[l]                                # (E, 3E)  (Q pre-scaled)
        wo = wo_ref[l]                                    # (E, E)
        w1 = w1_ref[l]                                    # (E, FF)
        w2 = w2_ref[l]                                    # (FF, E)

        # --- multi-head self attention (head-batched) ------------------------
        qkv = jnp.dot(x, wqkv, preferred_element_type=jnp.float32) \
            + vrow(base + 0, 3 * E)                       # (BS, 3E)

        qs, ks, vs = [], [], []
        for h in range(num_heads):
            qs.append(qkv[:, h * dh:(h + 1) * dh].reshape(batch, seq, dh))
            ks.append(qkv[:, E + h * dh:E + (h + 1) * dh].reshape(batch, seq, dh))
            vs.append(qkv[:, 2 * E + h * dh:2 * E + (h + 1) * dh].reshape(batch, seq, dh))
        # stack heads along the cheap leading (major) axis -> one batched einsum
        q = jnp.concatenate(qs, axis=0)                   # (H*B, S, dh)
        k = jnp.concatenate(ks, axis=0)
        v = jnp.concatenate(vs, axis=0)

        s = jnp.einsum('bqd,bkd->bqk', q, k,
                       preferred_element_type=jnp.float32)          # (H*B,S,S)
        s = s - jnp.max(s, axis=-1, keepdims=True)
        p = jnp.exp(s)
        p = p / jnp.sum(p, axis=-1, keepdims=True)        # exact softmax (parity)
        ctx = jnp.einsum('bqk,bkd->bqd', p, v,
                         preferred_element_type=jnp.float32)        # (H*B,S,dh)

        # re-join heads: one lane concat + ONE full output-projection matmul
        attn = jnp.concatenate(
            [ctx[h * batch:(h + 1) * batch].reshape(BS, dh)
             for h in range(num_heads)], axis=-1)                   # (BS, E)
        attn = jnp.dot(attn, wo, preferred_element_type=jnp.float32) \
            + vrow(base + 1, E)

        x = _layer_norm(x + attn, vrow(base + 4, E), vrow(base + 5, E), eps)

        # --- feed forward (Linear -> ReLU -> Linear) -------------------------
        ff = jnp.dot(x, w1, preferred_element_type=jnp.float32) + vrow(base + 2, FF)
        ff = jnp.maximum(ff, 0.0)
        ff = jnp.dot(ff, w2, preferred_element_type=jnp.float32) + vrow(base + 3, E)

        x = _layer_norm(x + ff, vrow(base + 6, E), vrow(base + 7, E), eps)

    # --- final encoder norm + folded mapper/reducer + head -------------------
    tail = 8 * num_layers
    hn = _layer_norm(x, vrow(tail + 0, E), vrow(tail + 1, E), eps)   # (BS, E)
    # reduced[b,s] = hn[b,s,:] . weff + beff   (mapper+reducer folded on host)
    red = jnp.sum(hn.reshape(batch, seq, E) * vrow(tail + 2, E), axis=-1) \
        + vec_ref[tail + 3:tail + 4, 0:1]                            # (B, S)
    # head: (B,S) @ (S,2) + bh
    o_ref[...] = jnp.dot(red, wh_ref[...],
                         preferred_element_type=jnp.float32) \
        + vec_ref[tail + 3:tail + 4, 1:3]


# ----------------------------------------------------------------------------
# host-side glue: init, one-time parameter preparation, wrapper
# ----------------------------------------------------------------------------
def _positional_encoding(S, E):
    pos = jnp.arange(S, dtype=jnp.float32)[:, None]
    div = jnp.exp(jnp.arange(0, E, 2, dtype=jnp.float32)
                  * (-math.log(10000.0) / E))
    pe = jnp.zeros((S, E), jnp.float32)
    pe = pe.at[:, 0::2].set(jnp.sin(pos * div))
    pe = pe.at[:, 1::2].set(jnp.cos(pos * div))
    return pe


def init_params(key, vocab, E, S, num_heads, FF, num_layers):
    def uni(k, shape, scale=0.1):
        return jax.random.uniform(k, shape, jnp.float32, -scale, scale)

    keys = iter(jax.random.split(key, 8 + 4 * num_layers))
    p = {"embedding": uni(next(keys), (vocab, E))}
    # linear weights stored pre-transposed so that y = x @ W + b
    p["wqkv"] = jnp.stack([uni(next(keys), (E, 3 * E)) for _ in range(num_layers)])
    p["bqkv"] = jnp.zeros((num_layers, 3 * E), jnp.float32)
    p["wo"] = jnp.stack([uni(next(keys), (E, E)) for _ in range(num_layers)])
    p["bo"] = jnp.zeros((num_layers, E), jnp.float32)
    p["w1"] = jnp.stack([uni(next(keys), (E, FF)) for _ in range(num_layers)])
    p["b1"] = jnp.zeros((num_layers, FF), jnp.float32)
    p["w2"] = jnp.stack([uni(next(keys), (FF, E)) for _ in range(num_layers)])
    p["b2"] = jnp.zeros((num_layers, E), jnp.float32)
    p["g1"] = jnp.ones((num_layers, E), jnp.float32)
    p["be1"] = jnp.zeros((num_layers, E), jnp.float32)
    p["g2"] = jnp.ones((num_layers, E), jnp.float32)
    p["be2"] = jnp.zeros((num_layers, E), jnp.float32)
    # final encoder norm + mapper/reducer/head (biases zeroed as in init_weights)
    p["gn"] = jnp.ones((E,), jnp.float32)
    p["bn"] = jnp.zeros((E,), jnp.float32)
    p["wm"] = uni(next(keys), (E, vocab))
    p["bm"] = jnp.zeros((vocab,), jnp.float32)
    p["wr"] = uni(next(keys), (vocab, 1))
    p["br"] = jnp.zeros((1,), jnp.float32)
    p["wh"] = uni(next(keys), (S, 2))
    p["bh"] = jnp.zeros((2,), jnp.float32)
    return p


def prepare_params(params, *, sequence_length, embedding_size, num_heads,
                   transformer_feedforward):
    """One-time host-side folds; done at init, NOT per forward call."""
    E = embedding_size
    FF = transformer_feedforward
    dh = E // num_heads
    L = params["wqkv"].shape[0]
    scale = 1.0 / math.sqrt(dh)

    # fold 1/sqrt(dh) into the Q columns of the in-projection (exact)
    wqkv = params["wqkv"].at[:, :, :E].multiply(scale)
    bqkv = params["bqkv"].at[:, :E].multiply(scale)

    # fold mapper -> reducer (both linear; exact)
    weff = (params["wm"] @ params["wr"])[:, 0]                       # (E,)
    beff = params["bm"] @ params["wr"][:, 0] + params["br"][0]       # scalar

    # pack all 1-row parameters into one slab: 8 rows per layer + 4 tail rows
    cmax = max(3 * E, FF, E, 3)

    def pad_row(v):
        v = jnp.asarray(v, jnp.float32).reshape(-1)
        return jnp.pad(v, (0, cmax - v.shape[0]))

    rows = []
    for l in range(L):
        rows += [pad_row(bqkv[l]), pad_row(params["bo"][l]),
                 pad_row(params["b1"][l]), pad_row(params["b2"][l]),
                 pad_row(params["g1"][l]), pad_row(params["be1"][l]),
                 pad_row(params["g2"][l]), pad_row(params["be2"][l])]
    rows += [pad_row(params["gn"]), pad_row(params["bn"]), pad_row(weff),
             pad_row(jnp.concatenate([jnp.reshape(beff, (1,)), params["bh"]]))]
    vec = jnp.stack(rows)                                            # (8L+4, cmax)

    return {
        "emb": params["embedding"],
        "pe": _positional_encoding(sequence_length, E),              # precomputed
        "wqkv": wqkv,
        "wo": params["wo"],
        "w1": params["w1"],
        "w2": params["w2"],
        "vec": vec,
        "wh": params["wh"],
        "num_layers": L,
    }


def transformer4go_forward(prepared, token_ids, *, sequence_length,
                           embedding_size, num_heads, transformer_feedforward,
                           eps):
    B, S = token_ids.shape
    assert S == sequence_length
    # PyTorch pe[:B] quirk (per-batch positional rows) requires B <= S.
    assert B <= sequence_length, "batch must be <= sequence_length (pe[:B] slice)"
    E = embedding_size
    L = prepared["num_layers"]

    vmem = pl.BlockSpec(memory_space=pltpu.MemorySpace.VMEM)
    smem = pl.BlockSpec(memory_space=pltpu.MemorySpace.SMEM)

    kernel = functools.partial(
        fused_forward_kernel,
        num_heads=num_heads, num_layers=L, eps=eps, batch=B, seq=S,
        emb_dim=E, ff_dim=transformer_feedforward)

    logits = pl.pallas_call(
        kernel,
        out_shape=jax.ShapeDtypeStruct((B, 2), jnp.float32),
        in_specs=[smem, vmem, vmem, vmem, vmem, vmem, vmem, vmem, vmem],
        out_specs=vmem,
        scratch_shapes=[pltpu.VMEM((B * S, E), jnp.float32)],
    )(token_ids.astype(jnp.int32),
      prepared["emb"], prepared["pe"],
      prepared["wqkv"], prepared["wo"], prepared["w1"], prepared["w2"],
      prepared["vec"], prepared["wh"])
    return {"output_logits": logits}


# ----------------------------------------------------------------------------
if __name__ == "__main__":
    vocab_size = 64
    embedding_size = 32
    padding_idx = 0
    sequence_length = 16
    dropout_prob = 0.1
    num_attention_heads = 4
    layer_norm_eps = 1e-5
    transformer_feedforward = 64
    num_transformer_layers = 2
    batch = 2                      # must be <= sequence_length (asserted)

    key = jax.random.PRNGKey(0)
    pkey, dkey = jax.random.split(key)
    params = init_params(pkey, vocab_size, embedding_size, sequence_length,
                         num_attention_heads, transformer_feedforward,
                         num_transformer_layers)
    prepared = prepare_params(params,
                              sequence_length=sequence_length,
                              embedding_size=embedding_size,
                              num_heads=num_attention_heads,
                              transformer_feedforward=transformer_feedforward)
    tokens = jax.random.randint(dkey, (batch, sequence_length), 0, vocab_size,
                                dtype=jnp.int32)

    out = transformer4go_forward(prepared, tokens,
                                 sequence_length=sequence_length,
                                 embedding_size=embedding_size,
                                 num_heads=num_attention_heads,
                                 transformer_feedforward=transformer_feedforward,
                                 eps=layer_norm_eps)
    logits = jax.block_until_ready(out["output_logits"])
    assert logits.shape == (batch, 2)
    assert bool(jnp.all(jnp.isfinite(logits)))
    print("KERNEL_OK")
</pallas_src>

<mosaic_0001>
module attributes {stable_mosaic.version = 11 : i64} {
  func.func @fused_forward_kernel(%arg0: memref<2x16xi32, #tpu.memory_space<smem>>, %arg1: memref<64x32xf32, #tpu.memory_space<vmem>>, %arg2: memref<16x32xf32, #tpu.memory_space<vmem>>, %arg3: memref<2x32x96xf32, #tpu.memory_space<vmem>>, %arg4: memref<2x32x32xf32, #tpu.memory_space<vmem>>, %arg5: memref<2x32x64xf32, #tpu.memory_space<vmem>>, %arg6: memref<2x64x32xf32, #tpu.memory_space<vmem>>, %arg7: memref<20x96xf32, #tpu.memory_space<vmem>>, %arg8: memref<16x2xf32, #tpu.memory_space<vmem>>, %arg9: memref<2x2xf32, #tpu.memory_space<vmem>>, %arg10: memref<32x32xf32, #tpu.memory_space<vmem>>) attributes {dimension_semantics = [], scalar_prefetch = 0 : i64, scratch_operands = 1 : i64, tpu.core_type = #tpu.core_type<tc>} {
    %c0 = arith.constant 0 : index
    %c0_0 = arith.constant 0 : index
    %0 = vector.load %arg2[%c0, %c0_0] : memref<16x32xf32, #tpu.memory_space<vmem>>, vector<1x32xf32>
    %c0_1 = arith.constant 0 : index
    %c0_2 = arith.constant 0 : index
    %1 = memref.load %arg0[%c0_1, %c0_2] : memref<2x16xi32, #tpu.memory_space<smem>>
    %2 = arith.index_cast %1 : i32 to index
    %c0_3 = arith.constant 0 : index
    %3 = vector.load %arg1[%2, %c0_3] : memref<64x32xf32, #tpu.memory_space<vmem>>, vector<1x32xf32>
    %4 = arith.addf %3, %0 : vector<1x32xf32>
    %c0_4 = arith.constant 0 : index
    %c0_5 = arith.constant 0 : index
    %5 = vector.load %arg10[%c0_4, %c0_5] : memref<32x32xf32, #tpu.memory_space<vmem>>, vector<1x32xf32>
    tpu.vector_store %arg10[%c0_4, %c0_5], %4 {strides = array<i32>} : memref<32x32xf32, #tpu.memory_space<vmem>>, vector<1x32xf32>,
    %c0_6 = arith.constant 0 : index
    %c1 = arith.constant 1 : index
    %6 = memref.load %arg0[%c0_6, %c1] : memref<2x16xi32, #tpu.memory_space<smem>>
    %7 = arith.index_cast %6 : i32 to index
    %c0_7 = arith.constant 0 : index
    %8 = vector.load %arg1[%7, %c0_7] : memref<64x32xf32, #tpu.memory_space<vmem>>, vector<1x32xf32>
    %9 = arith.addf %8, %0 : vector<1x32xf32>
    %c1_8 = arith.constant 1 : index
    %c0_9 = arith.constant 0 : index
    %10 = vector.load %arg10[%c1_8, %c0_9] : memref<32x32xf32, #tpu.memory_space<vmem>>, vector<1x32xf32>
    tpu.vector_store %arg10[%c1_8, %c0_9], %9 {strides = array<i32>} : memref<32x32xf32, #tpu.memory_space<vmem>>, vector<1x32xf32>,
    %c0_10 = arith.constant 0 : index
    %c2 = arith.constant 2 : index
    %11 = memref.load %arg0[%c0_10, %c2] : memref<2x16xi32, #tpu.memory_space<smem>>
    %12 = arith.index_cast %11 : i32 to index
    %c0_11 = arith.constant 0 : index
    %13 = vector.load %arg1[%12, %c0_11] : memref<64x32xf32, #tpu.memory_space<vmem>>, vector<1x32xf32>
    %14 = arith.addf %13, %0 : vector<1x32xf32>
    %c2_12 = arith.constant 2 : index
    %c0_13 = arith.constant 0 : index
    %15 = vector.load %arg10[%c2_12, %c0_13] : memref<32x32xf32, #tpu.memory_space<vmem>>, vector<1x32xf32>
    tpu.vector_store %arg10[%c2_12, %c0_13], %14 {strides = array<i32>} : memref<32x32xf32, #tpu.memory_space<vmem>>, vector<1x32xf32>,
    %c0_14 = arith.constant 0 : index
    %c3 = arith.constant 3 : index
    %16 = memref.load %arg0[%c0_14, %c3] : memref<2x16xi32, #tpu.memory_space<smem>>
    %17 = arith.index_cast %16 : i32 to index
    %c0_15 = arith.constant 0 : index
    %18 = vector.load %arg1[%17, %c0_15] : memref<64x32xf32, #tpu.memory_space<vmem>>, vector<1x32xf32>
    %19 = arith.addf %18, %0 : vector<1x32xf32>
    %c3_16 = arith.constant 3 : index
    %c0_17 = arith.constant 0 : index
    %20 = vector.load %arg10[%c3_16, %c0_17] : memref<32x32xf32, #tpu.memory_space<vmem>>, vector<1x32xf32>
    tpu.vector_store %arg10[%c3_16, %c0_17], %19 {strides = array<i32>} : memref<32x32xf32, #tpu.memory_space<vmem>>, vector<1x32xf32>,
    %c0_18 = arith.constant 0 : index
    %c4 = arith.constant 4 : index
    %21 = memref.load %arg0[%c0_18, %c4] : memref<2x16xi32, #tpu.memory_space<smem>>
    %22 = arith.index_cast %21 : i32 to index
    %c0_19 = arith.constant 0 : index
    %23 = vector.load %arg1[%22, %c0_19] : memref<64x32xf32, #tpu.memory_space<vmem>>, vector<1x32xf32>
    %24 = arith.addf %23, %0 : vector<1x32xf32>
    %c4_20 = arith.constant 4 : index
    %c0_21 = arith.constant 0 : index
    %25 = vector.load %arg10[%c4_20, %c0_21] : memref<32x32xf32, #tpu.memory_space<vmem>>, vector<1x32xf32>
    tpu.vector_store %arg10[%c4_20, %c0_21], %24 {strides = array<i32>} : memref<32x32xf32, #tpu.memory_space<vmem>>, vector<1x32xf32>,
    %c0_22 = arith.constant 0 : index
    %c5 = arith.constant 5 : index
    %26 = memref.load %arg0[%c0_22, %c5] : memref<2x16xi32, #tpu.memory_space<smem>>
    %27 = arith.index_cast %26 : i32 to index
    %c0_23 = arith.constant 0 : index
    %28 = vector.load %arg1[%27, %c0_23] : memref<64x32xf32, #tpu.memory_space<vmem>>, vector<1x32xf32>
    %29 = arith.addf %28, %0 : vector<1x32xf32>
    %c5_24 = arith.constant 5 : index
    %c0_25 = arith.constant 0 : index
    %30 = vector.load %arg10[%c5_24, %c0_25] : memref<32x32xf32, #tpu.memory_space<vmem>>, vector<1x32xf32>
    tpu.vector_store %arg10[%c5_24, %c0_25], %29 {strides = array<i32>} : memref<32x32xf32, #tpu.memory_space<vmem>>, vector<1x32xf32>,
    %c0_26 = arith.constant 0 : index
    %c6 = arith.constant 6 : index
    %31 = memref.load %arg0[%c0_26, %c6] : memref<2x16xi32, #tpu.memory_space<smem>>
    %32 = arith.index_cast %31 : i32 to index
    %c0_27 = arith.constant 0 : index
    %33 = vector.load %arg1[%32, %c0_27] : memref<64x32xf32, #tpu.memory_space<vmem>>, vector<1x32xf32>
    %34 = arith.addf %33, %0 : vector<1x32xf32>
    %c6_28 = arith.constant 6 : index
    %c0_29 = arith.constant 0 : index
    %35 = vector.load %arg10[%c6_28, %c0_29] : memref<32x32xf32, #tpu.memory_space<vmem>>, vector<1x32xf32>
    tpu.vector_store %arg10[%c6_28, %c0_29], %34 {strides = array<i32>} : memref<32x32xf32, #tpu.memory_space<vmem>>, vector<1x32xf32>,
    %c0_30 = arith.constant 0 : index
    %c7 = arith.constant 7 : index
    %36 = memref.load %arg0[%c0_30, %c7] : memref<2x16xi32, #tpu.memory_space<smem>>
    %37 = arith.index_cast %36 : i32 to index
    %c0_31 = arith.constant 0 : index
    %38 = vector.load %arg1[%37, %c0_31] : memref<64x32xf32, #tpu.memory_space<vmem>>, vector<1x32xf32>
    %39 = arith.addf %38, %0 : vector<1x32xf32>
    %c7_32 = arith.constant 7 : index
    %c0_33 = arith.constant 0 : index
    %40 = vector.load %arg10[%c7_32, %c0_33] : memref<32x32xf32, #tpu.memory_space<vmem>>, vector<1x32xf32>
    tpu.vector_store %arg10[%c7_32, %c0_33], %39 {strides = array<i32>} : memref<32x32xf32, #tpu.memory_space<vmem>>, vector<1x32xf32>,
    %c0_34 = arith.constant 0 : index
    %c8 = arith.constant 8 : index
    %41 = memref.load %arg0[%c0_34, %c8] : memref<2x16xi32, #tpu.memory_space<smem>>
    %42 = arith.index_cast %41 : i32 to index
    %c0_35 = arith.constant 0 : index
    %43 = vector.load %arg1[%42, %c0_35] : memref<64x32xf32, #tpu.memory_space<vmem>>, vector<1x32xf32>
    %44 = arith.addf %43, %0 : vector<1x32xf32>
    %c8_36 = arith.constant 8 : index
    %c0_37 = arith.constant 0 : index
    %45 = vector.load %arg10[%c8_36, %c0_37] : memref<32x32xf32, #tpu.memory_space<vmem>>, vector<1x32xf32>
    tpu.vector_store %arg10[%c8_36, %c0_37], %44 {strides = array<i32>} : memref<32x32xf32, #tpu.memory_space<vmem>>, vector<1x32xf32>,
    %c0_38 = arith.constant 0 : index
    %c9 = arith.constant 9 : index
    %46 = memref.load %arg0[%c0_38, %c9] : memref<2x16xi32, #tpu.memory_space<smem>>
    %47 = arith.index_cast %46 : i32 to index
    %c0_39 = arith.constant 0 : index
    %48 = vector.load %arg1[%47, %c0_39] : memref<64x32xf32, #tpu.memory_space<vmem>>, vector<1x32xf32>
    %49 = arith.addf %48, %0 : vector<1x32xf32>
    %c9_40 = arith.constant 9 : index
    %c0_41 = arith.constant 0 : index
    %50 = vector.load %arg10[%c9_40, %c0_41] : memref<32x32xf32, #tpu.memory_space<vmem>>, vector<1x32xf32>
    tpu.vector_store %arg10[%c9_40, %c0_41], %49 {strides = array<i32>} : memref<32x32xf32, #tpu.memory_space<vmem>>, vector<1x32xf32>,
    %c0_42 = arith.constant 0 : index
    %c10 = arith.constant 10 : index
    %51 = memref.load %arg0[%c0_42, %c10] : memref<2x16xi32, #tpu.memory_space<smem>>
    %52 = arith.index_cast %51 : i32 to index
    %c0_43 = arith.constant 0 : index
    %53 = vector.load %arg1[%52, %c0_43] : memref<64x32xf32, #tpu.memory_space<vmem>>, vector<1x32xf32>
    %54 = arith.addf %53, %0 : vector<1x32xf32>
    %c10_44 = arith.constant 10 : index
    %c0_45 = arith.constant 0 : index
    %55 = vector.load %arg10[%c10_44, %c0_45] : memref<32x32xf32, #tpu.memory_space<vmem>>, vector<1x32xf32>
    tpu.vector_store %arg10[%c10_44, %c0_45], %54 {strides = array<i32>} : memref<32x32xf32, #tpu.memory_space<vmem>>, vector<1x32xf32>,
    %c0_46 = arith.constant 0 : index
    %c11 = arith.constant 11 : index
    %56 = memref.load %arg0[%c0_46, %c11] : memref<2x16xi32, #tpu.memory_space<smem>>
    %57 = arith.index_cast %56 : i32 to index
    %c0_47 = arith.constant 0 : index
    %58 = vector.load %arg1[%57, %c0_47] : memref<64x32xf32, #tpu.memory_space<vmem>>, vector<1x32xf32>
    %59 = arith.addf %58, %0 : vector<1x32xf32>
    %c11_48 = arith.constant 11 : index
    %c0_49 = arith.constant 0 : index
    %60 = vector.load %arg10[%c11_48, %c0_49] : memref<32x32xf32, #tpu.memory_space<vmem>>, vector<1x32xf32>
    tpu.vector_store %arg10[%c11_48, %c0_49], %59 {strides = array<i32>} : memref<32x32xf32, #tpu.memory_space<vmem>>, vector<1x32xf32>,
    %c0_50 = arith.constant 0 : index
    %c12 = arith.constant 12 : index
    %61 = memref.load %arg0[%c0_50, %c12] : memref<2x16xi32, #tpu.memory_space<smem>>
    %62 = arith.index_cast %61 : i32 to index
    %c0_51 = arith.constant 0 : index
    %63 = vector.load %arg1[%62, %c0_51] : memref<64x32xf32, #tpu.memory_space<vmem>>, vector<1x32xf32>
    %64 = arith.addf %63, %0 : vector<1x32xf32>
    %c12_52 = arith.constant 12 : index
    %c0_53 = arith.constant 0 : index
    %65 = vector.load %arg10[%c12_52, %c0_53] : memref<32x32xf32, #tpu.memory_space<vmem>>, vector<1x32xf32>
    tpu.vector_store %arg10[%c12_52, %c0_53], %64 {strides = array<i32>} : memref<32x32xf32, #tpu.memory_space<vmem>>, vector<1x32xf32>,
    %c0_54 = arith.constant 0 : index
    %c13 = arith.constant 13 : index
    %66 = memref.load %arg0[%c0_54, %c13] : memref<2x16xi32, #tpu.memory_space<smem>>
    %67 = arith.index_cast %66 : i32 to index
    %c0_55 = arith.constant 0 : index
    %68 = vector.load %arg1[%67, %c0_55] : memref<64x32xf32, #tpu.memory_space<vmem>>, vector<1x32xf32>
    %69 = arith.addf %68, %0 : vector<1x32xf32>
    %c13_56 = arith.constant 13 : index
    %c0_57 = arith.constant 0 : index
    %70 = vector.load %arg10[%c13_56, %c0_57] : memref<32x32xf32, #tpu.memory_space<vmem>>, vector<1x32xf32>
    tpu.vector_store %arg10[%c13_56, %c0_57], %69 {strides = array<i32>} : memref<32x32xf32, #tpu.memory_space<vmem>>, vector<1x32xf32>,
    %c0_58 = arith.constant 0 : index
    %c14 = arith.constant 14 : index
    %71 = memref.load %arg0[%c0_58, %c14] : memref<2x16xi32, #tpu.memory_space<smem>>
    %72 = arith.index_cast %71 : i32 to index
    %c0_59 = arith.constant 0 : index
    %73 = vector.load %arg1[%72, %c0_59] : memref<64x32xf32, #tpu.memory_space<vmem>>, vector<1x32xf32>
    %74 = arith.addf %73, %0 : vector<1x32xf32>
    %c14_60 = arith.constant 14 : index
    %c0_61 = arith.constant 0 : index
    %75 = vector.load %arg10[%c14_60, %c0_61] : memref<32x32xf32, #tpu.memory_space<vmem>>, vector<1x32xf32>
    tpu.vector_store %arg10[%c14_60, %c0_61], %74 {strides = array<i32>} : memref<32x32xf32, #tpu.memory_space<vmem>>, vector<1x32xf32>,
    %c0_62 = arith.constant 0 : index
    %c15 = arith.constant 15 : index
    %76 = memref.load %arg0[%c0_62, %c15] : memref<2x16xi32, #tpu.memory_space<smem>>
    %77 = arith.index_cast %76 : i32 to index
    %c0_63 = arith.constant 0 : index
    %78 = vector.load %arg1[%77, %c0_63] : memref<64x32xf32, #tpu.memory_space<vmem>>, vector<1x32xf32>
    %79 = arith.addf %78, %0 : vector<1x32xf32>
    %c15_64 = arith.constant 15 : index
    %c0_65 = arith.constant 0 : index
    %80 = vector.load %arg10[%c15_64, %c0_65] : memref<32x32xf32, #tpu.memory_space<vmem>>, vector<1x32xf32>
    tpu.vector_store %arg10[%c15_64, %c0_65], %79 {strides = array<i32>} : memref<32x32xf32, #tpu.memory_space<vmem>>, vector<1x32xf32>,
    %c1_66 = arith.constant 1 : index
    %c0_67 = arith.constant 0 : index
    %81 = vector.load %arg2[%c1_66, %c0_67] : memref<16x32xf32, #tpu.memory_space<vmem>>, vector<1x32xf32>
    %c1_68 = arith.constant 1 : index
    %c0_69 = arith.constant 0 : index
    %82 = memref.load %arg0[%c1_68, %c0_69] : memref<2x16xi32, #tpu.memory_space<smem>>
    %83 = arith.index_cast %82 : i32 to index
    %c0_70 = arith.constant 0 : index
    %84 = vector.load %arg1[%83, %c0_70] : memref<64x32xf32, #tpu.memory_space<vmem>>, vector<1x32xf32>
    %85 = arith.addf %84, %81 : vector<1x32xf32>
    %c16 = arith.constant 16 : index
    %c0_71 = arith.constant 0 : index
    %86 = vector.load %arg10[%c16, %c0_71] : memref<32x32xf32, #tpu.memory_space<vmem>>, vector<1x32xf32>
    tpu.vector_store %arg10[%c16, %c0_71], %85 {strides = array<i32>} : memref<32x32xf32, #tpu.memory_space<vmem>>, vector<1x32xf32>,
    %c1_72 = arith.constant 1 : index
    %c1_73 = arith.constant 1 : index
    %87 = memref.load %arg0[%c1_72, %c1_73] : memref<2x16xi32, #tpu.memory_space<smem>>
    %88 = arith.index_cast %87 : i32 to index
    %c0_74 = arith.constant 0 : index
    %89 = vector.load %arg1[%88, %c0_74] : memref<64x32xf32, #tpu.memory_space<vmem>>, vector<1x32xf32>
    %90 = arith.addf %89, %81 : vector<1x32xf32>
    %c17 = arith.constant 17 : index
    %c0_75 = arith.constant 0 : index
    %91 = vector.load %arg10[%c17, %c0_75] : memref<32x32xf32, #tpu.memory_space<vmem>>, vector<1x32xf32>
    tpu.vector_store %arg10[%c17, %c0_75], %90 {strides = array<i32>} : memref<32x32xf32, #tpu.memory_space<vmem>>, vector<1x32xf32>,
    %c1_76 = arith.constant 1 : index
    %c2_77 = arith.constant 2 : index
    %92 = memref.load %arg0[%c1_76, %c2_77] : memref<2x16xi32, #tpu.memory_space<smem>>
    %93 = arith.index_cast %92 : i32 to index
    %c0_78 = arith.constant 0 : index
    %94 = vector.load %arg1[%93, %c0_78] : memref<64x32xf32, #tpu.memory_space<vmem>>, vector<1x32xf32>
    %95 = arith.addf %94, %81 : vector<1x32xf32>
    %c18 = arith.constant 18 : index
    %c0_79 = arith.constant 0 : index
    %96 = vector.load %arg10[%c18, %c0_79] : memref<32x32xf32, #tpu.memory_space<vmem>>, vector<1x32xf32>
    tpu.vector_store %arg10[%c18, %c0_79], %95 {strides = array<i32>} : memref<32x32xf32, #tpu.memory_space<vmem>>, vector<1x32xf32>,
    %c1_80 = arith.constant 1 : index
    %c3_81 = arith.constant 3 : index
    %97 = memref.load %arg0[%c1_80, %c3_81] : memref<2x16xi32, #tpu.memory_space<smem>>
    %98 = arith.index_cast %97 : i32 to index
    %c0_82 = arith.constant 0 : index
    %99 = vector.load %arg1[%98, %c0_82] : memref<64x32xf32, #tpu.memory_space<vmem>>, vector<1x32xf32>
    %100 = arith.addf %99, %81 : vector<1x32xf32>
    %c19 = arith.constant 19 : index
    %c0_83 = arith.constant 0 : index
    %101 = vector.load %arg10[%c19, %c0_83] : memref<32x32xf32, #tpu.memory_space<vmem>>, vector<1x32xf32>
    tpu.vector_store %arg10[%c19, %c0_83], %100 {strides = array<i32>} : memref<32x32xf32, #tpu.memory_space<vmem>>, vector<1x32xf32>,
    %c1_84 = arith.constant 1 : index
    %c4_85 = arith.constant 4 : index
    %102 = memref.load %arg0[%c1_84, %c4_85] : memref<2x16xi32, #tpu.memory_space<smem>>
    %103 = arith.index_cast %102 : i32 to index
    %c0_86 = arith.constant 0 : index
    %104 = vector.load %arg1[%103, %c0_86] : memref<64x32xf32, #tpu.memory_space<vmem>>, vector<1x32xf32>
    %105 = arith.addf %104, %81 : vector<1x32xf32>
    %c20 = arith.constant 20 : index
    %c0_87 = arith.constant 0 : index
    %106 = vector.load %arg10[%c20, %c0_87] : memref<32x32xf32, #tpu.memory_space<vmem>>, vector<1x32xf32>
    tpu.vector_store %arg10[%c20, %c0_87], %105 {strides = array<i32>} : memref<32x32xf32, #tpu.memory_space<vmem>>, vector<1x32xf32>,
    %c1_88 = arith.constant 1 : index
    %c5_89 = arith.constant 5 : index
    %107 = memref.load %arg0[%c1_88, %c5_89] : memref<2x16xi32, #tpu.memory_space<smem>>
    %108 = arith.index_cast %107 : i32 to index
    %c0_90 = arith.constant 0 : index
    %109 = vector.load %arg1[%108, %c0_90] : memref<64x32xf32, #tpu.memory_space<vmem>>, vector<1x32xf32>
    %110 = arith.addf %109, %81 : vector<1x32xf32>
    %c21 = arith.constant 21 : index
    %c0_91 = arith.constant 0 : index
    %111 = vector.load %arg10[%c21, %c0_91] : memref<32x32xf32, #tpu.memory_space<vmem>>, vector<1x32xf32>
    tpu.vector_store %arg10[%c21, %c0_91], %110 {strides = array<i32>} : memref<32x32xf32, #tpu.memory_space<vmem>>, vector<1x32xf32>,
    %c1_92 = arith.constant 1 : index
    %c6_93 = arith.constant 6 : index
    %112 = memref.load %arg0[%c1_92, %c6_93] : memref<2x16xi32, #tpu.memory_space<smem>>
    %113 = arith.index_cast %112 : i32 to index
    %c0_94 = arith.constant 0 : index
    %114 = vector.load %arg1[%113, %c0_94] : memref<64x32xf32, #tpu.memory_space<vmem>>, vector<1x32xf32>
    %115 = arith.addf %114, %81 : vector<1x32xf32>
    %c22 = arith.constant 22 : index
    %c0_95 = arith.constant 0 : index
    %116 = vector.load %arg10[%c22, %c0_95] : memref<32x32xf32, #tpu.memory_space<vmem>>, vector<1x32xf32>
    tpu.vector_store %arg10[%c22, %c0_95], %115 {strides = array<i32>} : memref<32x32xf32, #tpu.memory_space<vmem>>, vector<1x32xf32>,
    %c1_96 = arith.constant 1 : index
    %c7_97 = arith.constant 7 : index
    %117 = memref.load %arg0[%c1_96, %c7_97] : memref<2x16xi32, #tpu.memory_space<smem>>
    %118 = arith.index_cast %117 : i32 to index
    %c0_98 = arith.constant 0 : index
    %119 = vector.load %arg1[%118, %c0_98] : memref<64x32xf32, #tpu.memory_space<vmem>>, vector<1x32xf32>
    %120 = arith.addf %119, %81 : vector<1x32xf32>
    %c23 = arith.constant 23 : index
    %c0_99 = arith.constant 0 : index
    %121 = vector.load %arg10[%c23, %c0_99] : memref<32x32xf32, #tpu.memory_space<vmem>>, vector<1x32xf32>
    tpu.vector_store %arg10[%c23, %c0_99], %120 {strides = array<i32>} : memref<32x32xf32, #tpu.memory_space<vmem>>, vector<1x32xf32>,
    %c1_100 = arith.constant 1 : index
    %c8_101 = arith.constant 8 : index
    %122 = memref.load %arg0[%c1_100, %c8_101] : memref<2x16xi32, #tpu.memory_space<smem>>
    %123 = arith.index_cast %122 : i32 to index
    %c0_102 = arith.constant 0 : index
    %124 = vector.load %arg1[%123, %c0_102] : memref<64x32xf32, #tpu.memory_space<vmem>>, vector<1x32xf32>
    %125 = arith.addf %124, %81 : vector<1x32xf32>
    %c24 = arith.constant 24 : index
    %c0_103 = arith.constant 0 : index
    %126 = vector.load %arg10[%c24, %c0_103] : memref<32x32xf32, #tpu.memory_space<vmem>>, vector<1x32xf32>
    tpu.vector_store %arg10[%c24, %c0_103], %125 {strides = array<i32>} : memref<32x32xf32, #tpu.memory_space<vmem>>, vector<1x32xf32>,
    %c1_104 = arith.constant 1 : index
    %c9_105 = arith.constant 9 : index
    %127 = memref.load %arg0[%c1_104, %c9_105] : memref<2x16xi32, #tpu.memory_space<smem>>
    %128 = arith.index_cast %127 : i32 to index
    %c0_106 = arith.constant 0 : index
    %129 = vector.load %arg1[%128, %c0_106] : memref<64x32xf32, #tpu.memory_space<vmem>>, vector<1x32xf32>
    %130 = arith.addf %129, %81 : vector<1x32xf32>
    %c25 = arith.constant 25 : index
    %c0_107 = arith.constant 0 : index
    %131 = vector.load %arg10[%c25, %c0_107] : memref<32x32xf32, #tpu.memory_space<vmem>>, vector<1x32xf32>
    tpu.vector_store %arg10[%c25, %c0_107], %130 {strides = array<i32>} : memref<32x32xf32, #tpu.memory_space<vmem>>, vector<1x32xf32>,
    %c1_108 = arith.constant 1 : index
    %c10_109 = arith.constant 10 : index
    %132 = memref.load %arg0[%c1_108, %c10_109] : memref<2x16xi32, #tpu.memory_space<smem>>
    %133 = arith.index_cast %132 : i32 to index
    %c0_110 = arith.constant 0 : index
    %134 = vector.load %arg1[%133, %c0_110] : memref<64x32xf32, #tpu.memory_space<vmem>>, vector<1x32xf32>
    %135 = arith.addf %134, %81 : vector<1x32xf32>
    %c26 = arith.constant 26 : index
    %c0_111 = arith.constant 0 : index
    %136 = vector.load %arg10[%c26, %c0_111] : memref<32x32xf32, #tpu.memory_space<vmem>>, vector<1x32xf32>
    tpu.vector_store %arg10[%c26, %c0_111], %135 {strides = array<i32>} : memref<32x32xf32, #tpu.memory_space<vmem>>, vector<1x32xf32>,
    %c1_112 = arith.constant 1 : index
    %c11_113 = arith.constant 11 : index
    %137 = memref.load %arg0[%c1_112, %c11_113] : memref<2x16xi32, #tpu.memory_space<smem>>
    %138 = arith.index_cast %137 : i32 to index
    %c0_114 = arith.constant 0 : index
    %139 = vector.load %arg1[%138, %c0_114] : memref<64x32xf32, #tpu.memory_space<vmem>>, vector<1x32xf32>
    %140 = arith.addf %139, %81 : vector<1x32xf32>
    %c27 = arith.constant 27 : index
    %c0_115 = arith.constant 0 : index
    %141 = vector.load %arg10[%c27, %c0_115] : memref<32x32xf32, #tpu.memory_space<vmem>>, vector<1x32xf32>
    tpu.vector_store %arg10[%c27, %c0_115], %140 {strides = array<i32>} : memref<32x32xf32, #tpu.memory_space<vmem>>, vector<1x32xf32>,
    %c1_116 = arith.constant 1 : index
    %c12_117 = arith.constant 12 : index
    %142 = memref.load %arg0[%c1_116, %c12_117] : memref<2x16xi32, #tpu.memory_space<smem>>
    %143 = arith.index_cast %142 : i32 to index
    %c0_118 = arith.constant 0 : index
    %144 = vector.load %arg1[%143, %c0_118] : memref<64x32xf32, #tpu.memory_space<vmem>>, vector<1x32xf32>
    %145 = arith.addf %144, %81 : vector<1x32xf32>
    %c28 = arith.constant 28 : index
    %c0_119 = arith.constant 0 : index
    %146 = vector.load %arg10[%c28, %c0_119] : memref<32x32xf32, #tpu.memory_space<vmem>>, vector<1x32xf32>
    tpu.vector_store %arg10[%c28, %c0_119], %145 {strides = array<i32>} : memref<32x32xf32, #tpu.memory_space<vmem>>, vector<1x32xf32>,
    %c1_120 = arith.constant 1 : index
    %c13_121 = arith.constant 13 : index
    %147 = memref.load %arg0[%c1_120, %c13_121] : memref<2x16xi32, #tpu.memory_space<smem>>
    %148 = arith.index_cast %147 : i32 to index
    %c0_122 = arith.constant 0 : index
    %149 = vector.load %arg1[%148, %c0_122] : memref<64x32xf32, #tpu.memory_space<vmem>>, vector<1x32xf32>
    %150 = arith.addf %149, %81 : vector<1x32xf32>
    %c29 = arith.constant 29 : index
    %c0_123 = arith.constant 0 : index
    %151 = vector.load %arg10[%c29, %c0_123] : memref<32x32xf32, #tpu.memory_space<vmem>>, vector<1x32xf32>
    tpu.vector_store %arg10[%c29, %c0_123], %150 {strides = array<i32>} : memref<32x32xf32, #tpu.memory_space<vmem>>, vector<1x32xf32>,
    %c1_124 = arith.constant 1 : index
    %c14_125 = arith.constant 14 : index
    %152 = memref.load %arg0[%c1_124, %c14_125] : memref<2x16xi32, #tpu.memory_space<smem>>
    %153 = arith.index_cast %152 : i32 to index
    %c0_126 = arith.constant 0 : index
    %154 = vector.load %arg1[%153, %c0_126] : memref<64x32xf32, #tpu.memory_space<vmem>>, vector<1x32xf32>
    %155 = arith.addf %154, %81 : vector<1x32xf32>
    %c30 = arith.constant 30 : index
    %c0_127 = arith.constant 0 : index
    %156 = vector.load %arg10[%c30, %c0_127] : memref<32x32xf32, #tpu.memory_space<vmem>>, vector<1x32xf32>
    tpu.vector_store %arg10[%c30, %c0_127], %155 {strides = array<i32>} : memref<32x32xf32, #tpu.memory_space<vmem>>, vector<1x32xf32>,
    %c1_128 = arith.constant 1 : index
    %c15_129 = arith.constant 15 : index
    %157 = memref.load %arg0[%c1_128, %c15_129] : memref<2x16xi32, #tpu.memory_space<smem>>
    %158 = arith.index_cast %157 : i32 to index
    %c0_130 = arith.constant 0 : index
    %159 = vector.load %arg1[%158, %c0_130] : memref<64x32xf32, #tpu.memory_space<vmem>>, vector<1x32xf32>
    %160 = arith.addf %159, %81 : vector<1x32xf32>
    %c31 = arith.constant 31 : index
    %c0_131 = arith.constant 0 : index
    %161 = vector.load %arg10[%c31, %c0_131] : memref<32x32xf32, #tpu.memory_space<vmem>>, vector<1x32xf32>
    tpu.vector_store %arg10[%c31, %c0_131], %160 {strides = array<i32>} : memref<32x32xf32, #tpu.memory_space<vmem>>, vector<1x32xf32>,
    %c0_132 = arith.constant 0 : index
    %c0_133 = arith.constant 0 : index
    %162 = vector.load %arg10[%c0_132, %c0_133] : memref<32x32xf32, #tpu.memory_space<vmem>>, vector<32x32xf32>
    %c0_134 = arith.constant 0 : index
    %c0_135 = arith.constant 0 : index
    %c0_136 = arith.constant 0 : index
    %163 = vector.load %arg3[%c0_134, %c0_135, %c0_136] : memref<2x32x96xf32, #tpu.memory_space<vmem>>, vector<1x32x96xf32>
    %164 = vector.shape_cast %163 : vector<1x32x96xf32> to vector<32x96xf32>
    %c0_137 = arith.constant 0 : index
    %c0_138 = arith.constant 0 : index
    %c0_139 = arith.constant 0 : index
    %165 = vector.load %arg4[%c0_137, %c0_138, %c0_139] : memref<2x32x32xf32, #tpu.memory_space<vmem>>, vector<1x32x32xf32>
    %166 = vector.shape_cast %165 : vector<1x32x32xf32> to vector<32x32xf32>
    %c0_140 = arith.constant 0 : index
    %c0_141 = arith.constant 0 : index
    %c0_142 = arith.constant 0 : index
    %167 = vector.load %arg5[%c0_140, %c0_141, %c0_142] : memref<2x32x64xf32, #tpu.memory_space<vmem>>, vector<1x32x64xf32>
    %168 = vector.shape_cast %167 : vector<1x32x64xf32> to vector<32x64xf32>
    %c0_143 = arith.constant 0 : index
    %c0_144 = arith.constant 0 : index
    %c0_145 = arith.constant 0 : index
    %169 = vector.load %arg6[%c0_143, %c0_144, %c0_145] : memref<2x64x32xf32, #tpu.memory_space<vmem>>, vector<1x64x32xf32>
    %170 = vector.shape_cast %169 : vector<1x64x32xf32> to vector<64x32xf32>
    %cst = arith.constant dense<0.000000e+00> : vector<32x96xf32>
    %171 = tpu.matmul %162, %164, %cst {dimension_numbers = #tpu.dot_dimension_numbers<[1], [0], [0], [1], [0, 0, 1, 1], [], []>} : vector<32x32xf32>, vector<32x96xf32>, vector<32x96xf32> -> vector<32x96xf32>
    %c0_146 = arith.constant 0 : index
    %c0_147 = arith.constant 0 : index
    %172 = vector.load %arg7[%c0_146, %c0_147] : memref<20x96xf32, #tpu.memory_space<vmem>>, vector<1x96xf32>
    %173 = vector.broadcast %172 : vector<1x96xf32> to vector<32x96xf32>
    %174 = arith.addf %171, %173 : vector<32x96xf32>
    %175 = vector.extract_strided_slice %174 {offsets = [0, 0], sizes = [32, 8], strides = [1, 1]} : vector<32x96xf32> to vector<32x8xf32>
    %176 = vector.shape_cast %175 : vector<32x8xf32> to vector<2x16x8xf32>
    %177 = vector.extract_strided_slice %174 {offsets = [0, 32], sizes = [32, 8], strides = [1, 1]} : vector<32x96xf32> to vector<32x8xf32>
    %178 = vector.shape_cast %177 : vector<32x8xf32> to vector<2x16x8xf32>
    %179 = vector.extract_strided_slice %174 {offsets = [0, 64], sizes = [32, 8], strides = [1, 1]} : vector<32x96xf32> to vector<32x8xf32>
    %180 = vector.shape_cast %179 : vector<32x8xf32> to vector<2x16x8xf32>
    %181 = vector.extract_strided_slice %174 {offsets = [0, 8], sizes = [32, 8], strides = [1, 1]} : vector<32x96xf32> to vector<32x8xf32>
    %182 = vector.shape_cast %181 : vector<32x8xf32> to vector<2x16x8xf32>
    %183 = vector.extract_strided_slice %174 {offsets = [0, 40], sizes = [32, 8], strides = [1, 1]} : vector<32x96xf32> to vector<32x8xf32>
    %184 = vector.shape_cast %183 : vector<32x8xf32> to vector<2x16x8xf32>
    %185 = vector.extract_strided_slice %174 {offsets = [0, 72], sizes = [32, 8], strides = [1, 1]} : vector<32x96xf32> to vector<32x8xf32>
    %186 = vector.shape_cast %185 : vector<32x8xf32> to vector<2x16x8xf32>
    %187 = vector.extract_strided_slice %174 {offsets = [0, 16], sizes = [32, 8], strides = [1, 1]} : vector<32x96xf32> to vector<32x8xf32>
    %188 = vector.shape_cast %187 : vector<32x8xf32> to vector<2x16x8xf32>
    %189 = vector.extract_strided_slice %174 {offsets = [0, 48], sizes = [32, 8], strides = [1, 1]} : vector<32x96xf32> to vector<32x8xf32>
    %190 = vector.shape_cast %189 : vector<32x8xf32> to vector<2x16x8xf32>
    %191 = vector.extract_strided_slice %174 {offsets = [0, 80], sizes = [32, 8], strides = [1, 1]} : vector<32x96xf32> to vector<32x8xf32>
    %192 = vector.shape_cast %191 : vector<32x8xf32> to vector<2x16x8xf32>
    %193 = vector.extract_strided_slice %174 {offsets = [0, 24], sizes = [32, 8], strides = [1, 1]} : vector<32x96xf32> to vector<32x8xf32>
    %194 = vector.shape_cast %193 : vector<32x8xf32> to vector<2x16x8xf32>
    %195 = vector.extract_strided_slice %174 {offsets = [0, 56], sizes = [32, 8], strides = [1, 1]} : vector<32x96xf32> to vector<32x8xf32>
    %196 = vector.shape_cast %195 : vector<32x8xf32> to vector<2x16x8xf32>
    %197 = vector.extract_strided_slice %174 {offsets = [0, 88], sizes = [32, 8], strides = [1, 1]} : vector<32x96xf32> to vector<32x8xf32>
    %198 = vector.shape_cast %197 : vector<32x8xf32> to vector<2x16x8xf32>
    %199 = tpu.concatenate %176, %182, %188, %194 in 0 : vector<2x16x8xf32>, vector<2x16x8xf32>, vector<2x16x8xf32>, vector<2x16x8xf32> -> vector<8x16x8xf32>
    %200 = tpu.concatenate %178, %184, %190, %196 in 0 : vector<2x16x8xf32>, vector<2x16x8xf32>, vector<2x16x8xf32>, vector<2x16x8xf32> -> vector<8x16x8xf32>
    %201 = tpu.concatenate %180, %186, %192, %198 in 0 : vector<2x16x8xf32>, vector<2x16x8xf32>, vector<2x16x8xf32>, vector<2x16x8xf32> -> vector<8x16x8xf32>
    "tpu.trace_start"() <{level = 10 : i32, message = "bqd,bkd->bqk"}> : () -> ()
    %cst_148 = arith.constant dense<0.000000e+00> : vector<8x16x16xf32>
    %202 = tpu.matmul %199, %200, %cst_148 {dimension_numbers = #tpu.dot_dimension_numbers<[2], [2], [1], [1], [0, 0, 0, 1, 1, 1], [0], [0]>} : vector<8x16x8xf32>, vector<8x16x8xf32>, vector<8x16x16xf32> -> vector<8x16x16xf32>
    "tpu.trace_stop"() : () -> ()
    %cst_149 = arith.constant dense<0xFF800000> : vector<8x16xf32>
    %203 = vector.multi_reduction <maximumf>, %202, %cst_149 [2] : vector<8x16x16xf32> to vector<8x16xf32>
    %204 = vector.shape_cast %203 : vector<8x16xf32> to vector<8x16x1xf32>
    %205 = vector.broadcast %204 : vector<8x16x1xf32> to vector<8x16x16xf32>
    %206 = arith.subf %202, %205 : vector<8x16x16xf32>
    %207 = math.exp %206 : vector<8x16x16xf32>
    %cst_150 = arith.constant dense<0.000000e+00> : vector<8x16xf32>
    %208 = vector.multi_reduction <add>, %207, %cst_150 [2] : vector<8x16x16xf32> to vector<8x16xf32>
    %209 = vector.shape_cast %208 : vector<8x16xf32> to vector<8x16x1xf32>
    %210 = vector.broadcast %209 : vector<8x16x1xf32> to vector<8x16x16xf32>
    %211 = arith.divf %207, %210 : vector<8x16x16xf32>
    "tpu.trace_start"() <{level = 10 : i32, message = "bqk,bkd->bqd"}> : () -> ()
    %cst_151 = arith.constant dense<0.000000e+00> : vector<8x16x8xf32>
    %212 = tpu.matmul %211, %201, %cst_151 {dimension_numbers = #tpu.dot_dimension_numbers<[2], [1], [1], [2], [0, 0, 0, 1, 1, 2], [0], [0]>} : vector<8x16x16xf32>, vector<8x16x8xf32>, vector<8x16x8xf32> -> vector<8x16x8xf32>
    "tpu.trace_stop"() : () -> ()
    %213 = vector.extract_strided_slice %212 {offsets = [0, 0, 0], sizes = [2, 16, 8], strides = [1, 1, 1]} : vector<8x16x8xf32> to vector<2x16x8xf32>
    %214 = vector.shape_cast %213 : vector<2x16x8xf32> to vector<32x8xf32>
    %215 = vector.extract_strided_slice %212 {offsets = [2, 0, 0], sizes = [2, 16, 8], strides = [1, 1, 1]} : vector<8x16x8xf32> to vector<2x16x8xf32>
    %216 = vector.shape_cast %215 : vector<2x16x8xf32> to vector<32x8xf32>
    %217 = vector.extract_strided_slice %212 {offsets = [4, 0, 0], sizes = [2, 16, 8], strides = [1, 1, 1]} : vector<8x16x8xf32> to vector<2x16x8xf32>
    %218 = vector.shape_cast %217 : vector<2x16x8xf32> to vector<32x8xf32>
    %219 = vector.extract_strided_slice %212 {offsets = [6, 0, 0], sizes = [2, 16, 8], strides = [1, 1, 1]} : vector<8x16x8xf32> to vector<2x16x8xf32>
    %220 = vector.shape_cast %219 : vector<2x16x8xf32> to vector<32x8xf32>
    %221 = tpu.concatenate %214, %216, %218, %220 in 1 : vector<32x8xf32>, vector<32x8xf32>, vector<32x8xf32>, vector<32x8xf32> -> vector<32x32xf32>
    %cst_152 = arith.constant dense<0.000000e+00> : vector<32x32xf32>
    %222 = tpu.matmul %221, %166, %cst_152 {dimension_numbers = #tpu.dot_dimension_numbers<[1], [0], [0], [1], [0, 0, 1, 1], [], []>} : vector<32x32xf32>, vector<32x32xf32>, vector<32x32xf32> -> vector<32x32xf32>
    %c1_153 = arith.constant 1 : index
    %c0_154 = arith.constant 0 : index
    %223 = vector.load %arg7[%c1_153, %c0_154] : memref<20x96xf32, #tpu.memory_space<vmem>>, vector<1x32xf32>
    %224 = vector.broadcast %223 : vector<1x32xf32> to vector<32x32xf32>
    %225 = arith.addf %222, %224 : vector<32x32xf32>
    %226 = arith.addf %162, %225 : vector<32x32xf32>
    %c4_155 = arith.constant 4 : index
    %c0_156 = arith.constant 0 : index
    %227 = vector.load %arg7[%c4_155, %c0_156] : memref<20x96xf32, #tpu.memory_space<vmem>>, vector<1x32xf32>
    %c5_157 = arith.constant 5 : index
    %c0_158 = arith.constant 0 : index
    %228 = vector.load %arg7[%c5_157, %c0_158] : memref<20x96xf32, #tpu.memory_space<vmem>>, vector<1x32xf32>
    %cst_159 = arith.constant dense<0.000000e+00> : vector<32xf32>
    %229 = vector.multi_reduction <add>, %226, %cst_159 [1] : vector<32x32xf32> to vector<32xf32>
    %230 = vector.shape_cast %229 : vector<32xf32> to vector<32x1xf32>
    %cst_160 = arith.constant 3.200000e+01 : f32
    %231 = vector.broadcast %cst_160 : f32 to vector<32x1xf32>
    %232 = arith.divf %230, %231 : vector<32x1xf32>
    %233 = vector.broadcast %232 : vector<32x1xf32> to vector<32x32xf32>
    %234 = arith.subf %226, %233 : vector<32x32xf32>
    %235 = arith.mulf %234, %234 : vector<32x32xf32>
    %cst_161 = arith.constant dense<0.000000e+00> : vector<32xf32>
    %236 = vector.multi_reduction <add>, %235, %cst_161 [1] : vector<32x32xf32> to vector<32xf32>
    %237 = vector.shape_cast %236 : vector<32xf32> to vector<32x1xf32>
    %cst_162 = arith.constant 3.200000e+01 : f32
    %238 = vector.broadcast %cst_162 : f32 to vector<32x1xf32>
    %239 = arith.divf %237, %238 : vector<32x1xf32>
    %240 = vector.broadcast %232 : vector<32x1xf32> to vector<32x32xf32>
    %241 = arith.subf %226, %240 : vector<32x32xf32>
    %cst_163 = arith.constant 9.99999974E-6 : f32
    %242 = vector.broadcast %cst_163 : f32 to vector<32x1xf32>
    %243 = arith.addf %239, %242 : vector<32x1xf32>
    %244 = math.rsqrt %243 : vector<32x1xf32>
    %245 = vector.broadcast %244 : vector<32x1xf32> to vector<32x32xf32>
    %246 = arith.mulf %241, %245 : vector<32x32xf32>
    %247 = vector.broadcast %227 : vector<1x32xf32> to vector<32x32xf32>
    %248 = arith.mulf %246, %247 : vector<32x32xf32>
    %249 = vector.broadcast %228 : vector<1x32xf32> to vector<32x32xf32>
    %250 = arith.addf %248, %249 : vector<32x32xf32>
    %cst_164 = arith.constant dense<0.000000e+00> : vector<32x64xf32>
    %251 = tpu.matmul %250, %168, %cst_164 {dimension_numbers = #tpu.dot_dimension_numbers<[1], [0], [0], [1], [0, 0, 1, 1], [], []>} : vector<32x32xf32>, vector<32x64xf32>, vector<32x64xf32> -> vector<32x64xf32>
    %c2_165 = arith.constant 2 : index
    %c0_166 = arith.constant 0 : index
    %252 = vector.load %arg7[%c2_165, %c0_166] : memref<20x96xf32, #tpu.memory_space<vmem>>, vector<1x64xf32>
    %253 = vector.broadcast %252 : vector<1x64xf32> to vector<32x64xf32>
    %254 = arith.addf %251, %253 : vector<32x64xf32>
    %cst_167 = arith.constant 0.000000e+00 : f32
    %255 = vector.broadcast %cst_167 : f32 to vector<32x64xf32>
    %256 = arith.maximumf %254, %255 : vector<32x64xf32>
    %cst_168 = arith.constant dense<0.000000e+00> : vector<32x32xf32>
    %257 = tpu.matmul %256, %170, %cst_168 {dimension_numbers = #tpu.dot_dimension_numbers<[1], [0], [0], [1], [0, 0, 1, 1], [], []>} : vector<32x64xf32>, vector<64x32xf32>, vector<32x32xf32> -> vector<32x32xf32>
    %c3_169 = arith.constant 3 : index
    %c0_170 = arith.constant 0 : index
    %258 = vector.load %arg7[%c3_169, %c0_170] : memref<20x96xf32, #tpu.memory_space<vmem>>, vector<1x32xf32>
    %259 = vector.broadcast %258 : vector<1x32xf32> to vector<32x32xf32>
    %260 = arith.addf %257, %259 : vector<32x32xf32>
    %261 = arith.addf %250, %260 : vector<32x32xf32>
    %c6_171 = arith.constant 6 : index
    %c0_172 = arith.constant 0 : index
    %262 = vector.load %arg7[%c6_171, %c0_172] : memref<20x96xf32, #tpu.memory_space<vmem>>, vector<1x32xf32>
    %c7_173 = arith.constant 7 : index
    %c0_174 = arith.constant 0 : index
    %263 = vector.load %arg7[%c7_173, %c0_174] : memref<20x96xf32, #tpu.memory_space<vmem>>, vector<1x32xf32>
    %cst_175 = arith.constant dense<0.000000e+00> : vector<32xf32>
    %264 = vector.multi_reduction <add>, %261, %cst_175 [1] : vector<32x32xf32> to vector<32xf32>
    %265 = vector.shape_cast %264 : vector<32xf32> to vector<32x1xf32>
    %cst_176 = arith.constant 3.200000e+01 : f32
    %266 = vector.broadcast %cst_176 : f32 to vector<32x1xf32>
    %267 = arith.divf %265, %266 : vector<32x1xf32>
    %268 = vector.broadcast %267 : vector<32x1xf32> to vector<32x32xf32>
    %269 = arith.subf %261, %268 : vector<32x32xf32>
    %270 = arith.mulf %269, %269 : vector<32x32xf32>
    %cst_177 = arith.constant dense<0.000000e+00> : vector<32xf32>
    %271 = vector.multi_reduction <add>, %270, %cst_177 [1] : vector<32x32xf32> to vector<32xf32>
    %272 = vector.shape_cast %271 : vector<32xf32> to vector<32x1xf32>
    %cst_178 = arith.constant 3.200000e+01 : f32
    %273 = vector.broadcast %cst_178 : f32 to vector<32x1xf32>
    %274 = arith.divf %272, %273 : vector<32x1xf32>
    %275 = vector.broadcast %267 : vector<32x1xf32> to vector<32x32xf32>
    %276 = arith.subf %261, %275 : vector<32x32xf32>
    %cst_179 = arith.constant 9.99999974E-6 : f32
    %277 = vector.broadcast %cst_179 : f32 to vector<32x1xf32>
    %278 = arith.addf %274, %277 : vector<32x1xf32>
    %279 = math.rsqrt %278 : vector<32x1xf32>
    %280 = vector.broadcast %279 : vector<32x1xf32> to vector<32x32xf32>
    %281 = arith.mulf %276, %280 : vector<32x32xf32>
    %282 = vector.broadcast %262 : vector<1x32xf32> to vector<32x32xf32>
    %283 = arith.mulf %281, %282 : vector<32x32xf32>
    %284 = vector.broadcast %263 : vector<1x32xf32> to vector<32x32xf32>
    %285 = arith.addf %283, %284 : vector<32x32xf32>
    %c1_180 = arith.constant 1 : index
    %c0_181 = arith.constant 0 : index
    %c0_182 = arith.constant 0 : index
    %286 = vector.load %arg3[%c1_180, %c0_181, %c0_182] : memref<2x32x96xf32, #tpu.memory_space<vmem>>, vector<1x32x96xf32>
    %287 = vector.shape_cast %286 : vector<1x32x96xf32> to vector<32x96xf32>
    %c1_183 = arith.constant 1 : index
    %c0_184 = arith.constant 0 : index
    %c0_185 = arith.constant 0 : index
    %288 = vector.load %arg4[%c1_183, %c0_184, %c0_185] : memref<2x32x32xf32, #tpu.memory_space<vmem>>, vector<1x32x32xf32>
    %289 = vector.shape_cast %288 : vector<1x32x32xf32> to vector<32x32xf32>
    %c1_186 = arith.constant 1 : index
    %c0_187 = arith.constant 0 : index
    %c0_188 = arith.constant 0 : index
    %290 = vector.load %arg5[%c1_186, %c0_187, %c0_188] : memref<2x32x64xf32, #tpu.memory_space<vmem>>, vector<1x32x64xf32>
    %291 = vector.shape_cast %290 : vector<1x32x64xf32> to vector<32x64xf32>
    %c1_189 = arith.constant 1 : index
    %c0_190 = arith.constant 0 : index
    %c0_191 = arith.constant 0 : index
    %292 = vector.load %arg6[%c1_189, %c0_190, %c0_191] : memref<2x64x32xf32, #tpu.memory_space<vmem>>, vector<1x64x32xf32>
    %293 = vector.shape_cast %292 : vector<1x64x32xf32> to vector<64x32xf32>
    %cst_192 = arith.constant dense<0.000000e+00> : vector<32x96xf32>
    %294 = tpu.matmul %285, %287, %cst_192 {dimension_numbers = #tpu.dot_dimension_numbers<[1], [0], [0], [1], [0, 0, 1, 1], [], []>} : vector<32x32xf32>, vector<32x96xf32>, vector<32x96xf32> -> vector<32x96xf32>
    %c8_193 = arith.constant 8 : index
    %c0_194 = arith.constant 0 : index
    %295 = vector.load %arg7[%c8_193, %c0_194] : memref<20x96xf32, #tpu.memory_space<vmem>>, vector<1x96xf32>
    %296 = vector.broadcast %295 : vector<1x96xf32> to vector<32x96xf32>
    %297 = arith.addf %294, %296 : vector<32x96xf32>
    %298 = vector.extract_strided_slice %297 {offsets = [0, 0], sizes = [32, 8], strides = [1, 1]} : vector<32x96xf32> to vector<32x8xf32>
    %299 = vector.shape_cast %298 : vector<32x8xf32> to vector<2x16x8xf32>
    %300 = vector.extract_strided_slice %297 {offsets = [0, 32], sizes = [32, 8], strides = [1, 1]} : vector<32x96xf32> to vector<32x8xf32>
    %301 = vector.shape_cast %300 : vector<32x8xf32> to vector<2x16x8xf32>
    %302 = vector.extract_strided_slice %297 {offsets = [0, 64], sizes = [32, 8], strides = [1, 1]} : vector<32x96xf32> to vector<32x8xf32>
    %303 = vector.shape_cast %302 : vector<32x8xf32> to vector<2x16x8xf32>
    %304 = vector.extract_strided_slice %297 {offsets = [0, 8], sizes = [32, 8], strides = [1, 1]} : vector<32x96xf32> to vector<32x8xf32>
    %305 = vector.shape_cast %304 : vector<32x8xf32> to vector<2x16x8xf32>
    %306 = vector.extract_strided_slice %297 {offsets = [0, 40], sizes = [32, 8], strides = [1, 1]} : vector<32x96xf32> to vector<32x8xf32>
    %307 = vector.shape_cast %306 : vector<32x8xf32> to vector<2x16x8xf32>
    %308 = vector.extract_strided_slice %297 {offsets = [0, 72], sizes = [32, 8], strides = [1, 1]} : vector<32x96xf32> to vector<32x8xf32>
    %309 = vector.shape_cast %308 : vector<32x8xf32> to vector<2x16x8xf32>
    %310 = vector.extract_strided_slice %297 {offsets = [0, 16], sizes = [32, 8], strides = [1, 1]} : vector<32x96xf32> to vector<32x8xf32>
    %311 = vector.shape_cast %310 : vector<32x8xf32> to vector<2x16x8xf32>
    %312 = vector.extract_strided_slice %297 {offsets = [0, 48], sizes = [32, 8], strides = [1, 1]} : vector<32x96xf32> to vector<32x8xf32>
    %313 = vector.shape_cast %312 : vector<32x8xf32> to vector<2x16x8xf32>
    %314 = vector.extract_strided_slice %297 {offsets = [0, 80], sizes = [32, 8], strides = [1, 1]} : vector<32x96xf32> to vector<32x8xf32>
    %315 = vector.shape_cast %314 : vector<32x8xf32> to vector<2x16x8xf32>
    %316 = vector.extract_strided_slice %297 {offsets = [0, 24], sizes = [32, 8], strides = [1, 1]} : vector<32x96xf32> to vector<32x8xf32>
    %317 = vector.shape_cast %316 : vector<32x8xf32> to vector<2x16x8xf32>
    %318 = vector.extract_strided_slice %297 {offsets = [0, 56], sizes = [32, 8], strides = [1, 1]} : vector<32x96xf32> to vector<32x8xf32>
    %319 = vector.shape_cast %318 : vector<32x8xf32> to vector<2x16x8xf32>
    %320 = vector.extract_strided_slice %297 {offsets = [0, 88], sizes = [32, 8], strides = [1, 1]} : vector<32x96xf32> to vector<32x8xf32>
    %321 = vector.shape_cast %320 : vector<32x8xf32> to vector<2x16x8xf32>
    %322 = tpu.concatenate %299, %305, %311, %317 in 0 : vector<2x16x8xf32>, vector<2x16x8xf32>, vector<2x16x8xf32>, vector<2x16x8xf32> -> vector<8x16x8xf32>
    %323 = tpu.concatenate %301, %307, %313, %319 in 0 : vector<2x16x8xf32>, vector<2x16x8xf32>, vector<2x16x8xf32>, vector<2x16x8xf32> -> vector<8x16x8xf32>
    %324 = tpu.concatenate %303, %309, %315, %321 in 0 : vector<2x16x8xf32>, vector<2x16x8xf32>, vector<2x16x8xf32>, vector<2x16x8xf32> -> vector<8x16x8xf32>
    "tpu.trace_start"() <{level = 10 : i32, message = "bqd,bkd->bqk"}> : () -> ()
    %cst_195 = arith.constant dense<0.000000e+00> : vector<8x16x16xf32>
    %325 = tpu.matmul %322, %323, %cst_195 {dimension_numbers = #tpu.dot_dimension_numbers<[2], [2], [1], [1], [0, 0, 0, 1, 1, 1], [0], [0]>} : vector<8x16x8xf32>, vector<8x16x8xf32>, vector<8x16x16xf32> -> vector<8x16x16xf32>
    "tpu.trace_stop"() : () -> ()
    %cst_196 = arith.constant dense<0xFF800000> : vector<8x16xf32>
    %326 = vector.multi_reduction <maximumf>, %325, %cst_196 [2] : vector<8x16x16xf32> to vector<8x16xf32>
    %327 = vector.shape_cast %326 : vector<8x16xf32> to vector<8x16x1xf32>
    %328 = vector.broadcast %327 : vector<8x16x1xf32> to vector<8x16x16xf32>
    %329 = arith.subf %325, %328 : vector<8x16x16xf32>
    %330 = math.exp %329 : vector<8x16x16xf32>
    %cst_197 = arith.constant dense<0.000000e+00> : vector<8x16xf32>
    %331 = vector.multi_reduction <add>, %330, %cst_197 [2] : vector<8x16x16xf32> to vector<8x16xf32>
    %332 = vector.shape_cast %331 : vector<8x16xf32> to vector<8x16x1xf32>
    %333 = vector.broadcast %332 : vector<8x16x1xf32> to vector<8x16x16xf32>
    %334 = arith.divf %330, %333 : vector<8x16x16xf32>
    "tpu.trace_start"() <{level = 10 : i32, message = "bqk,bkd->bqd"}> : () -> ()
    %cst_198 = arith.constant dense<0.000000e+00> : vector<8x16x8xf32>
    %335 = tpu.matmul %334, %324, %cst_198 {dimension_numbers = #tpu.dot_dimension_numbers<[2], [1], [1], [2], [0, 0, 0, 1, 1, 2], [0], [0]>} : vector<8x16x16xf32>, vector<8x16x8xf32>, vector<8x16x8xf32> -> vector<8x16x8xf32>
    "tpu.trace_stop"() : () -> ()
    %336 = vector.extract_strided_slice %335 {offsets = [0, 0, 0], sizes = [2, 16, 8], strides = [1, 1, 1]} : vector<8x16x8xf32> to vector<2x16x8xf32>
    %337 = vector.shape_cast %336 : vector<2x16x8xf32> to vector<32x8xf32>
    %338 = vector.extract_strided_slice %335 {offsets = [2, 0, 0], sizes = [2, 16, 8], strides = [1, 1, 1]} : vector<8x16x8xf32> to vector<2x16x8xf32>
    %339 = vector.shape_cast %338 : vector<2x16x8xf32> to vector<32x8xf32>
    %340 = vector.extract_strided_slice %335 {offsets = [4, 0, 0], sizes = [2, 16, 8], strides = [1, 1, 1]} : vector<8x16x8xf32> to vector<2x16x8xf32>
    %341 = vector.shape_cast %340 : vector<2x16x8xf32> to vector<32x8xf32>
    %342 = vector.extract_strided_slice %335 {offsets = [6, 0, 0], sizes = [2, 16, 8], strides = [1, 1, 1]} : vector<8x16x8xf32> to vector<2x16x8xf32>
    %343 = vector.shape_cast %342 : vector<2x16x8xf32> to vector<32x8xf32>
    %344 = tpu.concatenate %337, %339, %341, %343 in 1 : vector<32x8xf32>, vector<32x8xf32>, vector<32x8xf32>, vector<32x8xf32> -> vector<32x32xf32>
    %cst_199 = arith.constant dense<0.000000e+00> : vector<32x32xf32>
    %345 = tpu.matmul %344, %289, %cst_199 {dimension_numbers = #tpu.dot_dimension_numbers<[1], [0], [0], [1], [0, 0, 1, 1], [], []>} : vector<32x32xf32>, vector<32x32xf32>, vector<32x32xf32> -> vector<32x32xf32>
    %c9_200 = arith.constant 9 : index
    %c0_201 = arith.constant 0 : index
    %346 = vector.load %arg7[%c9_200, %c0_201] : memref<20x96xf32, #tpu.memory_space<vmem>>, vector<1x32xf32>
    %347 = vector.broadcast %346 : vector<1x32xf32> to vector<32x32xf32>
    %348 = arith.addf %345, %347 : vector<32x32xf32>
    %349 = arith.addf %285, %348 : vector<32x32xf32>
    %c12_202 = arith.constant 12 : index
    %c0_203 = arith.constant 0 : index
    %350 = vector.load %arg7[%c12_202, %c0_203] : memref<20x96xf32, #tpu.memory_space<vmem>>, vector<1x32xf32>
    %c13_204 = arith.constant 13 : index
    %c0_205 = arith.constant 0 : index
    %351 = vector.load %arg7[%c13_204, %c0_205] : memref<20x96xf32, #tpu.memory_space<vmem>>, vector<1x32xf32>
    %cst_206 = arith.constant dense<0.000000e+00> : vector<32xf32>
    %352 = vector.multi_reduction <add>, %349, %cst_206 [1] : vector<32x32xf32> to vector<32xf32>
    %353 = vector.shape_cast %352 : vector<32xf32> to vector<32x1xf32>
    %cst_207 = arith.constant 3.200000e+01 : f32
    %354 = vector.broadcast %cst_207 : f32 to vector<32x1xf32>
    %355 = arith.divf %353, %354 : vector<32x1xf32>
    %356 = vector.broadcast %355 : vector<32x1xf32> to vector<32x32xf32>
    %357 = arith.subf %349, %356 : vector<32x32xf32>
    %358 = arith.mulf %357, %357 : vector<32x32xf32>
    %cst_208 = arith.constant dense<0.000000e+00> : vector<32xf32>
    %359 = vector.multi_reduction <add>, %358, %cst_208 [1] : vector<32x32xf32> to vector<32xf32>
    %360 = vector.shape_cast %359 : vector<32xf32> to vector<32x1xf32>
    %cst_209 = arith.constant 3.200000e+01 : f32
    %361 = vector.broadcast %cst_209 : f32 to vector<32x1xf32>
    %362 = arith.divf %360, %361 : vector<32x1xf32>
    %363 = vector.broadcast %355 : vector<32x1xf32> to vector<32x32xf32>
    %364 = arith.subf %349, %363 : vector<32x32xf32>
    %cst_210 = arith.constant 9.99999974E-6 : f32
    %365 = vector.broadcast %cst_210 : f32 to vector<32x1xf32>
    %366 = arith.addf %362, %365 : vector<32x1xf32>
    %367 = math.rsqrt %366 : vector<32x1xf32>
    %368 = vector.broadcast %367 : vector<32x1xf32> to vector<32x32xf32>
    %369 = arith.mulf %364, %368 : vector<32x32xf32>
    %370 = vector.broadcast %350 : vector<1x32xf32> to vector<32x32xf32>
    %371 = arith.mulf %369, %370 : vector<32x32xf32>
    %372 = vector.broadcast %351 : vector<1x32xf32> to vector<32x32xf32>
    %373 = arith.addf %371, %372 : vector<32x32xf32>
    %cst_211 = arith.constant dense<0.000000e+00> : vector<32x64xf32>
    %374 = tpu.matmul %373, %291, %cst_211 {dimension_numbers = #tpu.dot_dimension_numbers<[1], [0], [0], [1], [0, 0, 1, 1], [], []>} : vector<32x32xf32>, vector<32x64xf32>, vector<32x64xf32> -> vector<32x64xf32>
    %c10_212 = arith.constant 10 : index
    %c0_213 = arith.constant 0 : index
    %375 = vector.load %arg7[%c10_212, %c0_213] : memref<20x96xf32, #tpu.memory_space<vmem>>, vector<1x64xf32>
    %376 = vector.broadcast %375 : vector<1x64xf32> to vector<32x64xf32>
    %377 = arith.addf %374, %376 : vector<32x64xf32>
    %cst_214 = arith.constant 0.000000e+00 : f32
    %378 = vector.broadcast %cst_214 : f32 to vector<32x64xf32>
    %379 = arith.maximumf %377, %378 : vector<32x64xf32>
    %cst_215 = arith.constant dense<0.000000e+00> : vector<32x32xf32>
    %380 = tpu.matmul %379, %293, %cst_215 {dimension_numbers = #tpu.dot_dimension_numbers<[1], [0], [0], [1], [0, 0, 1, 1], [], []>} : vector<32x64xf32>, vector<64x32xf32>, vector<32x32xf32> -> vector<32x32xf32>
    %c11_216 = arith.constant 11 : index
    %c0_217 = arith.constant 0 : index
    %381 = vector.load %arg7[%c11_216, %c0_217] : memref<20x96xf32, #tpu.memory_space<vmem>>, vector<1x32xf32>
    %382 = vector.broadcast %381 : vector<1x32xf32> to vector<32x32xf32>
    %383 = arith.addf %380, %382 : vector<32x32xf32>
    %384 = arith.addf %373, %383 : vector<32x32xf32>
    %c14_218 = arith.constant 14 : index
    %c0_219 = arith.constant 0 : index
    %385 = vector.load %arg7[%c14_218, %c0_219] : memref<20x96xf32, #tpu.memory_space<vmem>>, vector<1x32xf32>
    %c15_220 = arith.constant 15 : index
    %c0_221 = arith.constant 0 : index
    %386 = vector.load %arg7[%c15_220, %c0_221] : memref<20x96xf32, #tpu.memory_space<vmem>>, vector<1x32xf32>
    %cst_222 = arith.constant dense<0.000000e+00> : vector<32xf32>
    %387 = vector.multi_reduction <add>, %384, %cst_222 [1] : vector<32x32xf32> to vector<32xf32>
    %388 = vector.shape_cast %387 : vector<32xf32> to vector<32x1xf32>
    %cst_223 = arith.constant 3.200000e+01 : f32
    %389 = vector.broadcast %cst_223 : f32 to vector<32x1xf32>
    %390 = arith.divf %388, %389 : vector<32x1xf32>
    %391 = vector.broadcast %390 : vector<32x1xf32> to vector<32x32xf32>
    %392 = arith.subf %384, %391 : vector<32x32xf32>
    %393 = arith.mulf %392, %392 : vector<32x32xf32>
    %cst_224 = arith.constant dense<0.000000e+00> : vector<32xf32>
    %394 = vector.multi_reduction <add>, %393, %cst_224 [1] : vector<32x32xf32> to vector<32xf32>
    %395 = vector.shape_cast %394 : vector<32xf32> to vector<32x1xf32>
    %cst_225 = arith.constant 3.200000e+01 : f32
    %396 = vector.broadcast %cst_225 : f32 to vector<32x1xf32>
    %397 = arith.divf %395, %396 : vector<32x1xf32>
    %398 = vector.broadcast %390 : vector<32x1xf32> to vector<32x32xf32>
    %399 = arith.subf %384, %398 : vector<32x32xf32>
    %cst_226 = arith.constant 9.99999974E-6 : f32
    %400 = vector.broadcast %cst_226 : f32 to vector<32x1xf32>
    %401 = arith.addf %397, %400 : vector<32x1xf32>
    %402 = math.rsqrt %401 : vector<32x1xf32>
    %403 = vector.broadcast %402 : vector<32x1xf32> to vector<32x32xf32>
    %404 = arith.mulf %399, %403 : vector<32x32xf32>
    %405 = vector.broadcast %385 : vector<1x32xf32> to vector<32x32xf32>
    %406 = arith.mulf %404, %405 : vector<32x32xf32>
    %407 = vector.broadcast %386 : vector<1x32xf32> to vector<32x32xf32>
    %408 = arith.addf %406, %407 : vector<32x32xf32>
    %c16_227 = arith.constant 16 : index
    %c0_228 = arith.constant 0 : index
    %409 = vector.load %arg7[%c16_227, %c0_228] : memref<20x96xf32, #tpu.memory_space<vmem>>, vector<1x32xf32>
    %c17_229 = arith.constant 17 : index
    %c0_230 = arith.constant 0 : index
    %410 = vector.load %arg7[%c17_229, %c0_230] : memref<20x96xf32, #tpu.memory_space<vmem>>, vector<1x32xf32>
    %cst_231 = arith.constant dense<0.000000e+00> : vector<32xf32>
    %411 = vector.multi_reduction <add>, %408, %cst_231 [1] : vector<32x32xf32> to vector<32xf32>
    %412 = vector.shape_cast %411 : vector<32xf32> to vector<32x1xf32>
    %cst_232 = arith.constant 3.200000e+01 : f32
    %413 = vector.broadcast %cst_232 : f32 to vector<32x1xf32>
    %414 = arith.divf %412, %413 : vector<32x1xf32>
    %415 = vector.broadcast %414 : vector<32x1xf32> to vector<32x32xf32>
    %416 = arith.subf %408, %415 : vector<32x32xf32>
    %417 = arith.mulf %416, %416 : vector<32x32xf32>
    %cst_233 = arith.constant dense<0.000000e+00> : vector<32xf32>
    %418 = vector.multi_reduction <add>, %417, %cst_233 [1] : vector<32x32xf32> to vector<32xf32>
    %419 = vector.shape_cast %418 : vector<32xf32> to vector<32x1xf32>
    %cst_234 = arith.constant 3.200000e+01 : f32
    %420 = vector.broadcast %cst_234 : f32 to vector<32x1xf32>
    %421 = arith.divf %419, %420 : vector<32x1xf32>
    %422 = vector.broadcast %414 : vector<32x1xf32> to vector<32x32xf32>
    %423 = arith.subf %408, %422 : vector<32x32xf32>
    %cst_235 = arith.constant 9.99999974E-6 : f32
    %424 = vector.broadcast %cst_235 : f32 to vector<32x1xf32>
    %425 = arith.addf %421, %424 : vector<32x1xf32>
    %426 = math.rsqrt %425 : vector<32x1xf32>
    %427 = vector.broadcast %426 : vector<32x1xf32> to vector<32x32xf32>
    %428 = arith.mulf %423, %427 : vector<32x32xf32>
    %429 = vector.broadcast %409 : vector<1x32xf32> to vector<32x32xf32>
    %430 = arith.mulf %428, %429 : vector<32x32xf32>
    %431 = vector.broadcast %410 : vector<1x32xf32> to vector<32x32xf32>
    %432 = arith.addf %430, %431 : vector<32x32xf32>
    %433 = vector.shape_cast %432 : vector<32x32xf32> to vector<2x16x32xf32>
    %c18_236 = arith.constant 18 : index
    %c0_237 = arith.constant 0 : index
    %434 = vector.load %arg7[%c18_236, %c0_237] : memref<20x96xf32, #tpu.memory_space<vmem>>, vector<1x32xf32>
    %435 = vector.shape_cast %434 : vector<1x32xf32> to vector<1x1x32xf32>
    %436 = vector.broadcast %435 : vector<1x1x32xf32> to vector<2x16x32xf32>
    %437 = arith.mulf %433, %436 : vector<2x16x32xf32>
    %cst_238 = arith.constant dense<0.000000e+00> : vector<2x16xf32>
    %438 = vector.multi_reduction <add>, %437, %cst_238 [2] : vector<2x16x32xf32> to vector<2x16xf32>
    %c19_239 = arith.constant 19 : index
    %c0_240 = arith.constant 0 : index
    %439 = vector.load %arg7[%c19_239, %c0_240] : memref<20x96xf32, #tpu.memory_space<vmem>>, vector<1x1xf32>
    %440 = vector.broadcast %439 : vector<1x1xf32> to vector<2x16xf32>
    %441 = arith.addf %438, %440 : vector<2x16xf32>
    %c0_241 = arith.constant 0 : index
    %c0_242 = arith.constant 0 : index
    %442 = vector.load %arg8[%c0_241, %c0_242] : memref<16x2xf32, #tpu.memory_space<vmem>>, vector<16x2xf32>
    %cst_243 = arith.constant dense<0.000000e+00> : vector<2x2xf32>
    %443 = tpu.matmul %441, %442, %cst_243 {dimension_numbers = #tpu.dot_dimension_numbers<[1], [0], [0], [1], [0, 0, 1, 1], [], []>} : vector<2x16xf32>, vector<16x2xf32>, vector<2x2xf32> -> vector<2x2xf32>
    %c19_244 = arith.constant 19 : index
    %c1_245 = arith.constant 1 : index
    %444 = vector.load %arg7[%c19_244, %c1_245] : memref<20x96xf32, #tpu.memory_space<vmem>>, vector<1x2xf32>
    %445 = vector.broadcast %444 : vector<1x2xf32> to vector<2x2xf32>
    %446 = arith.addf %443, %445 : vector<2x2xf32>
    %c0_246 = arith.constant 0 : index
    %c0_247 = arith.constant 0 : index
    %447 = vector.load %arg9[%c0_246, %c0_247] : memref<2x2xf32, #tpu.memory_space<vmem>>, vector<2x2xf32>
    tpu.vector_store %arg9[%c0_246, %c0_247], %446 {strides = array<i32>} : memref<2x2xf32, #tpu.memory_space<vmem>>, vector<2x2xf32>,
    return
  }
}

</mosaic_0001>

<bundles_post_ra>
// kernel: tpu_custom_call.1
= control target key start
LH: loop header
LB: loop body
LE: loop exit
PB: predicated region body
PF: predicated region fallthrough
CT: control target
= control target key end

     0   :  { %14 = vsyncpa [#allocation5], 0  ;;  %s7607_s0 = inlined_call_operand.vmem [shape: s32[2,16], index: 0, kind: input, shape index: {}]   ;;  %s7608_s1 = inlined_call_operand.vmem [shape: f32[64,32], index: 1, kind: input, shape index: {}]   ;;  %s7609_s2 = inlined_call_operand.vmem [shape: f32[16,32], index: 2, kind: input, shape index: {}]   ;;  %s7610_s3 = inlined_call_operand.vmem [shape: f32[2,32,96], index: 3, kind: input, shape index: {}]   ;;  %s7611_s4 = inlined_call_operand.vmem [shape: f32[2,32,32], index: 4, kind: input, shape index: {}]   ;;  %s7612_s5 = inlined_call_operand.vmem [shape: f32[2,32,64], index: 5, kind: input, shape index: {}]   ;;  %s7613_s6 = inlined_call_operand.vmem [shape: f32[2,64,32], index: 6, kind: input, shape index: {}]   ;;  %s7614_s7 = inlined_call_operand.vmem [shape: f32[20,96], index: 7, kind: input, shape index: {}]   ;;  %s7615_s8 = inlined_call_operand.vmem [shape: f32[16,2], index: 8, kind: input, shape index: {}]   ;;  %s7616_s9 = inlined_call_operand.hbm [shape: f32[2,2], index: 9, kind: output, shape index: {}]  }
   0x1   :  { %15 = vsyncpa [#allocation4], 0  ;;  %s22_s11 = sshll.u32 %s7607_s0, 4  ;;  %s23_s11 = int_to_ptr.vmem [resolvable:$true] %s22_s11 }
   0x2   :  { %s6306_s12 = scalar_lea.vmem %s23_s11, 32  ;;  %p6311_p1 = scmp.lt.s32.totalorder %s23_s11, %s23_s11 }
   0x3   :  { %p6307_p0 = scmp.ne.s32.totalorder %s23_s11, %s6306_s12  ;;  %p6312_p2 = scmp.lt.s32.totalorder %s6306_s12, %s6306_s12 }
   0x5   :  { %p6313_p3 = por %p6312_p2, %p6311_p1 }
   0x7   :  { %p6314_p4 = pnand %p6313_p3, %p6307_p0 }
   0x9   :  { %6317 = shalt.err (!%p6314_p4)
}
   0xa   :  { %s6344_s13 = smov [#allocation3]  }
   0xb   :  { %25 = dma.vmem_to_smem %s23_s11, 32, %s6344_s13, [#allocation5]  }
   0xc   :  { %6340 = dma.done.wait [#allocation5], 32  }
   0xd   :  { %6341 = vsyncadd [#allocation5], 4294967264 }
   0xe   :  { %45 = sfence }
   0xf   :  { %v213_v0 = vld [vmem:[%s7610_s3] sm:$0xff]  ;;  %v214_v1 = vld [vmem:[%s7610_s3 + $0x8] sm:$0xff]  ;;  %v215_v2 = vld [vmem:[%s7610_s3 + $0x10] sm:$0xff]  ;;  %s47_s19 = sld [smem:[#allocation3]]  ;;  %s4954_s22 = sld [smem:[#allocation3 + $0x1]]  ;;  %vm51_vm0 = vcmask 253952  }
  0x10   :  { %v5715_v3 = vpack.c.bf16 %v214_v1, %v213_v0  ;;  %v216_v4 = vld [vmem:[%s7610_s3 + $0x18] sm:$0xff]  ;;  %s4955_s23 = sld [smem:[#allocation3 + $0x2]]  ;;  %s4956_s24 = sld [smem:[#allocation3 + $0x3]]  ;;  %v6430_v6 = vld [vmem:[%s7609_s2] sm:$0x1]  ;;  %vm238_vm1 = vcmask 261120  }
  0x11   :  { %v5719_v5 = vpack.c.bf16 %v216_v4, %v215_v2  ;;  %s4957_s25 = sld [smem:[#allocation3 + $0x4]]  ;;  %s4958_s26 = sld [smem:[#allocation3 + $0x5]]  ;;  %v6538_v34 = vld [vmem:[%s7609_s2 + $0x1] sm:$0x1]  ;;  %vm368_vm2 = vcmask 64512   ;;  %vm1061_vm4 = vcmask 130048  }
  0x12   :  { %5716 = vmatprep.subr.bf16.mxu1 %v5715_v3  ;;  %s6423_s27 = sld [smem:[#allocation3 + $0x6]]  ;;  %s6425_s28 = sld [smem:[#allocation3 + $0x7]]  ;;  %vm6692_vm3 = vmpackc.low %vm368_vm2, %vm368_vm2  ;;  %vm1990_vm5 = vcmask 195584   ;;  %vm2283_vm6 = vcmask 523264   ;;  %vm6354_vm7 = vmmov 0   ;;  %vm4816_vm8 = vcmask 130112  }
  0x13   :  { %5718 = vmatpush3.bf16.msra.mxu1 %v5715_v3  ;;  %s6432_s10 = sld [smem:[#allocation3 + $0x8]]  ;;  %s6434_s11 = sld [smem:[#allocation3 + $0x9]]  ;;  %vm4827_vm9 = vcmask 1041409   ;;  %vm4905_vm10 = vcmask 9216  }
  0x14   :  { %5720 = vmatprep.subr.bf16.mxu1 %v5719_v5  ;;  %s6439_s15 = sld [smem:[#allocation3 + $0xa]]  ;;  %s6444_s18 = sld [smem:[#allocation3 + $0xb]] }
  0x15   :  { %s48_s14 = scalar_lea.vmem %s7608_s1, %s47_s19  ;;  %s54_s0 = scalar_lea.vmem %s7608_s1, %s4954_s22 }
  0x16   :  { %v49_v7 = vld [vmem:[%s48_s14] sm:$0x1]  ;;  %s59_s19 = scalar_lea.vmem %s7608_s1, %s4955_s23  ;;  %s64_s12 = scalar_lea.vmem %s7608_s1, %s4956_s24 }
  0x17   :  { %5722 = vmatpush3.bf16.msra.mxu1 %v5719_v5  ;;  %v50_v8 = vadd.f32 %v49_v7, %v6430_v6  ;;  %v55_v9 = vld [vmem:[%s54_s0] sm:$0x1]  ;;  %s69_s14 = scalar_lea.vmem %s7608_s1, %s4957_s25  ;;  %s74_s0 = scalar_lea.vmem %s7608_s1, %s4958_s26 }
  0x18   :  { %v56_v10 = vadd.f32 %v55_v9, %v6430_v6  ;;  %v60_v11 = vld [vmem:[%s59_s19] sm:$0x1]  ;;  %s79_s20 = scalar_lea.vmem %s7608_s1, %s6423_s27  ;;  %s84_s25 = scalar_lea.vmem %s7608_s1, %s6425_s28 }
  0x19   :  { %v65_v12 = vld [vmem:[%s64_s12] sm:$0x1]  ;;  %52 = vst.msk [vmem:[#allocation2] sm:$0x1] %vm51_vm0, %v50_v8  ;;  %v61_v13 = vadd.f32 %v60_v11, %v6430_v6  ;;  %s89_s30 = scalar_lea.vmem %s7608_s1, %s6432_s10  ;;  %s94_s27 = scalar_lea.vmem %s7608_s1, %s6434_s11 }
  0x1a   :  { %v66_v14 = vadd.f32 %v65_v12, %v6430_v6  ;;  %v70_v15 = vld [vmem:[%s69_s14] sm:$0x1]  ;;  %57 = vst.msk [vmem:[#allocation2 + $0x1] sm:$0x1] %vm51_vm0, %v56_v10  ;;  %s99_s14 = scalar_lea.vmem %s7608_s1, %s6439_s15  ;;  %s4965_s16 = sld [smem:[#allocation3 + $0xc]] }
  0x1b   :  { %v75_v16 = vld [vmem:[%s74_s0] sm:$0x1]  ;;  %v71_v17 = vadd.f32 %v70_v15, %v6430_v6  ;;  %62 = vst.msk [vmem:[#allocation2 + $0x2] sm:$0x1] %vm51_vm0, %v61_v13  ;;  %s104_s17 = scalar_lea.vmem %s7608_s1, %s6444_s18  ;;  %s4966_s0 = sld [smem:[#allocation3 + $0xd]] }
  0x1c   :  { %v76_v18 = vadd.f32 %v75_v16, %v6430_v6  ;;  %v80_v19 = vld [vmem:[%s79_s20] sm:$0x1]  ;;  %67 = vst.msk [vmem:[#allocation2 + $0x3] sm:$0x1] %vm51_vm0, %v66_v14  ;;  %s4967_s15 = sld [smem:[#allocation3 + $0xe]]  ;;  %s4968_s23 = sld [smem:[#allocation3 + $0xf]] }
  0x1d   :  { %v85_v20 = vld [vmem:[%s84_s25] sm:$0x1]  ;;  %v81_v21 = vadd.f32 %v80_v19, %v6430_v6  ;;  %72 = vst.msk [vmem:[#allocation2 + $0x4] sm:$0x1] %vm51_vm0, %v71_v17  ;;  %s6504_s24 = sld [smem:[#allocation3 + $0x80]]  ;;  %s6506_s20 = sld [smem:[#allocation3 + $0x81]] }
  0x1e   :  { %v86_v22 = vadd.f32 %v85_v20, %v6430_v6  ;;  %v90_v23 = vld [vmem:[%s89_s30] sm:$0x1]  ;;  %77 = vst.msk [vmem:[#allocation2 + $0x5] sm:$0x1] %vm51_vm0, %v76_v18  ;;  %s6509_s18 = sld [smem:[#allocation3 + $0x82]]  ;;  %s6511_s21 = sld [smem:[#allocation3 + $0x83]] }
  0x1f   :  { %v95_v24 = vld [vmem:[%s94_s27] sm:$0x1]  ;;  %v91_v25 = vadd.f32 %v90_v23, %v6430_v6  ;;  %82 = vst.msk [vmem:[#allocation2 + $0x6] sm:$0x1] %vm51_vm0, %v81_v21  ;;  %s6514_s19 = sld [smem:[#allocation3 + $0x84]]  ;;  %s6516_s25 = sld [smem:[#allocation3 + $0x85]] }
  0x20   :  { %v96_v26 = vadd.f32 %v95_v24, %v6430_v6  ;;  %v100_v27 = vld [vmem:[%s99_s14] sm:$0x1]  ;;  %87 = vst.msk [vmem:[#allocation2 + $0x7] sm:$0x1] %vm51_vm0, %v86_v22  ;;  %s109_s30 = scalar_lea.vmem %s7608_s1, %s4965_s16  ;;  %s6521_s12 = sld [smem:[#allocation3 + $0x86]] }
  0x21   :  { %v101_v28 = vadd.f32 %v100_v27, %v6430_v6  ;;  %v105_v29 = vld [vmem:[%s104_s17] sm:$0x1]  ;;  %92 = vst.msk [vmem:[#allocation2 + $0x8] sm:$0x1] %vm51_vm0, %v91_v25  ;;  %s114_s28 = scalar_lea.vmem %s7608_s1, %s4966_s0  ;;  %s6526_s13 = sld [smem:[#allocation3 + $0x87]] }
  0x22   :  { %97 = vst.msk [vmem:[#allocation2 + $0x9] sm:$0x1] %vm51_vm0, %v96_v26  ;;  %v106_v30 = vadd.f32 %v105_v29, %v6430_v6  ;;  %v110_v31 = vld [vmem:[%s109_s30] sm:$0x1]  ;;  %s119_s11 = scalar_lea.vmem %s7608_s1, %s4967_s15  ;;  %s124_s26 = scalar_lea.vmem %s7608_s1, %s4968_s23 }
  0x23   :  { %102 = vst.msk [vmem:[#allocation2 + $0xa] sm:$0x1] %vm51_vm0, %v101_v28  ;;  %v111_v32 = vadd.f32 %v110_v31, %v6430_v6  ;;  %v115_v33 = vld [vmem:[%s114_s28] sm:$0x1]  ;;  %s130_s15 = scalar_lea.vmem %s7608_s1, %s6504_s24  ;;  %s135_s23 = scalar_lea.vmem %s7608_s1, %s6506_s20 }
  0x24   :  { %107 = vst.msk [vmem:[#allocation2 + $0xb] sm:$0x1] %vm51_vm0, %v106_v30  ;;  %v116_v36 = vadd.f32 %v115_v33, %v6430_v6  ;;  %v120_v37 = vld [vmem:[%s119_s11] sm:$0x1]  ;;  %s140_s24 = scalar_lea.vmem %s7608_s1, %s6509_s18  ;;  %s145_s16 = scalar_lea.vmem %s7608_s1, %s6511_s21 }
  0x25   :  { %v125_v38 = vld [vmem:[%s124_s26] sm:$0x1]  ;;  %112 = vst.msk [vmem:[#allocation2 + $0xc] sm:$0x1] %vm51_vm0, %v111_v32  ;;  %v121_v39 = vadd.f32 %v120_v37, %v6430_v6  ;;  %s150_s26 = scalar_lea.vmem %s7608_s1, %s6514_s19  ;;  %s155_s18 = scalar_lea.vmem %s7608_s1, %s6516_s25 }
  0x26   :  { %v126_v40 = vadd.f32 %v125_v38, %v6430_v6  ;;  %v131_v41 = vld [vmem:[%s130_s15] sm:$0x1]  ;;  %117 = vst.msk [vmem:[#allocation2 + $0xd] sm:$0x1] %vm51_vm0, %v116_v36  ;;  %s160_s22 = scalar_lea.vmem %s7608_s1, %s6521_s12  ;;  %s4977_s15 = sld [smem:[#allocation3 + $0x88]] }
  0x27   :  { %v209_v35 = vld [vmem:[#allocation2] sm:$0xff]  ;;  %v132_v43 = vadd.f32 %v131_v41, %v6538_v34  ;;  %122 = vst.msk [vmem:[#allocation2 + $0xe] sm:$0x1] %vm51_vm0, %v121_v39  ;;  %s165_s27 = scalar_lea.vmem %s7608_s1, %s6526_s13  ;;  %s4978_s28 = sld [smem:[#allocation3 + $0x89]] }
  0x28   :  { %5364 = vmatprep.mubr.msk.f32.mxu1 %vm238_vm1, %v209_v35  ;;  %v136_v42 = vld [vmem:[%s135_s23] sm:$0x1]  ;;  %127 = vst.msk [vmem:[#allocation2 + $0xf] sm:$0x1] %vm51_vm0, %v126_v40  ;;  %s4979_s12 = sld [smem:[#allocation3 + $0x8a]]  ;;  %s4980_s23 = sld [smem:[#allocation3 + $0x8b]] }
  0x29   :  { %v137_v44 = vadd.f32 %v136_v42, %v6538_v34  ;;  %v141_v45 = vld [vmem:[%s140_s24] sm:$0x1]  ;;  %133 = vst.msk [vmem:[#allocation2 + $0x10] sm:$0x1] %vm51_vm0, %v132_v43  ;;  %s4981_s2 = sld [smem:[#allocation3 + $0x8c]]  ;;  %s4982_s14 = sld [smem:[#allocation3 + $0x8d]] }
  0x2a   :  { %v146_v46 = vld [vmem:[%s145_s16] sm:$0x1]  ;;  %v142_v47 = vadd.f32 %v141_v45, %v6538_v34  ;;  %s4983_s13 = sld [smem:[#allocation3 + $0x8e]]  ;;  %s4984_s24 = sld [smem:[#allocation3 + $0x8f]] }
  0x2b   :  { %v147_v48 = vadd.f32 %v146_v46, %v6538_v34  ;;  %v151_v49 = vld [vmem:[%s150_s26] sm:$0x1]  ;;  %138 = vst.msk [vmem:[#allocation2 + $0x11] sm:$0x1] %vm51_vm0, %v137_v44  ;;  %s6347_s17 = smov 104   ;;  %s6349_s29 = smov 64  }
  0x2c   :  { %v156_v50 = vld [vmem:[%s155_s18] sm:$0x1]  ;;  %v152_v51 = vadd.f32 %v151_v49, %v6538_v34  ;;  %143 = vst.msk [vmem:[#allocation2 + $0x12] sm:$0x1] %vm51_vm0, %v142_v47  ;;  %s170_s16 = scalar_lea.vmem %s7608_s1, %s4977_s15  ;;  %s6350_s30 = smov 8  }
  0x2d   :  { %v157_v52 = vadd.f32 %v156_v50, %v6538_v34  ;;  %v161_v53 = vld [vmem:[%s160_s22] sm:$0x1]  ;;  %148 = vst.msk [vmem:[#allocation2 + $0x13] sm:$0x1] %vm51_vm0, %v147_v48  ;;  %s175_s26 = scalar_lea.vmem %s7608_s1, %s4978_s28  ;;  %s6351_s28 = smov 16  }
  0x2e   :  { %v162_v54 = vadd.f32 %v161_v53, %v6538_v34  ;;  %v166_v55 = vld [vmem:[%s165_s27] sm:$0x1]  ;;  %153 = vst.msk [vmem:[#allocation2 + $0x14] sm:$0x1] %vm51_vm0, %v152_v51  ;;  %s180_s18 = scalar_lea.vmem %s7608_s1, %s4979_s12  ;;  %s185_s22 = scalar_lea.vmem %s7608_s1, %s4980_s23 }
  0x2f   :  { %158 = vst.msk [vmem:[#allocation2 + $0x15] sm:$0x1] %vm51_vm0, %v157_v52  ;;  %v167_v56 = vadd.f32 %v166_v55, %v6538_v34  ;;  %v210_v57 = vld [vmem:[#allocation2 + $0x8] sm:$0xff]  ;;  %v171_v58 = vld [vmem:[%s170_s16] sm:$0x1]  ;;  %s190_s25 = scalar_lea.vmem %s7608_s1, %s4981_s2  ;;  %s195_s10 = scalar_lea.vmem %s7608_s1, %s4982_s14 }
  0x30   :  { %163 = vst.msk [vmem:[#allocation2 + $0x16] sm:$0x1] %vm51_vm0, %v162_v54  ;;  %5365 = vmatmul.mubr.msk.f32.vlgmr.msra.gmra.mrb[0].mxu1 %vm238_vm1, %v210_v57  ;;  %v172_v59 = vadd.f32 %v171_v58, %v6538_v34  ;;  %v176_v60 = vld [vmem:[%s175_s26] sm:$0x1]  ;;  %s200_s11 = scalar_lea.vmem %s7608_s1, %s4983_s13  ;;  %s205_s2 = scalar_lea.vmem %s7608_s1, %s4984_s24 }
  0x31   :  { %168 = vst.msk [vmem:[#allocation2 + $0x17] sm:$0x1] %vm51_vm0, %v167_v56  ;;  %v177_v61 = vadd.f32 %v176_v60, %v6538_v34  ;;  %v181_v62 = vld [vmem:[%s180_s18] sm:$0x1]  ;;  %s6345_s13 = smov 120   ;;  %s6346_s24 = smov 112  }
  0x32   :  { %v186_v63 = vld [vmem:[%s185_s22] sm:$0x1]  ;;  %173 = vst.msk [vmem:[#allocation2 + $0x18] sm:$0x1] %vm51_vm0, %v172_v59  ;;  %v182_v0 = vadd.f32 %v181_v62, %v6538_v34  ;;  %s6348_s26 = smov 96  }
  0x33   :  { %v187_v1 = vadd.f32 %v186_v63, %v6538_v34  ;;  %v191_v2 = vld [vmem:[%s190_s25] sm:$0x1]  ;;  %178 = vst.msk [vmem:[#allocation2 + $0x19] sm:$0x1] %vm51_vm0, %v177_v61 }
  0x34   :  { %v196_v3 = vld [vmem:[%s195_s10] sm:$0x1]  ;;  %v192_v4 = vadd.f32 %v191_v2, %v6538_v34  ;;  %183 = vst.msk [vmem:[#allocation2 + $0x1a] sm:$0x1] %vm51_vm0, %v182_v0  ;;  %s6352_s10 = smov 24  }
  0x35   :  { %v197_v5 = vadd.f32 %v196_v3, %v6538_v34  ;;  %v201_v6 = vld [vmem:[%s200_s11] sm:$0x1]  ;;  %188 = vst.msk [vmem:[#allocation2 + $0x1b] sm:$0x1] %vm51_vm0, %v187_v1 }
  0x36   :  { %v206_v7 = vld [vmem:[%s205_s2] sm:$0x1]  ;;  %v202_v9 = vadd.f32 %v201_v6, %v6538_v34  ;;  %193 = vst.msk [vmem:[#allocation2 + $0x1c] sm:$0x1] %vm51_vm0, %v192_v4 }
  0x37   :  { %v207_v10 = vadd.f32 %v206_v7, %v6538_v34  ;;  %198 = vst.msk [vmem:[#allocation2 + $0x1d] sm:$0x1] %vm51_vm0, %v197_v5  ;;  %v4985_v12 = vld [vmem:[%s7614_s7] ss:$0 sm:$0xff] }
  0x38   :  { %v211_v8 = vld [vmem:[#allocation2 + $0x10] sm:$0xff]  ;;  %203 = vst.msk [vmem:[#allocation2 + $0x1e] sm:$0x1] %vm51_vm0, %v202_v9 }
  0x39   :  { %5367 = vmatprep.mubr.msk.f32.mxu1 %vm238_vm1, %v211_v8  ;;  %208 = vst.msk [vmem:[#allocation2 + $0x1f] sm:$0x1] %vm51_vm0, %v207_v10 }
  0x40   :  { %v212_v11 = vld [vmem:[#allocation2 + $0x18] sm:$0xff] }
  0x41   :  { %5368 = vmatmul.mubr.msk.f32.gmra.mrb[2].mxu1 %vm238_vm1, %v212_v11 }
 0x103   :  { %v5366_v13 = vpop.f32.mrb[0].mxu1 }
 0x104   :  { %v317_v14 = vpop.f32.mrb[1].mxu1  ;;  %v323_v16 = vadd.f32 %v5366_v13, %v4985_v12 }
 0x105   :  { %v318_v15 = vadd.f32 %v4985_v12, %v317_v14 }
 0x107   :  { %340 = vrot.lane.b32.xlu0 %v318_v15, %s6345_s13  ;;  %5374 = vmatprep.mubr.msk.f32.mxu1 %vm368_vm2, %v318_v15  ;;  %v5974_v21 = vpack.i.bf16 %v323_v16, %v318_v15 }
 0x10b   :  { %342 = vrot.lane.b32.xlu0 %v323_v16, %s6345_s13 }
 0x10f   :  { %348 = vrot.lane.b32.xlu0 %v318_v15, %s6346_s24 }
 0x114   :  { %v5369_v17 = vpop.f32.mrb[2].mxu1 }
 0x115   :  { %v6646_v18 = vadd.f32 %v5369_v17, %v4985_v12  ;;  %v327_v19 = vpop.f32.mrb[3].mxu1 }
 0x116   :  { %v328_v20 = vadd.f32 %v4985_v12, %v327_v19 }
 0x117   :  { %346 = vrot.lane.b32.xlu1 %v6646_v18, %s6345_s13 }
 0x118   :  { %5381 = vmatprep.mubr.msk.f32.mxu0 %vm368_vm2, %v328_v20  ;;  %352 = vrot.lane.b32.xlu0 %v328_v20, %s6346_s24  ;;  %v5979_v22 = vpack.i.bf16 %v6646_v18, %v328_v20 }
 0x11b   :  { %344 = vrot.lane.b32.xlu1 %v328_v20, %s6345_s13 }
 0x11c   :  { %356 = vrot.lane.b32.xlu0 %v318_v15, %s6347_s17 }
 0x11f   :  { %350 = vrot.lane.b32.xlu1 %v323_v16, %s6346_s24 }
 0x120   :  { %360 = vrot.lane.b32.xlu0 %v328_v20, %s6347_s17 }
 0x123   :  { %354 = vrot.lane.b32.xlu1 %v6646_v18, %s6346_s24 }
 0x124   :  { %5975 = vrot.lane.b32.xlu0 %v5974_v21, %s6348_s26 }
 0x127   :  { %358 = vrot.lane.b32.xlu1 %v323_v16, %s6347_s17 }
 0x12b   :  { %362 = vrot.lane.b32.xlu1 %v6646_v18, %s6347_s17 }
 0x12f   :  { %5980 = vrot.lane.b32.xlu1 %v5979_v22, %s6348_s26 }
 0x179   :  { %v341_v23 = vpop.permute.xlu0 %340 }
 0x17d   :  { %v343_v24 = vpop.permute.xlu0 %342 }
 0x17e   :  { %v5984_v25 = vpack.i.bf16 %v343_v24, %v341_v23 }
 0x180   :  { %5985 = vrot.lane.b32.xlu0 %v5984_v25, %s6348_s26 }
 0x181   :  { %v349_v26 = vpop.permute.xlu0 %348 }
 0x189   :  { %v6665_v27 = vpop.permute.xlu1 %346 }
 0x18a   :  { %v6667_v28 = vpop.permute.xlu0 %352 }
 0x18d   :  { %v345_v29 = vpop.permute.xlu1 %344 }
 0x18e   :  { %v5989_v30 = vpack.i.bf16 %v6665_v27, %v345_v29  ;;  %v6670_v31 = vpop.permute.xlu0 %356 }
 0x190   :  { %5990 = vrot.lane.b32.xlu1 %v5989_v30, %s6348_s26 }
 0x191   :  { %v6673_v32 = vpop.permute.xlu1 %350 }
 0x192   :  { %v6676_v33 = vpack.i.bf16 %v6673_v32, %v349_v26  ;;  %v6678_v34 = vpop.permute.xlu0 %360 }
 0x194   :  { %5995 = vrot.lane.b32.xlu0 %v6676_v33, %s6348_s26 }
 0x195   :  { %v6682_v35 = vpop.permute.xlu1 %354 }
 0x196   :  { %v6686_v36 = vpack.i.bf16 %v6682_v35, %v6667_v28  ;;  %v5976_v37 = vpop.permute.xlu0 %5975 }
 0x197   :  { %v5978_v38 = vunpack.i.h.bf16 %v5976_v37  ;;  %v5977_v39 = vunpack.i.l.bf16 %v5976_v37 }
 0x198   :  { %6000 = vrot.lane.b32.xlu1 %v6686_v36, %s6348_s26 }
 0x199   :  { %v6696_v41 = vpop.permute.xlu1 %358  ;;  %v5723_v42 = vpack.c.bf16 %v5978_v38, %v5977_v39 }
 0x19a   :  { %v6700_v43 = vpack.i.bf16 %v6696_v41, %v6670_v31 }
 0x19b   :  { %5725 = vmatprep.subr.msk.bf16.mxu1 %vm6692_vm3, %v5723_v42 }
 0x19c   :  { %6005 = vrot.lane.b32.xlu0 %v6700_v43, %s6348_s26  ;;  %5728 = vmatpush3.bf16.xpose.msk.msra.mxu1 %vm6692_vm3, %v5723_v42 }
 0x19d   :  { %v6708_v44 = vpop.permute.xlu1 %362 }
 0x19e   :  { %v6712_v45 = vpack.i.bf16 %v6708_v44, %v6678_v34 }
 0x1a0   :  { %6020 = vrot.lane.b32.xlu0 %v5979_v22, %s6349_s29  ;;  %6010 = vrot.lane.b32.xlu1 %v6712_v45, %s6348_s26 }
 0x1a1   :  { %v5981_v46 = vpop.permute.xlu1 %5980 }
 0x1a2   :  { %v5983_v47 = vunpack.i.h.bf16 %v5981_v46  ;;  %v5982_v48 = vunpack.i.l.bf16 %v5981_v46 }
 0x1a3   :  { %5375 = vmatmul.mubr.msk.f32.vlgmr.msra.gmra.mrb[4].mxu1 %vm368_vm2, %v323_v16 }
 0x1a4   :  { %6015 = vrot.lane.b32.xlu1 %v5974_v21, %s6349_s29  ;;  %v5729_v49 = vpack.c.bf16 %v5983_v47, %v5982_v48  ;;  %5388 = vmatprep.mubr.msk.f32.mxu1 %vm368_vm2, %v341_v23 }
 0x1a6   :  { %5731 = vmatprep.subr.msk.bf16.mxu0 %vm6692_vm3, %v5729_v49 }
 0x1a7   :  { %5734 = vmatpush3.bf16.xpose.msk.msra.mxu0 %vm6692_vm3, %v5729_v49 }
 0x1a8   :  { %6025 = vrot.lane.b32.xlu1 %v5984_v25, %s6349_s29 }
 0x1ac   :  { %6030 = vrot.lane.b32.xlu1 %v5989_v30, %s6349_s29 }
 0x1ae   :  { %5382 = vmatmul.mubr.msk.f32.vlgmr.msra.gmra.mrb[0].mxu0 %vm368_vm2, %v6646_v18 }
 0x1af   :  { %5395 = vmatprep.mubr.msk.f32.mxu0 %vm368_vm2, %v345_v29 }
 0x1f2   :  { %v5986_v50 = vpop.permute.xlu0 %5985 }
 0x1f3   :  { %v5988_v51 = vunpack.i.h.bf16 %v5986_v50  ;;  %v5987_v52 = vunpack.i.l.bf16 %v5986_v50 }
 0x1f5   :  { %v5735_v53 = vpack.c.bf16 %v5988_v51, %v5987_v52 }
 0x1f7   :  { %5737 = vmatprep.subr.msk.bf16.mxu1 %vm6692_vm3, %v5735_v53 }
 0x1f8   :  { %5740 = vmatpush3.bf16.xpose.msk.msra.mxu1 %vm6692_vm3, %v5735_v53 }
 0x1ff   :  { %5389 = vmatmul.mubr.msk.f32.vlgmr.msra.gmra.mrb[6].mxu1 %vm368_vm2, %v343_v24 }
 0x200   :  { %5402 = vmatprep.mubr.msk.f32.mxu1 %vm368_vm2, %v349_v26 }
 0x202   :  { %v5991_v54 = vpop.permute.xlu1 %5990 }
 0x203   :  { %v5993_v55 = vunpack.i.h.bf16 %v5991_v54  ;;  %v5992_v56 = vunpack.i.l.bf16 %v5991_v54 }
 0x205   :  { %v5741_v57 = vpack.c.bf16 %v5993_v55, %v5992_v56 }
 0x206   :  { %v5996_v58 = vpop.permute.xlu0 %5995 }
 0x207   :  { %v5998_v59 = vunpack.i.h.bf16 %v5996_v58  ;;  %v5997_v60 = vunpack.i.l.bf16 %v5996_v58  ;;  %5743 = vmatprep.subr.msk.bf16.mxu0 %vm6692_vm3, %v5741_v57 }
 0x208   :  { %5746 = vmatpush3.bf16.xpose.msk.msra.mxu0 %vm6692_vm3, %v5741_v57 }
 0x209   :  { %v5747_v61 = vpack.c.bf16 %v5998_v59, %v5997_v60 }
 0x20a   :  { %v6001_v62 = vpop.permute.xlu1 %6000 }
 0x20b   :  { %v6003_v63 = vunpack.i.h.bf16 %v6001_v62  ;;  %v6002_v0 = vunpack.i.l.bf16 %v6001_v62  ;;  %5749 = vmatprep.subr.msk.bf16.mxu1 %vm6692_vm3, %v5747_v61 }
 0x20c   :  { %5752 = vmatpush3.bf16.xpose.msk.msra.mxu1 %vm6692_vm3, %v5747_v61 }
 0x20d   :  { %v5753_v1 = vpack.c.bf16 %v6003_v63, %v6002_v0 }
 0x20e   :  { %v6006_v2 = vpop.permute.xlu0 %6005 }
 0x20f   :  { %v6008_v3 = vunpack.i.h.bf16 %v6006_v2  ;;  %v6007_v4 = vunpack.i.l.bf16 %v6006_v2  ;;  %5396 = vmatmul.mubr.msk.f32.vlgmr.msra.gmra.mrb[2].mxu0 %vm368_vm2, %v6665_v27  ;;  %5755 = vmatprep.subr.msk.bf16.mxu0 %vm6692_vm3, %v5753_v1 }
 0x210   :  { %5758 = vmatpush3.bf16.xpose.msk.msra.mxu0 %vm6692_vm3, %v5753_v1  ;;  %5409 = vmatprep.mubr.msk.f32.mxu0 %vm368_vm2, %v6667_v28 }
 0x211   :  { %v5759_v5 = vpack.c.bf16 %v6008_v3, %v6007_v4 }
 0x212   :  { %v6011_v6 = vpop.permute.xlu1 %6010  ;;  %v6021_v9 = vpop.permute.xlu0 %6020 }
 0x213   :  { %v6013_v7 = vunpack.i.h.bf16 %v6011_v6  ;;  %v6012_v8 = vunpack.i.l.bf16 %v6011_v6  ;;  %5761 = vmatprep.subr.msk.bf16.mxu1 %vm6692_vm3, %v5759_v5  ;;  %5403 = vmatmul.mubr.msk.f32.vlgmr.msra.gmra.mrb[8].mxu1 %vm368_vm2, %v6673_v32  ;;  %v6023_v12 = vunpack.i.h.bf16 %v6021_v9  ;;  %v6022_v13 = vunpack.i.l.bf16 %v6021_v9 }
 0x214   :  { %5764 = vmatpush3.bf16.xpose.msk.msra.mxu1 %vm6692_vm3, %v5759_v5  ;;  %5416 = vmatprep.mubr.msk.f32.mxu1 %vm368_vm2, %v6670_v31 }
 0x215   :  { %v5765_v10 = vpack.c.bf16 %v6013_v7, %v6012_v8  ;;  %v6769_v20 = vpack.c.bf16 %v6023_v12, %v6022_v13 }
 0x216   :  { %v6016_v11 = vpop.permute.xlu1 %6015 }
 0x217   :  { %v6018_v14 = vunpack.i.h.bf16 %v6016_v11  ;;  %v6017_v15 = vunpack.i.l.bf16 %v6016_v11  ;;  %5410 = vmatmul.mubr.msk.f32.vlgmr.msra.gmra.mrb[4].mxu0 %vm368_vm2, %v6682_v35  ;;  %5767 = vmatprep.subr.msk.bf16.mxu0 %vm6692_vm3, %v5765_v10 }
 0x218   :  { %5770 = vmatpush3.bf16.xpose.msk.msra.mxu0 %vm6692_vm3, %v5765_v10  ;;  %5423 = vmatprep.mubr.msk.f32.mxu0 %vm368_vm2, %v6678_v34 }
 0x219   :  { %v5771_v16 = vpack.c.bf16 %v6018_v14, %v6017_v15 }
 0x21a   :  { %v6026_v17 = vpop.permute.xlu1 %6025 }
 0x21b   :  { %v6028_v18 = vunpack.i.h.bf16 %v6026_v17  ;;  %v6027_v19 = vunpack.i.l.bf16 %v6026_v17  ;;  %5772 = vmatprep.subr.bf16.mxu1 %v5771_v16  ;;  %5417 = vmatmul.mubr.msk.f32.vlgmr.msra.gmra.mrb[10].mxu1 %vm368_vm2, %v6696_v41 }
 0x21c   :  { %5774 = vmatpush3.bf16.msra.mxu1 %v5771_v16 }
 0x21d   :  { %5776 = vmatprep.subr.bf16.mxu1 %v6769_v20  ;;  %v5779_v21 = vpack.c.bf16 %v6028_v18, %v6027_v19 }
 0x21e   :  { %v6828_v59 = vpop.permute.xlu1 %6030 }
 0x21f   :  { %5424 = vmatmul.mubr.msk.f32.vlgmr.msra.gmra.mrb[6].mxu0 %vm368_vm2, %v6708_v44  ;;  %5780 = vmatprep.subr.bf16.mxu0 %v5779_v21 }
 0x220   :  { %5782 = vmatpush3.bf16.msra.mxu0 %v5779_v21 }
 0x276   :  { %v5376_v22 = vpop.f32.mrb[4].mxu1 }
 0x277   :  { %v443_v23 = vpop.f32.mrb[5].mxu1  ;;  %v1065_v24 = vsel %vm1061_vm4, %v5376_v22, -inf }
 0x278   :  { %1066 = vmax.xlane.f32.xlu1 %v1065_v24  ;;  %v1062_v25 = vsel %vm1061_vm4, %v443_v23, -inf }
 0x279   :  { %1063 = vmax.xlane.f32.xlu0 %v1062_v25 }
 0x281   :  { %v5383_v26 = vpop.f32.mrb[0].mxu0 }
 0x282   :  { %v530_v27 = vpop.f32.mrb[1].mxu0  ;;  %v1071_v28 = vsel %vm1061_vm4, %v5383_v26, -inf }
 0x283   :  { %1072 = vmax.xlane.f32.xlu1 %v1071_v28  ;;  %v1068_v29 = vsel %vm1061_vm4, %v530_v27, -inf }
 0x284   :  { %1069 = vmax.xlane.f32.xlu0 %v1068_v29 }
 0x2d2   :  { %v6778_v30 = vpop.f32.mrb[6].mxu1 }
 0x2d3   :  { %v6780_v31 = vpop.f32.mrb[7].mxu1  ;;  %v1077_v32 = vsel %vm1061_vm4, %v6778_v30, -inf }
 0x2d4   :  { %1078 = vmax.xlane.f32.xlu0 %v1077_v32  ;;  %v1074_v34 = vsel %vm1061_vm4, %v6780_v31, -inf }
 0x2d8   :  { %1075 = vmax.xlane.f32.xlu0 %v1074_v34 }
 0x2e2   :  { %v6786_v35 = vpop.f32.mrb[2].mxu0 }
 0x2e3   :  { %v6788_v37 = vpop.f32.mrb[3].mxu0  ;;  %v1083_v38 = vsel %vm1061_vm4, %v6786_v35, -inf }
 0x2e4   :  { %1084 = vmax.xlane.f32.xlu1 %v1083_v38  ;;  %v1080_v41 = vsel %vm1061_vm4, %v6788_v37, -inf }
 0x2e6   :  { %v6792_v39 = vpop.f32.mrb[8].mxu1 }
 0x2e7   :  { %v6796_v42 = vpop.f32.mrb[9].mxu1  ;;  %v1089_v44 = vsel %vm1061_vm4, %v6792_v39, -inf }
 0x2e8   :  { %1081 = vmax.xlane.f32.xlu1 %v1080_v41  ;;  %1090 = vmax.xlane.f32.xlu0 %v1089_v44  ;;  %v1086_v49 = vsel %vm1061_vm4, %v6796_v42, -inf }
 0x2ea   :  { %v6800_v46 = vpop.f32.mrb[4].mxu0 }
 0x2eb   :  { %v6802_v47 = vpop.f32.mrb[5].mxu0  ;;  %v1095_v48 = vsel %vm1061_vm4, %v6800_v46, -inf }
 0x2ec   :  { %1096 = vmax.xlane.f32.xlu1 %v1095_v48  ;;  %1087 = vmax.xlane.f32.xlu0 %v1086_v49  ;;  %v1092_v51 = vsel %vm1061_vm4, %v6802_v47, -inf }
 0x2ee   :  { %v6808_v50 = vpop.f32.mrb[10].mxu1 }
 0x2ef   :  { %v6812_v52 = vpop.f32.mrb[11].mxu1  ;;  %v1101_v53 = vsel %vm1061_vm4, %v6808_v50, -inf }
 0x2f0   :  { %1093 = vmax.xlane.f32.xlu1 %v1092_v51  ;;  %1102 = vmax.xlane.f32.xlu0 %v1101_v53  ;;  %v1098_v56 = vsel %vm1061_vm4, %v6812_v52, -inf }
 0x2f2   :  { %v6816_v54 = vpop.f32.mrb[6].mxu0 }
 0x2f3   :  { %v6818_v55 = vpop.f32.mrb[7].mxu0  ;;  %v1107_v58 = vsel %vm1061_vm4, %v6816_v54, -inf }
 0x2f4   :  { %v1104_v57 = vsel %vm1061_vm4, %v6818_v55, -inf  ;;  %1099 = vmax.xlane.f32.xlu0 %v1098_v56 }
 0x2f5   :  { %1105 = vmax.xlane.f32.xlu1 %v1104_v57 }
 0x2f8   :  { %1108 = vmax.xlane.f32.xlu0 %v1107_v58 }
 0x305   :  { %v1067_v60 = vpop.xlane.xlu1 %1066 }
 0x306   :  { %6040 = vrot.lane.b32.xlu1 %v6686_v36, %s6349_s29  ;;  %v1064_v61 = vpop.xlane.xlu0 %1063  ;;  %v1111_v0 = vsub.f32 %v5376_v22, %v1067_v60 }
 0x307   :  { %v1110_v62 = vsub.f32 %v443_v23, %v1064_v61 }
 0x308   :  { %v1128_v4 = vmul.f32 1.442695, %v1111_v0 }
 0x309   :  { %v1126_v1 = vmul.f32 1.442695, %v1110_v62 }
 0x30b   :  { %6134 = vpow2.f32 %v1126_v1 }
 0x30c   :  { %6136 = vpow2.f32 %v1128_v4 }
 0x30e   :  { %6035 = vrot.lane.b32.xlu0 %v6676_v33, %s6349_s29 }
 0x310   :  { %v1073_v63 = vpop.xlane.xlu1 %1072 }
 0x311   :  { %v1113_v2 = vsub.f32 %v5383_v26, %v1073_v63  ;;  %v1070_v3 = vpop.xlane.xlu0 %1069 }
 0x312   :  { %v1112_v6 = vsub.f32 %v530_v27, %v1070_v3 }
 0x313   :  { %v1132_v5 = vmul.f32 1.442695, %v1113_v2 }
 0x314   :  { %v1130_v36 = vmul.f32 1.442695, %v1112_v6 }
 0x315   :  { %6138 = vpow2.f32 %v1132_v5  ;;  %v6832_v7 = vpop.eup %6134 }
 0x316   :  { %6140 = vpow2.f32 %v1130_v36  ;;  %v6834_v8 = vpop.eup %6136  ;;  %v1158_v33 = vsel %vm1061_vm4, %v6832_v7, 0.0 }
 0x317   :  { %v1161_v10 = vsel %vm1061_vm4, %v6834_v8, 0.0 }
 0x31f   :  { %v6838_v9 = vpop.eup %6138 }
 0x320   :  { %v1167_v11 = vsel %vm1061_vm4, %v6838_v9, 0.0  ;;  %v6844_v12 = vpop.eup %6140 }
 0x321   :  { %v1164_v13 = vsel %vm1061_vm4, %v6844_v12, 0.0 }
 0x32a   :  { %1159 = vadd.xlane.f32.xlu1 %v1158_v33 }
 0x32d   :  { %1162 = vadd.xlane.f32.xlu0 %v1161_v10 }
 0x32e   :  { %1168 = vadd.xlane.f32.xlu1 %v1167_v11 }
 0x332   :  { %1165 = vadd.xlane.f32.xlu1 %v1164_v13 }
 0x361   :  { %v1079_v14 = vpop.xlane.xlu0 %1078 }
 0x362   :  { %v1115_v15 = vsub.f32 %v6778_v30, %v1079_v14 }
 0x364   :  { %v1136_v16 = vmul.f32 1.442695, %v1115_v15 }
 0x365   :  { %v1076_v17 = vpop.xlane.xlu0 %1075 }
 0x366   :  { %6142 = vpow2.f32 %v1136_v16  ;;  %v1114_v18 = vsub.f32 %v6780_v31, %v1076_v17 }
 0x368   :  { %v1134_v19 = vmul.f32 1.442695, %v1114_v18 }
 0x36a   :  { %6144 = vpow2.f32 %v1134_v19 }
 0x370   :  { %v6851_v23 = vpop.eup %6142 }
 0x371   :  { %v1085_v21 = vpop.xlane.xlu1 %1084  ;;  %v1173_v25 = vsel %vm1061_vm4, %v6851_v23, 0.0 }
 0x372   :  { %v1117_v22 = vsub.f32 %v6786_v35, %v1085_v21  ;;  %1174 = vadd.xlane.f32.xlu0 %v1173_v25 }
 0x374   :  { %v1140_v24 = vmul.f32 1.442695, %v1117_v22  ;;  %v6857_v30 = vpop.eup %6144 }
 0x375   :  { %v1082_v26 = vpop.xlane.xlu1 %1081  ;;  %v1091_v27 = vpop.xlane.xlu0 %1090  ;;  %v1170_v34 = vsel %vm1061_vm4, %v6857_v30, 0.0 }
 0x376   :  { %6146 = vpow2.f32 %v1140_v24  ;;  %v1116_v28 = vsub.f32 %v6788_v37, %v1082_v26  ;;  %v1119_v29 = vsub.f32 %v6792_v39, %v1091_v27  ;;  %1171 = vadd.xlane.f32.xlu0 %v1170_v34  ;;  %v6033_v34 = vunpack.i.h.bf16 %v6828_v59 }
 0x378   :  { %v1138_v31 = vmul.f32 1.442695, %v1116_v28  ;;  %v1144_v32 = vmul.f32 1.442695, %v1119_v29 }
 0x379   :  { %v1097_v35 = vpop.xlane.xlu1 %1096  ;;  %v1088_v38 = vpop.xlane.xlu0 %1087 }
 0x37a   :  { %6148 = vpow2.f32 %v1138_v31  ;;  %v1121_v41 = vsub.f32 %v6800_v46, %v1097_v35  ;;  %v1118_v44 = vsub.f32 %v6796_v42, %v1088_v38  ;;  %v6032_v35 = vunpack.i.l.bf16 %v6828_v59 }
 0x37b   :  { %6150 = vpow2.f32 %v1144_v32 }
 0x37c   :  { %v1148_v48 = vmul.f32 1.442695, %v1121_v41  ;;  %v1142_v37 = vmul.f32 1.442695, %v1118_v44  ;;  %v5783_v38 = vpack.c.bf16 %v6033_v34, %v6032_v35 }
 0x37d   :  { %v1094_v49 = vpop.xlane.xlu1 %1093  ;;  %v1103_v39 = vpop.xlane.xlu0 %1102 }
 0x37e   :  { %6152 = vpow2.f32 %v1148_v48  ;;  %v1120_v51 = vsub.f32 %v6802_v47, %v1094_v49  ;;  %v1123_v53 = vsub.f32 %v6808_v50, %v1103_v39 }
 0x37f   :  { %6154 = vpow2.f32 %v1142_v37 }
 0x380   :  { %v6865_v56 = vpop.eup %6146  ;;  %v1146_v57 = vmul.f32 1.442695, %v1120_v51  ;;  %v1152_v58 = vmul.f32 1.442695, %v1123_v53 }
 0x381   :  { %v1179_v46 = vsel %vm1061_vm4, %v6865_v56, 0.0  ;;  %v1100_v60 = vpop.xlane.xlu0 %1099 }
 0x382   :  { %6156 = vpow2.f32 %v1146_v57  ;;  %v1106_v42 = vpop.xlane.xlu1 %1105  ;;  %1180 = vadd.xlane.f32.xlu1 %v1179_v46  ;;  %v1122_v61 = vsub.f32 %v6812_v52, %v1100_v60 }
 0x383   :  { %6158 = vpow2.f32 %v1152_v58  ;;  %v1124_v62 = vsub.f32 %v6818_v55, %v1106_v42 }
 0x384   :  { %v6871_v47 = vpop.eup %6148  ;;  %v1150_v50 = vmul.f32 1.442695, %v1122_v61 }
 0x385   :  { %v6873_v63 = vpop.eup %6150  ;;  %v1154_v0 = vmul.f32 1.442695, %v1124_v62  ;;  %v1176_v1 = vsel %vm1061_vm4, %v6871_v47, 0.0  ;;  %v1109_v2 = vpop.xlane.xlu0 %1108 }
 0x386   :  { %6160 = vpow2.f32 %v1150_v50  ;;  %1177 = vadd.xlane.f32.xlu1 %v1176_v1  ;;  %v1125_v3 = vsub.f32 %v6816_v54, %v1109_v2  ;;  %v1185_v52 = vsel %vm1061_vm4, %v6873_v63, 0.0  ;;  %v6041_v25 = vpop.permute.xlu1 %6040 }
 0x387   :  { %6162 = vpow2.f32 %v1154_v0  ;;  %1186 = vadd.xlane.f32.xlu0 %v1185_v52  ;;  %v6043_v48 = vunpack.i.h.bf16 %v6041_v25  ;;  %v6042_v37 = vunpack.i.l.bf16 %v6041_v25 }
 0x388   :  { %v6880_v55 = vpop.eup %6152  ;;  %v1156_v4 = vmul.f32 1.442695, %v1125_v3 }
 0x389   :  { %v6882_v5 = vpop.eup %6154  ;;  %v1191_v6 = vsel %vm1061_vm4, %v6880_v55, 0.0  ;;  %v6036_v36 = vpop.permute.xlu0 %6035  ;;  %v5791_v59 = vpack.c.bf16 %v6043_v48, %v6042_v37 }
 0x38a   :  { %6164 = vpow2.f32 %v1156_v4  ;;  %1192 = vadd.xlane.f32.xlu1 %v1191_v6  ;;  %v6038_v33 = vunpack.i.h.bf16 %v6036_v36  ;;  %v6037_v10 = vunpack.i.l.bf16 %v6036_v36  ;;  %v1182_v54 = vsel %vm1061_vm4, %v6882_v5, 0.0 }
 0x38b   :  { %1183 = vadd.xlane.f32.xlu0 %v1182_v54 }
 0x38c   :  { %v6888_v11 = vpop.eup %6156  ;;  %v6890_v13 = vpack.c.bf16 %v6038_v33, %v6037_v10 }
 0x38d   :  { %v6892_v14 = vpop.eup %6158  ;;  %v1188_v15 = vsel %vm1061_vm4, %v6888_v11, 0.0 }
 0x38e   :  { %1189 = vadd.xlane.f32.xlu1 %v1188_v15  ;;  %v1197_v16 = vsel %vm1061_vm4, %v6892_v14, 0.0  ;;  %5788 = vmatprep.subr.bf16.mxu0 %v6890_v13 }
 0x38f   :  { %1198 = vadd.xlane.f32.xlu0 %v1197_v16 }
 0x390   :  { %v6899_v17 = vpop.eup %6160 }
 0x391   :  { %v6901_v18 = vpop.eup %6162  ;;  %v1194_v19 = vsel %vm1061_vm4, %v6899_v17, 0.0 }
 0x392   :  { %v1200_v21 = vsel %vm1061_vm4, %v6901_v18, 0.0 }
 0x393   :  { %1201 = vadd.xlane.f32.xlu1 %v1200_v21  ;;  %1195 = vadd.xlane.f32.xlu0 %v1194_v19 }
 0x394   :  { %v6907_v22 = vpop.eup %6164 }
 0x395   :  { %v1203_v24 = vsel %vm1061_vm4, %v6907_v22, 0.0 }
 0x397   :  { %1204 = vadd.xlane.f32.xlu0 %v1203_v24 }
 0x3a4   :  { %6050 = vrot.lane.b32.xlu1 %v6712_v45, %s6349_s29 }
 0x3ad   :  { %6045 = vrot.lane.b32.xlu0 %v6700_v43, %s6349_s29 }
 0x3b7   :  { %v1160_v26 = vpop.xlane.xlu1 %1159 }
 0x3b8   :  { %6166 = vrcp.f32 %v1160_v26 }
 0x3ba   :  { %v1163_v27 = vpop.xlane.xlu0 %1162 }
 0x3bb   :  { %v1169_v28 = vpop.xlane.xlu1 %1168  ;;  %6168 = vrcp.f32 %v1163_v27 }
 0x3bc   :  { %6170 = vrcp.f32 %v1169_v28 }
 0x3bf   :  { %v1166_v29 = vpop.xlane.xlu1 %1165 }
 0x3c0   :  { %6172 = vrcp.f32 %v1166_v29 }
 0x3c2   :  { %v6167_v31 = vpop.eup %6166 }
 0x3c3   :  { %v1207_v32 = vmul.f32 %v6167_v31, %v6832_v7 }
 0x3c5   :  { %v6169_v45 = vpop.eup %6168  ;;  %5430 = vmatprep.mubr.msk.f32.mxu1 %vm1061_vm4, %v1207_v32 }
 0x3c6   :  { %v1209_v43 = vmul.f32 %v6169_v45, %v6834_v8  ;;  %v6171_v41 = vpop.eup %6170  ;;  %v219_v45 = vld [vmem:[%s7611_s4 + $0x10] sm:$0xff] }
 0x3c7   :  { %v1213_v49 = vmul.f32 %v6171_v41, %v6838_v9 }
 0x3c8   :  { %5431 = vmatmul.mubr.msk.f32.vlgmr.msra.gmra.mrb[12].mxu1 %vm1061_vm4, %v1209_v43  ;;  %v220_v43 = vld [vmem:[%s7611_s4 + $0x18] sm:$0xff] }
 0x3c9   :  { %5778 = vmatpush3.bf16.msra.mxu1 %v6769_v20 }
 0x3ca   :  { %v6173_v44 = vpop.eup %6172  ;;  %5784 = vmatprep.subr.bf16.mxu1 %v5783_v38 }
 0x3cb   :  { %v1211_v7 = vmul.f32 %v6173_v44, %v6844_v12 }
 0x3cd   :  { %5437 = vmatprep.mubr.msk.f32.mxu1 %vm1061_vm4, %v1211_v7 }
 0x3ce   :  { %5438 = vmatmul.mubr.msk.f32.vlgmr.msra.gmra.mrb[14].mxu1 %vm1061_vm4, %v1213_v49 }
 0x3cf   :  { %5786 = vmatpush3.bf16.msra.mxu1 %v5783_v38  ;;  %v5807_v38 = vpack.c.bf16 %v220_v43, %v219_v45 }
 0x3d0   :  { %5792 = vmatprep.subr.bf16.mxu1 %v5791_v59 }
 0x3ff   :  { %v1175_v8 = vpop.xlane.xlu0 %1174 }
 0x400   :  { %6174 = vrcp.f32 %v1175_v8 }
 0x403   :  { %v1172_v39 = vpop.xlane.xlu0 %1171 }
 0x404   :  { %6176 = vrcp.f32 %v1172_v39 }
 0x40a   :  { %v6175_v51 = vpop.eup %6174 }
 0x40b   :  { %v1217_v9 = vmul.f32 %v6175_v51, %v6851_v23 }
 0x40e   :  { %v6177_v53 = vpop.eup %6176 }
 0x40f   :  { %v1181_v20 = vpop.xlane.xlu1 %1180  ;;  %v1215_v57 = vmul.f32 %v6177_v53, %v6857_v30 }
 0x410   :  { %6178 = vrcp.f32 %v1181_v20 }
 0x411   :  { %5444 = vmatprep.mubr.msk.f32.mxu0 %vm1061_vm4, %v1215_v57 }
 0x412   :  { %5445 = vmatmul.mubr.msk.f32.vlgmr.msra.gmra.mrb[8].mxu0 %vm1061_vm4, %v1217_v9 }
 0x413   :  { %v1178_v12 = vpop.xlane.xlu1 %1177  ;;  %5790 = vmatpush3.bf16.msra.mxu0 %v6890_v13 }
 0x414   :  { %6180 = vrcp.f32 %v1178_v12  ;;  %v1187_v58 = vpop.xlane.xlu0 %1186 }
 0x415   :  { %6182 = vrcp.f32 %v1187_v58 }
 0x417   :  { %v1193_v46 = vpop.xlane.xlu1 %1192 }
 0x418   :  { %v1184_v60 = vpop.xlane.xlu0 %1183 }
 0x419   :  { %6184 = vrcp.f32 %v1184_v60 }
 0x41a   :  { %6186 = vrcp.f32 %v1193_v46  ;;  %v6179_v61 = vpop.eup %6178 }
 0x41b   :  { %v1190_v42 = vpop.xlane.xlu1 %1189  ;;  %v1221_v1 = vmul.f32 %v6179_v61, %v6865_v56 }
 0x41c   :  { %6188 = vrcp.f32 %v1190_v42  ;;  %v1199_v30 = vpop.xlane.xlu0 %1198 }
 0x41d   :  { %6190 = vrcp.f32 %v1199_v30 }
 0x41e   :  { %v6181_v62 = vpop.eup %6180 }
 0x41f   :  { %v1219_v23 = vmul.f32 %v6181_v62, %v6871_v47  ;;  %v6183_v2 = vpop.eup %6182 }
 0x420   :  { %v1202_v50 = vpop.xlane.xlu1 %1201  ;;  %v1196_v0 = vpop.xlane.xlu0 %1195  ;;  %v1225_v10 = vmul.f32 %v6183_v2, %v6873_v63 }
 0x421   :  { %6192 = vrcp.f32 %v1202_v50  ;;  %5451 = vmatprep.mubr.msk.f32.mxu1 %vm1061_vm4, %v1219_v23 }
 0x422   :  { %6194 = vrcp.f32 %v1196_v0  ;;  %5452 = vmatmul.mubr.msk.f32.vlgmr.msra.gmra.mrb[16].mxu1 %vm1061_vm4, %v1221_v1 }
 0x423   :  { %v6185_v3 = vpop.eup %6184  ;;  %5794 = vmatpush3.bf16.msra.mxu1 %v5791_v59 }
 0x424   :  { %v6051_v52 = vpop.permute.xlu1 %6050  ;;  %v1205_v4 = vpop.xlane.xlu0 %1204  ;;  %v1223_v6 = vmul.f32 %v6185_v3, %v6882_v5 }
 0x425   :  { %v6187_v36 = vpop.eup %6186  ;;  %v6053_v47 = vunpack.i.h.bf16 %v6051_v52  ;;  %v6052_v33 = vunpack.i.l.bf16 %v6051_v52  ;;  %6196 = vrcp.f32 %v1205_v4 }
 0x426   :  { %v6189_v56 = vpop.eup %6188  ;;  %5458 = vmatprep.mubr.msk.f32.mxu0 %vm1061_vm4, %v1223_v6  ;;  %v1229_v16 = vmul.f32 %v6187_v36, %v6880_v55 }
 0x427   :  { %5459 = vmatmul.mubr.msk.f32.vlgmr.msra.gmra.mrb[10].mxu0 %vm1061_vm4, %v1225_v10  ;;  %v1227_v54 = vmul.f32 %v6189_v56, %v6888_v11  ;;  %v5799_v13 = vpack.c.bf16 %v6053_v47, %v6052_v33  ;;  %v6191_v5 = vpop.eup %6190  ;;  %v5038_v10 = vld [vmem:[%s7614_s7 + $0x1] ss:$0 sm:$0xff] }
 0x428   :  { %v6046_v15 = vpop.permute.xlu0 %6045  ;;  %v1233_v27 = vmul.f32 %v6191_v5, %v6892_v14  ;;  %v217_v14 = vld [vmem:[%s7611_s4] sm:$0xff] }
 0x429   :  { %v6048_v19 = vunpack.i.h.bf16 %v6046_v15  ;;  %v6047_v21 = vunpack.i.l.bf16 %v6046_v15  ;;  %5465 = vmatprep.mubr.msk.f32.mxu1 %vm1061_vm4, %v1227_v54  ;;  %5800 = vmatprep.subr.bf16.mxu1 %v5799_v13  ;;  %v6303_v5 = vld [vmem:[#allocation2] sm:$0xff] }
 0x42a   :  { %5466 = vmatmul.mubr.msk.f32.vlgmr.msra.gmra.mrb[18].mxu1 %vm1061_vm4, %v1229_v16  ;;  %v6302_v16 = vld [vmem:[#allocation2 + $0x8] sm:$0xff] }
 0x42b   :  { %v6193_v63 = vpop.eup %6192  ;;  %5802 = vmatpush3.bf16.msra.mxu1 %v5799_v13  ;;  %v5795_v24 = vpack.c.bf16 %v6048_v19, %v6047_v21 }
 0x42c   :  { %v6195_v25 = vpop.eup %6194  ;;  %v1235_v26 = vmul.f32 %v6193_v63, %v6901_v18 }
 0x42d   :  { %5796 = vmatprep.subr.bf16.mxu0 %v5795_v24  ;;  %v1231_v11 = vmul.f32 %v6195_v25, %v6899_v17 }
 0x42e   :  { %5798 = vmatpush3.bf16.msra.mxu0 %v5795_v24  ;;  %5479 = vmatprep.mubr.msk.f32.mxu1 %vm1061_vm4, %v1235_v26 }
 0x42f   :  { %v6197_v55 = vpop.eup %6196  ;;  %5472 = vmatprep.mubr.msk.f32.mxu0 %vm1061_vm4, %v1231_v11 }
 0x430   :  { %v1237_v28 = vmul.f32 %v6197_v55, %v6907_v22  ;;  %v218_v22 = vld [vmem:[%s7611_s4 + $0x8] sm:$0xff] }
 0x431   :  { %5473 = vmatmul.mubr.msk.f32.vlgmr.msra.gmra.mrb[12].mxu0 %vm1061_vm4, %v1233_v27  ;;  %v5803_v35 = vpack.c.bf16 %v218_v22, %v217_v14  ;;  %v6304_v27 = vld [vmem:[#allocation2 + $0x10] sm:$0xff] }
 0x432   :  { %5480 = vmatmul.mubr.msk.f32.vlgmr.msra.gmra.mrb[20].mxu1 %vm1061_vm4, %v1237_v28 }
 0x433   :  { %5804 = vmatprep.subr.bf16.mxu0 %v5803_v35 }
 0x434   :  { %5806 = vmatpush3.bf16.msra.mxu0 %v5803_v35 }
 0x435   :  { %5808 = vmatprep.subr.bf16.mxu0 %v5807_v38 }
 0x438   :  { %5810 = vmatpush3.bf16.msra.mxu0 %v5807_v38 }
 0x49b   :  { %v5432_v29 = vpop.f32.mrb[12].mxu1 }
 0x49c   :  { %v1316_v31 = vpop.f32.mrb[13].mxu1 }
 0x4a1   :  { %v5439_v18 = vpop.f32.mrb[14].mxu1 }
 0x4a2   :  { %v1403_v32 = vpop.f32.mrb[15].mxu1 }
 0x4e5   :  { %v5446_v34 = vpop.f32.mrb[8].mxu0 }
 0x4e6   :  { %1940 = vrot.lane.b32.xlu1 %v5446_v34, %s6350_s30  ;;  %v1490_v17 = vpop.f32.mrb[9].mxu0 }
 0x4e7   :  { %1938 = vrot.lane.b32.xlu0 %v1490_v17, %s6350_s30 }
 0x4f5   :  { %v5453_v41 = vpop.f32.mrb[16].mxu1 }
 0x4f6   :  { %v1577_v44 = vpop.f32.mrb[17].mxu1  ;;  %1944 = vrot.lane.b32.xlu1 %v5453_v41, %s6350_s30 }
 0x4f7   :  { %1942 = vrot.lane.b32.xlu0 %v1577_v44, %s6350_s30 }
 0x4fa   :  { %v5460_v48 = vpop.f32.mrb[10].mxu0 }
 0x4fb   :  { %1956 = vrot.lane.b32.xlu1 %v5460_v48, %s6351_s28  ;;  %v1664_v37 = vpop.f32.mrb[11].mxu0 }
 0x4fc   :  { %1954 = vrot.lane.b32.xlu0 %v1664_v37, %s6351_s28 }
 0x4fd   :  { %v5467_v7 = vpop.f32.mrb[18].mxu1 }
 0x4fe   :  { %v1751_v49 = vpop.f32.mrb[19].mxu1 }
 0x4ff   :  { %1960 = vrot.lane.b32.xlu1 %v5467_v7, %s6351_s28 }
 0x500   :  { %1958 = vrot.lane.b32.xlu0 %v1751_v49, %s6351_s28 }
 0x504   :  { %v5474_v59 = vpop.f32.mrb[12].mxu0 }
 0x505   :  { %v5481_v8 = vpop.f32.mrb[20].mxu1  ;;  %1972 = vrot.lane.b32.xlu1 %v5474_v59, %s6352_s10  ;;  %v1838_v39 = vpop.f32.mrb[13].mxu0 }
 0x506   :  { %v1925_v20 = vpop.f32.mrb[21].mxu1  ;;  %1970 = vrot.lane.b32.xlu0 %v1838_v39, %s6352_s10 }
 0x509   :  { %1976 = vrot.lane.b32.xlu1 %v5481_v8, %s6352_s10 }
 0x50a   :  { %1974 = vrot.lane.b32.xlu0 %v1925_v20, %s6352_s10 }
 0x558   :  { %v1941_v51 = vpop.permute.xlu1 %1940 }
 0x559   :  { %v1939_v53 = vpop.permute.xlu0 %1938  ;;  %v1983_v61 = vsel %vm368_vm2, %v5432_v29, %v1941_v51 }
 0x55a   :  { %v1982_v42 = vsel %vm368_vm2, %v1316_v31, %v1939_v53  ;;  %v6305_v31 = vld [vmem:[#allocation2 + $0x18] sm:$0xff] }
 0x568   :  { %v1945_v57 = vpop.permute.xlu1 %1944 }
 0x569   :  { %v1943_v12 = vpop.permute.xlu0 %1942  ;;  %v1985_v52 = vsel %vm368_vm2, %v5439_v18, %v1945_v57  ;;  %v221_v57 = vld [vmem:[%s7612_s5] sm:$0xff] }
 0x56a   :  { %v1984_v2 = vsel %vm368_vm2, %v1403_v32, %v1943_v12  ;;  %v222_v12 = vld [vmem:[%s7612_s5 + $0x8] sm:$0xff] }
 0x56d   :  { %v1957_v9 = vpop.permute.xlu1 %1956 }
 0x56e   :  { %v1955_v58 = vpop.permute.xlu0 %1954  ;;  %v1987_v50 = vsel %vm1061_vm4, %v1983_v61, %v1957_v9  ;;  %v5811_v9 = vpack.c.bf16 %v222_v12, %v221_v57  ;;  %v227_v61 = vld [vmem:[%s7613_s6 + $0x10] sm:$0xff] }
 0x56f   :  { %v1986_v62 = vsel %vm1061_vm4, %v1982_v42, %v1955_v58  ;;  %v223_v58 = vld [vmem:[%s7612_s5 + $0x10] sm:$0xff]  ;;  %v225_v42 = vld [vmem:[%s7613_s6] sm:$0xff] }
 0x570   :  { %5812 = vmatprep.subr.bf16.mxu1 %v5811_v9 }
 0x571   :  { %v1961_v46 = vpop.permute.xlu1 %1960  ;;  %5814 = vmatpush3.bf16.msra.mxu1 %v5811_v9 }
 0x572   :  { %v1959_v60 = vpop.permute.xlu0 %1958  ;;  %v1989_v36 = vsel %vm1061_vm4, %v1985_v52, %v1961_v46  ;;  %v224_v46 = vld [vmem:[%s7612_s5 + $0x18] sm:$0xff] }
 0x573   :  { %v1988_v4 = vsel %vm1061_vm4, %v1984_v2, %v1959_v60  ;;  %v5815_v60 = vpack.c.bf16 %v224_v46, %v223_v58 }
 0x575   :  { %5816 = vmatprep.subr.bf16.mxu1 %v5815_v60 }
 0x576   :  { %5818 = vmatpush3.bf16.msra.mxu1 %v5815_v60 }
 0x577   :  { %v1973_v30 = vpop.permute.xlu1 %1972 }
 0x578   :  { %v1971_v23 = vpop.permute.xlu0 %1970  ;;  %v1992_v1 = vsel %vm1990_vm5, %v1987_v50, %v1973_v30  ;;  %v226_v30 = vld [vmem:[%s7613_s6 + $0x8] sm:$0xff] }
 0x579   :  { %v1991_v0 = vsel %vm1990_vm5, %v1986_v62, %v1971_v23  ;;  %v5819_v62 = vpack.c.bf16 %v226_v30, %v225_v42  ;;  %v228_v23 = vld [vmem:[%s7613_s6 + $0x18] sm:$0xff] }
 0x57a   :  { %5490 = vmatprep.mubr.msk.f32.mxu0 %vm238_vm1, %v1991_v0  ;;  %v5823_v50 = vpack.c.bf16 %v228_v23, %v227_v61  ;;  %v229_v0 = vld [vmem:[%s7613_s6 + $0x20] sm:$0xff] }
 0x57b   :  { %v1977_v3 = vpop.permute.xlu1 %1976  ;;  %5491 = vmatmul.mubr.msk.f32.vlgmr.msra.gmra.mrb[14].mxu0 %vm238_vm1, %v1992_v1  ;;  %v230_v1 = vld [vmem:[%s7613_s6 + $0x28] sm:$0xff]  ;;  %5820 = vmatprep.subr.bf16.mxu0 %v5819_v62 }
 0x57c   :  { %v1975_v6 = vpop.permute.xlu0 %1974  ;;  %v1994_v33 = vsel %vm1990_vm5, %v1989_v36, %v1977_v3  ;;  %5822 = vmatpush3.bf16.msra.mxu0 %v5819_v62  ;;  %v5827_v2 = vpack.c.bf16 %v230_v1, %v229_v0 }
 0x57d   :  { %v1993_v47 = vsel %vm1990_vm5, %v1988_v4, %v1975_v6  ;;  %5824 = vmatprep.subr.bf16.mxu0 %v5823_v50 }
 0x57e   :  { %5493 = vmatprep.mubr.msk.f32.mxu0 %vm238_vm1, %v1993_v47 }
 0x57f   :  { %5494 = vmatmul.mubr.msk.f32.gmra.mrb[16].mxu0 %vm238_vm1, %v1994_v33 }
 0x580   :  { %5826 = vmatpush3.bf16.msra.mxu0 %v5823_v50 }
 0x581   :  { %5828 = vmatprep.subr.bf16.mxu0 %v5827_v2 }
 0x584   :  { %5830 = vmatpush3.bf16.msra.mxu0 %v5827_v2 }
 0x64e   :  { %v5492_v56 = vpop.f32.mrb[14].mxu0 }
 0x64f   :  { %v2084_v54 = vadd.f32 %v5492_v56, %v5038_v10  ;;  %v2078_v13 = vpop.f32.mrb[15].mxu0 }
 0x650   :  { %v2079_v15 = vadd.f32 %v5038_v10, %v2078_v13 }
 0x651   :  { %v2098_v19 = vadd.f32 %v6302_v16, %v2084_v54 }
 0x652   :  { %v5495_v21 = vpop.f32.mrb[16].mxu0  ;;  %v2097_v63 = vadd.f32 %v6303_v5, %v2079_v15 }
 0x653   :  { %v2088_v24 = vpop.f32.mrb[17].mxu0  ;;  %v2106_v25 = vsel %vm238_vm1, %v2098_v19, 0.0  ;;  %v2094_v26 = vadd.f32 %v5495_v21, %v5038_v10 }
 0x654   :  { %v2089_v11 = vadd.f32 %v5038_v10, %v2088_v24  ;;  %2107 = vadd.xlane.f32.xlu1 %v2106_v25  ;;  %v2103_v55 = vsel %vm238_vm1, %v2097_v63, 0.0  ;;  %v5044_v24 = vld [vmem:[%s7614_s7 + $0x5] ss:$0 sm:$0xff] }
 0x655   :  { %2104 = vadd.xlane.f32.xlu0 %v2103_v55  ;;  %v2100_v18 = vadd.f32 %v6305_v31, %v2094_v26 }
 0x656   :  { %v2099_v28 = vadd.f32 %v6304_v27, %v2089_v11 }
 0x657   :  { %v2112_v32 = vsel %vm238_vm1, %v2100_v18, 0.0 }
 0x658   :  { %v2109_v29 = vsel %vm238_vm1, %v2099_v28, 0.0 }
 0x659   :  { %2110 = vadd.xlane.f32.xlu0 %v2109_v29 }
 0x65d   :  { %2113 = vadd.xlane.f32.xlu0 %v2112_v32 }
 0x6e1   :  { %v2108_v34 = vpop.xlane.xlu1 %2107 }
 0x6e2   :  { %v2117_v17 = vmul.f32 0.03125, %v2108_v34  ;;  %v2105_v14 = vpop.xlane.xlu0 %2104 }
 0x6e3   :  { %v2116_v22 = vmul.f32 0.03125, %v2105_v14  ;;  %v231_v14 = vld [vmem:[%s7613_s6 + $0x30] sm:$0xff] }
 0x6e4   :  { %v6998_v35 = vsub.f32 %v2098_v19, %v2117_v17  ;;  %v5043_v19 = vld [vmem:[%s7614_s7 + $0x4] ss:$0 sm:$0xff] }
 0x6e5   :  { %v7000_v45 = vsub.f32 %v2097_v63, %v2116_v22  ;;  %v232_v22 = vld [vmem:[%s7613_s6 + $0x38] sm:$0xff] }
 0x6e6   :  { %v2111_v43 = vpop.xlane.xlu0 %2110  ;;  %v2125_v38 = vmul.f32 %v6998_v35, %v6998_v35 }
 0x6e7   :  { %v2118_v41 = vmul.f32 0.03125, %v2111_v43  ;;  %v2124_v44 = vmul.f32 %v7000_v45, %v7000_v45 }
 0x6e8   :  { %v2131_v48 = vsel %vm238_vm1, %v2125_v38, 0.0 }
 0x6e9   :  { %v7007_v37 = vsub.f32 %v2099_v28, %v2118_v41  ;;  %2132 = vadd.xlane.f32.xlu0 %v2131_v48  ;;  %v2128_v7 = vsel %vm238_vm1, %v2124_v44, 0.0 }
 0x6ea   :  { %2129 = vadd.xlane.f32.xlu1 %v2128_v7  ;;  %v2114_v49 = vpop.xlane.xlu0 %2113 }
 0x6eb   :  { %v2119_v59 = vmul.f32 0.03125, %v2114_v49  ;;  %v2126_v8 = vmul.f32 %v7007_v37, %v7007_v37 }
 0x6ed   :  { %v7012_v39 = vsub.f32 %v2100_v18, %v2119_v59  ;;  %v2134_v20 = vsel %vm238_vm1, %v2126_v8, 0.0 }
 0x6ee   :  { %2135 = vadd.xlane.f32.xlu1 %v2134_v20 }
 0x6ef   :  { %v2127_v51 = vmul.f32 %v7012_v39, %v7012_v39 }
 0x6f1   :  { %v2137_v53 = vsel %vm238_vm1, %v2127_v51, 0.0  ;;  %v5050_v51 = vld [vmem:[%s7614_s7 + $0x3] ss:$0 sm:$0xff] }
 0x6f2   :  { %2138 = vadd.xlane.f32.xlu0 %v2137_v53 }
 0x776   :  { %v2133_v3 = vpop.xlane.xlu0 %2132 }
 0x777   :  { %v2141_v52 = vmul.f32 0.03125, %v2133_v3  ;;  %v2130_v4 = vpop.xlane.xlu1 %2129 }
 0x778   :  { %v2140_v6 = vmul.f32 0.03125, %v2130_v4 }
 0x779   :  { %v2145_v36 = vadd.f32 1e-05, %v2141_v52 }
 0x77a   :  { %v2144_v47 = vadd.f32 1e-05, %v2140_v6 }
 0x77b   :  { %6198 = vrsqrt.f32 %v2145_v36  ;;  %v2136_v33 = vpop.xlane.xlu1 %2135 }
 0x77c   :  { %6200 = vrsqrt.f32 %v2144_v47  ;;  %v2142_v10 = vmul.f32 0.03125, %v2136_v33 }
 0x77e   :  { %v2146_v56 = vadd.f32 1e-05, %v2142_v10 }
 0x77f   :  { %v2139_v54 = vpop.xlane.xlu0 %2138 }
 0x780   :  { %6202 = vrsqrt.f32 %v2146_v56  ;;  %v2143_v13 = vmul.f32 0.03125, %v2139_v54 }
 0x782   :  { %v2147_v15 = vadd.f32 1e-05, %v2143_v13 }
 0x784   :  { %6204 = vrsqrt.f32 %v2147_v15 }
 0x785   :  { %v6199_v16 = vpop.eup %6198 }
 0x786   :  { %v6201_v21 = vpop.eup %6200  ;;  %v2153_v5 = vmul.f32 %v6199_v16, %v6998_v35  ;;  %v5831_v35 = vpack.c.bf16 %v232_v22, %v231_v14 }
 0x787   :  { %v2152_v63 = vmul.f32 %v6201_v21, %v7000_v45  ;;  %v5045_v45 = vld [vmem:[%s7614_s7 + $0x2] ss:$0 sm:$0xff] }
 0x788   :  { %v2161_v25 = vmul.f32 %v5043_v19, %v2153_v5  ;;  %5832 = vmatprep.subr.bf16.mxu0 %v5831_v35 }
 0x789   :  { %v2160_v26 = vmul.f32 %v5043_v19, %v2152_v63  ;;  %5834 = vmatpush3.bf16.msra.mxu0 %v5831_v35 }
 0x78a   :  { %v6203_v11 = vpop.eup %6202  ;;  %v2169_v28 = vadd.f32 %v5044_v24, %v2161_v25 }
 0x78b   :  { %v2168_v55 = vadd.f32 %v5044_v24, %v2160_v26  ;;  %v2154_v27 = vmul.f32 %v6203_v11, %v7007_v37  ;;  %v5057_v11 = vld [vmem:[%s7610_s3 + $0x20] sm:$0xff] }
 0x78d   :  { %5504 = vmatprep.mubr.msk.f32.mxu1 %vm238_vm1, %v2168_v55  ;;  %v2162_v29 = vmul.f32 %v5043_v19, %v2154_v27 }
 0x78e   :  { %v6205_v31 = vpop.eup %6204  ;;  %5505 = vmatmul.mubr.msk.f32.vlgmr.msra.gmra.mrb[22].mxu1 %vm238_vm1, %v2169_v28 }
 0x78f   :  { %v2170_v18 = vadd.f32 %v5044_v24, %v2162_v29  ;;  %v2155_v32 = vmul.f32 %v6205_v31, %v7012_v39  ;;  %v5060_v29 = vld [vmem:[%s7610_s3 + $0x38] sm:$0xff] }
 0x791   :  { %5507 = vmatprep.mubr.msk.f32.mxu1 %vm238_vm1, %v2170_v18  ;;  %v2163_v34 = vmul.f32 %v5043_v19, %v2155_v32 }
 0x793   :  { %v2171_v17 = vadd.f32 %v5044_v24, %v2163_v34 }
 0x795   :  { %5508 = vmatmul.mubr.msk.f32.gmra.mrb[24].mxu1 %vm238_vm1, %v2171_v17 }
 0x861   :  { %v5506_v43 = vpop.f32.mrb[22].mxu1 }
 0x862   :  { %v2261_v38 = vadd.f32 %v5506_v43, %v5045_v45  ;;  %v2255_v41 = vpop.f32.mrb[23].mxu1 }
 0x863   :  { %v2256_v44 = vadd.f32 %v5045_v45, %v2255_v41 }
 0x864   :  { %v2275_v37 = vmax.f32 %v2261_v38, 0.0 }
 0x865   :  { %v2274_v48 = vmax.f32 %v2256_v44, 0.0 }
 0x867   :  { %5526 = vmatprep.mubr.msk.f32.mxu0 %vm2283_vm6, %v2274_v48 }
 0x868   :  { %v5509_v7 = vpop.f32.mrb[24].mxu1  ;;  %5527 = vmatmul.mubr.msk.f32.vlgmr.msra.gmra.mrb[18].mxu0 %vm2283_vm6, %v2275_v37  ;;  %v5055_v37 = vld [vmem:[%s7614_s7 + $0x6] ss:$0 sm:$0xff] }
 0x869   :  { %v2271_v49 = vadd.f32 %v5509_v7, %v5045_v45  ;;  %v2265_v59 = vpop.f32.mrb[25].mxu1 }
 0x86a   :  { %v2266_v8 = vadd.f32 %v5045_v45, %v2265_v59 }
 0x86b   :  { %v2277_v20 = vmax.f32 %v2271_v49, 0.0 }
 0x86c   :  { %v2276_v39 = vmax.f32 %v2266_v8, 0.0  ;;  %v5056_v8 = vld [vmem:[%s7614_s7 + $0x7] ss:$0 sm:$0xff] }
 0x86e   :  { %5529 = vmatprep.mubr.msk.f32.mxu0 %vm2283_vm6, %v2276_v39 }
 0x86f   :  { %5530 = vmatmul.mubr.msk.f32.gmra.mrb[20].mxu0 %vm2283_vm6, %v2277_v20 }
 0x93b   :  { %v5528_v53 = vpop.f32.mrb[18].mxu0 }
 0x93c   :  { %v2368_v57 = vadd.f32 %v5528_v53, %v5050_v51  ;;  %v2362_v12 = vpop.f32.mrb[19].mxu0 }
 0x93d   :  { %v2363_v9 = vadd.f32 %v5050_v51, %v2362_v12 }
 0x93e   :  { %v2382_v58 = vadd.f32 %v2368_v57, %v2169_v28  ;;  %v5059_v28 = vld [vmem:[%s7610_s3 + $0x30] sm:$0xff] }
 0x93f   :  { %v2381_v46 = vadd.f32 %v2363_v9, %v2168_v55  ;;  %v5058_v55 = vld [vmem:[%s7610_s3 + $0x28] sm:$0xff]  ;;  %v5839_v31 = vpack.c.bf16 %v5060_v29, %v5059_v28 }
 0x940   :  { %v2390_v60 = vsel %vm238_vm1, %v2382_v58, 0.0  ;;  %v5835_v27 = vpack.c.bf16 %v5058_v55, %v5057_v11 }
 0x941   :  { %2391 = vadd.xlane.f32.xlu0 %v2390_v60  ;;  %v2387_v42 = vsel %vm238_vm1, %v2381_v46, 0.0 }
 0x942   :  { %2388 = vadd.xlane.f32.xlu1 %v2387_v42  ;;  %v5531_v30 = vpop.f32.mrb[20].mxu0  ;;  %5836 = vmatprep.subr.bf16.mxu1 %v5835_v27 }
 0x943   :  { %v2378_v61 = vadd.f32 %v5531_v30, %v5050_v51  ;;  %v2372_v62 = vpop.f32.mrb[21].mxu0  ;;  %5838 = vmatpush3.bf16.msra.mxu1 %v5835_v27 }
 0x944   :  { %v2373_v23 = vadd.f32 %v5050_v51, %v2372_v62  ;;  %5840 = vmatprep.subr.bf16.mxu1 %v5839_v31 }
 0x945   :  { %v2384_v50 = vadd.f32 %v2378_v61, %v2171_v17  ;;  %v5077_v61 = vld [vmem:[%s7614_s7 + $0x8] ss:$0 sm:$0xff] }
 0x946   :  { %v2383_v0 = vadd.f32 %v2373_v23, %v2170_v18 }
 0x947   :  { %v2396_v1 = vsel %vm238_vm1, %v2384_v50, 0.0  ;;  %5842 = vmatpush3.bf16.msra.mxu1 %v5839_v31 }
 0x948   :  { %2397 = vadd.xlane.f32.xlu0 %v2396_v1  ;;  %v2393_v2 = vsel %vm238_vm1, %v2383_v0, 0.0 }
 0x949   :  { %2394 = vadd.xlane.f32.xlu1 %v2393_v2 }
 0x9ce   :  { %v2392_v3 = vpop.xlane.xlu0 %2391 }
 0x9cf   :  { %v2400_v52 = vmul.f32 0.03125, %v2392_v3  ;;  %v2389_v4 = vpop.xlane.xlu1 %2388 }
 0x9d0   :  { %v2399_v6 = vmul.f32 0.03125, %v2389_v4 }
 0x9d1   :  { %v2404_v36 = vsub.f32 %v2382_v58, %v2400_v52 }
 0x9d2   :  { %v2403_v47 = vsub.f32 %v2381_v46, %v2399_v6 }
 0x9d3   :  { %v2408_v33 = vmul.f32 %v2404_v36, %v2404_v36 }
 0x9d4   :  { %v2407_v10 = vmul.f32 %v2403_v47, %v2403_v47 }
 0x9d5   :  { %v2398_v56 = vpop.xlane.xlu0 %2397  ;;  %v2414_v54 = vsel %vm238_vm1, %v2408_v33, 0.0 }
 0x9d6   :  { %v2402_v13 = vmul.f32 0.03125, %v2398_v56  ;;  %v2395_v15 = vpop.xlane.xlu1 %2394  ;;  %2415 = vadd.xlane.f32.xlu0 %v2414_v54  ;;  %v2411_v16 = vsel %vm238_vm1, %v2407_v10, 0.0 }
 0x9d7   :  { %v2401_v19 = vmul.f32 0.03125, %v2395_v15  ;;  %2412 = vadd.xlane.f32.xlu1 %v2411_v16 }
 0x9d8   :  { %v2406_v21 = vsub.f32 %v2384_v50, %v2402_v13 }
 0x9d9   :  { %v2405_v5 = vsub.f32 %v2383_v0, %v2401_v19 }
 0x9da   :  { %v2410_v63 = vmul.f32 %v2406_v21, %v2406_v21 }
 0x9db   :  { %v2409_v24 = vmul.f32 %v2405_v5, %v2405_v5 }
 0x9dc   :  { %v2420_v25 = vsel %vm238_vm1, %v2410_v63, 0.0 }
 0x9dd   :  { %2421 = vadd.xlane.f32.xlu0 %v2420_v25  ;;  %v2417_v26 = vsel %vm238_vm1, %v2409_v24, 0.0 }
 0x9de   :  { %2418 = vadd.xlane.f32.xlu1 %v2417_v26 }
 0xa63   :  { %v2416_v18 = vpop.xlane.xlu0 %2415 }
 0xa64   :  { %v2424_v32 = vmul.f32 0.03125, %v2416_v18  ;;  %v2413_v34 = vpop.xlane.xlu1 %2412 }
 0xa65   :  { %v2423_v17 = vmul.f32 0.03125, %v2413_v34 }
 0xa66   :  { %v2428_v14 = vadd.f32 1e-05, %v2424_v32 }
 0xa67   :  { %v2427_v22 = vadd.f32 1e-05, %v2423_v17 }
 0xa68   :  { %6206 = vrsqrt.f32 %v2428_v14 }
 0xa69   :  { %6208 = vrsqrt.f32 %v2427_v22 }
 0xa6a   :  { %v2422_v35 = vpop.xlane.xlu0 %2421 }
 0xa6b   :  { %v2426_v45 = vmul.f32 0.03125, %v2422_v35  ;;  %v2419_v43 = vpop.xlane.xlu1 %2418 }
 0xa6c   :  { %v2425_v38 = vmul.f32 0.03125, %v2419_v43 }
 0xa6d   :  { %v2430_v41 = vadd.f32 1e-05, %v2426_v45 }
 0xa6e   :  { %v2429_v44 = vadd.f32 1e-05, %v2425_v38 }
 0xa6f   :  { %6210 = vrsqrt.f32 %v2430_v41 }
 0xa70   :  { %6212 = vrsqrt.f32 %v2429_v44 }
 0xa72   :  { %v6207_v48 = vpop.eup %6206 }
 0xa73   :  { %v6209_v7 = vpop.eup %6208  ;;  %v2436_v49 = vmul.f32 %v6207_v48, %v2404_v36 }
 0xa74   :  { %v2435_v59 = vmul.f32 %v6209_v7, %v2403_v47 }
 0xa75   :  { %v2444_v39 = vmul.f32 %v5055_v37, %v2436_v49 }
 0xa76   :  { %v2443_v20 = vmul.f32 %v5055_v37, %v2435_v59 }
 0xa77   :  { %v7106_v57 = vadd.f32 %v5056_v8, %v2444_v39 }
 0xa78   :  { %v7104_v51 = vadd.f32 %v5056_v8, %v2443_v20 }
 0xa79   :  { %v6211_v53 = vpop.eup %6210 }
 0xa7a   :  { %v6213_v12 = vpop.eup %6212  ;;  %5540 = vmatprep.mubr.msk.f32.mxu1 %vm238_vm1, %v7104_v51  ;;  %v2438_v9 = vmul.f32 %v6211_v53, %v2406_v21 }
 0xa7b   :  { %5541 = vmatmul.mubr.msk.f32.vlgmr.msra.gmra.mrb[26].mxu1 %vm238_vm1, %v7106_v57  ;;  %v2437_v58 = vmul.f32 %v6213_v12, %v2405_v5 }
 0xa7c   :  { %v2446_v46 = vmul.f32 %v5055_v37, %v2438_v9 }
 0xa7d   :  { %v2445_v60 = vmul.f32 %v5055_v37, %v2437_v58 }
 0xa7e   :  { %v7114_v30 = vadd.f32 %v5056_v8, %v2446_v46 }
 0xa7f   :  { %v7112_v42 = vadd.f32 %v5056_v8, %v2445_v60 }
 0xa81   :  { %5543 = vmatprep.mubr.msk.f32.mxu1 %vm238_vm1, %v7112_v42 }
 0xa82   :  { %5544 = vmatmul.mubr.msk.f32.gmra.mrb[28].mxu1 %vm238_vm1, %v7114_v30 }
 0xb4e   :  { %v5542_v62 = vpop.f32.mrb[26].mxu1 }
 0xb4f   :  { %v2568_v23 = vadd.f32 %v5542_v62, %v5077_v61  ;;  %v2562_v50 = vpop.f32.mrb[27].mxu1 }
 0xb50   :  { %v2563_v0 = vadd.f32 %v5077_v61, %v2562_v50 }
 0xb51   :  { %2587 = vrot.lane.b32.xlu0 %v2568_v23, %s6345_s13 }
 0xb52   :  { %2585 = vrot.lane.b32.xlu1 %v2563_v0, %s6345_s13  ;;  %5550 = vmatprep.mubr.msk.f32.mxu1 %vm368_vm2, %v2563_v0  ;;  %v6054_v4 = vpack.i.bf16 %v2568_v23, %v2563_v0 }
 0xb55   :  { %2593 = vrot.lane.b32.xlu0 %v2563_v0, %s6346_s24  ;;  %v5545_v1 = vpop.f32.mrb[28].mxu1 }
 0xb56   :  { %v2578_v2 = vadd.f32 %v5545_v1, %v5077_v61  ;;  %v2572_v3 = vpop.f32.mrb[29].mxu1 }
 0xb57   :  { %v2573_v52 = vadd.f32 %v5077_v61, %v2572_v3 }
 0xb58   :  { %2591 = vrot.lane.b32.xlu1 %v2578_v2, %s6345_s13 }
 0xb59   :  { %2597 = vrot.lane.b32.xlu0 %v2573_v52, %s6346_s24  ;;  %5557 = vmatprep.mubr.msk.f32.mxu0 %vm368_vm2, %v2573_v52  ;;  %v6059_v6 = vpack.i.bf16 %v2578_v2, %v2573_v52 }
 0xb5c   :  { %2589 = vrot.lane.b32.xlu1 %v2573_v52, %s6345_s13 }
 0xb5d   :  { %2601 = vrot.lane.b32.xlu0 %v2563_v0, %s6347_s17 }
 0xb60   :  { %2595 = vrot.lane.b32.xlu1 %v2568_v23, %s6346_s24 }
 0xb61   :  { %2605 = vrot.lane.b32.xlu0 %v2573_v52, %s6347_s17 }
 0xb64   :  { %2599 = vrot.lane.b32.xlu1 %v2578_v2, %s6346_s24 }
 0xb65   :  { %6055 = vrot.lane.b32.xlu0 %v6054_v4, %s6348_s26 }
 0xb68   :  { %2603 = vrot.lane.b32.xlu1 %v2568_v23, %s6347_s17 }
 0xb6c   :  { %2607 = vrot.lane.b32.xlu1 %v2578_v2, %s6347_s17  ;;  %s6356_s17 = smov 127  }
 0xb70   :  { %6060 = vrot.lane.b32.xlu1 %v6059_v6, %s6348_s26 }
 0xbc3   :  { %v2588_v36 = vpop.permute.xlu0 %2587 }
 0xbc4   :  { %v2586_v47 = vpop.permute.xlu1 %2585 }
 0xbc5   :  { %v6064_v33 = vpack.i.bf16 %v2588_v36, %v2586_v47 }
 0xbc7   :  { %6065 = vrot.lane.b32.xlu0 %v6064_v33, %s6348_s26  ;;  %v2594_v10 = vpop.permute.xlu0 %2593 }
 0xbca   :  { %v7140_v56 = vpop.permute.xlu1 %2591 }
 0xbcb   :  { %v7142_v54 = vpop.permute.xlu0 %2597 }
 0xbce   :  { %v2590_v13 = vpop.permute.xlu1 %2589 }
 0xbcf   :  { %v6069_v15 = vpack.i.bf16 %v7140_v56, %v2590_v13  ;;  %v7145_v16 = vpop.permute.xlu0 %2601 }
 0xbd1   :  { %6070 = vrot.lane.b32.xlu1 %v6069_v15, %s6348_s26 }
 0xbd2   :  { %v7148_v19 = vpop.permute.xlu1 %2595 }
 0xbd3   :  { %v7151_v21 = vpack.i.bf16 %v7148_v19, %v2594_v10  ;;  %v7153_v5 = vpop.permute.xlu0 %2605 }
 0xbd5   :  { %6075 = vrot.lane.b32.xlu0 %v7151_v21, %s6348_s26 }
 0xbd6   :  { %v7157_v63 = vpop.permute.xlu1 %2599 }
 0xbd7   :  { %v7161_v24 = vpack.i.bf16 %v7157_v63, %v7142_v54  ;;  %v6056_v25 = vpop.permute.xlu0 %6055 }
 0xbd8   :  { %v6058_v26 = vunpack.i.h.bf16 %v6056_v25  ;;  %v6057_v11 = vunpack.i.l.bf16 %v6056_v25 }
 0xbd9   :  { %6080 = vrot.lane.b32.xlu1 %v7161_v24, %s6348_s26 }
 0xbda   :  { %v5843_v55 = vpack.c.bf16 %v6058_v26, %v6057_v11  ;;  %v7165_v27 = vpop.permute.xlu1 %2603 }
 0xbdb   :  { %v7169_v28 = vpack.i.bf16 %v7165_v27, %v7145_v16 }
 0xbdc   :  { %5845 = vmatprep.subr.msk.bf16.mxu1 %vm6692_vm3, %v5843_v55 }
 0xbdd   :  { %6085 = vrot.lane.b32.xlu0 %v7169_v28, %s6348_s26  ;;  %5848 = vmatpush3.bf16.xpose.msk.msra.mxu1 %vm6692_vm3, %v5843_v55 }
 0xbde   :  { %v7177_v29 = vpop.permute.xlu1 %2607 }
 0xbdf   :  { %v7181_v31 = vpack.i.bf16 %v7177_v29, %v7153_v5 }
 0xbe1   :  { %6100 = vrot.lane.b32.xlu0 %v6059_v6, %s6349_s29  ;;  %6090 = vrot.lane.b32.xlu1 %v7181_v31, %s6348_s26 }
 0xbe2   :  { %v6061_v18 = vpop.permute.xlu1 %6060 }
 0xbe3   :  { %v6063_v32 = vunpack.i.h.bf16 %v6061_v18  ;;  %v6062_v34 = vunpack.i.l.bf16 %v6061_v18 }
 0xbe4   :  { %5551 = vmatmul.mubr.msk.f32.vlgmr.msra.gmra.mrb[30].mxu1 %vm368_vm2, %v2568_v23 }
 0xbe5   :  { %v5849_v17 = vpack.c.bf16 %v6063_v32, %v6062_v34  ;;  %6095 = vrot.lane.b32.xlu1 %v6054_v4, %s6349_s29  ;;  %5564 = vmatprep.mubr.msk.f32.mxu1 %vm368_vm2, %v2586_v47 }
 0xbe7   :  { %5851 = vmatprep.subr.msk.bf16.mxu0 %vm6692_vm3, %v5849_v17 }
 0xbe8   :  { %5854 = vmatpush3.bf16.xpose.msk.msra.mxu0 %vm6692_vm3, %v5849_v17 }
 0xbe9   :  { %6105 = vrot.lane.b32.xlu1 %v6064_v33, %s6349_s29 }
 0xbed   :  { %6110 = vrot.lane.b32.xlu1 %v6069_v15, %s6349_s29 }
 0xbef   :  { %5558 = vmatmul.mubr.msk.f32.vlgmr.msra.gmra.mrb[22].mxu0 %vm368_vm2, %v2578_v2 }
 0xbf0   :  { %5571 = vmatprep.mubr.msk.f32.mxu0 %vm368_vm2, %v2590_v13 }
 0xc39   :  { %v6066_v14 = vpop.permute.xlu0 %6065 }
 0xc3a   :  { %v6068_v22 = vunpack.i.h.bf16 %v6066_v14  ;;  %v6067_v35 = vunpack.i.l.bf16 %v6066_v14 }
 0xc3c   :  { %v5855_v45 = vpack.c.bf16 %v6068_v22, %v6067_v35 }
 0xc3e   :  { %5857 = vmatprep.subr.msk.bf16.mxu1 %vm6692_vm3, %v5855_v45 }
 0xc3f   :  { %5860 = vmatpush3.bf16.xpose.msk.msra.mxu1 %vm6692_vm3, %v5855_v45 }
 0xc43   :  { %v6071_v43 = vpop.permute.xlu1 %6070 }
 0xc44   :  { %v6073_v38 = vunpack.i.h.bf16 %v6071_v43  ;;  %v6072_v41 = vunpack.i.l.bf16 %v6071_v43 }
 0xc46   :  { %v5861_v44 = vpack.c.bf16 %v6073_v38, %v6072_v41  ;;  %5565 = vmatmul.mubr.msk.f32.vlgmr.msra.gmra.mrb[32].mxu1 %vm368_vm2, %v2588_v36 }
 0xc47   :  { %v6076_v48 = vpop.permute.xlu0 %6075  ;;  %5578 = vmatprep.mubr.msk.f32.mxu1 %vm368_vm2, %v2594_v10 }
 0xc48   :  { %v6078_v37 = vunpack.i.h.bf16 %v6076_v48  ;;  %v6077_v7 = vunpack.i.l.bf16 %v6076_v48  ;;  %5863 = vmatprep.subr.msk.bf16.mxu0 %vm6692_vm3, %v5861_v44 }
 0xc49   :  { %5866 = vmatpush3.bf16.xpose.msk.msra.mxu0 %vm6692_vm3, %v5861_v44 }
 0xc4a   :  { %v5867_v49 = vpack.c.bf16 %v6078_v37, %v6077_v7 }
 0xc4b   :  { %v6081_v59 = vpop.permute.xlu1 %6080 }
 0xc4c   :  { %v6083_v8 = vunpack.i.h.bf16 %v6081_v59  ;;  %v6082_v39 = vunpack.i.l.bf16 %v6081_v59  ;;  %5869 = vmatprep.subr.msk.bf16.mxu1 %vm6692_vm3, %v5867_v49 }
 0xc4d   :  { %5872 = vmatpush3.bf16.xpose.msk.msra.mxu1 %vm6692_vm3, %v5867_v49 }
 0xc4e   :  { %v5873_v20 = vpack.c.bf16 %v6083_v8, %v6082_v39 }
 0xc4f   :  { %v6086_v53 = vpop.permute.xlu0 %6085 }
 0xc50   :  { %v6088_v12 = vunpack.i.h.bf16 %v6086_v53  ;;  %v6087_v9 = vunpack.i.l.bf16 %v6086_v53  ;;  %5572 = vmatmul.mubr.msk.f32.vlgmr.msra.gmra.mrb[24].mxu0 %vm368_vm2, %v7140_v56  ;;  %5875 = vmatprep.subr.msk.bf16.mxu0 %vm6692_vm3, %v5873_v20 }
 0xc51   :  { %5878 = vmatpush3.bf16.xpose.msk.msra.mxu0 %vm6692_vm3, %v5873_v20  ;;  %5585 = vmatprep.mubr.msk.f32.mxu0 %vm368_vm2, %v7142_v54 }
 0xc52   :  { %v5879_v58 = vpack.c.bf16 %v6088_v12, %v6087_v9 }
 0xc53   :  { %v6091_v46 = vpop.permute.xlu1 %6090  ;;  %v6101_v62 = vpop.permute.xlu0 %6100 }
 0xc54   :  { %v6093_v60 = vunpack.i.h.bf16 %v6091_v46  ;;  %v6092_v61 = vunpack.i.l.bf16 %v6091_v46  ;;  %5579 = vmatmul.mubr.msk.f32.vlgmr.msra.gmra.mrb[34].mxu1 %vm368_vm2, %v7148_v19  ;;  %5881 = vmatprep.subr.msk.bf16.mxu1 %vm6692_vm3, %v5879_v58  ;;  %v6103_v0 = vunpack.i.h.bf16 %v6101_v62  ;;  %v6102_v1 = vunpack.i.l.bf16 %v6101_v62 }
 0xc55   :  { %5884 = vmatpush3.bf16.xpose.msk.msra.mxu1 %vm6692_vm3, %v5879_v58  ;;  %5592 = vmatprep.mubr.msk.f32.mxu1 %vm368_vm2, %v7145_v16 }
 0xc56   :  { %v5885_v23 = vpack.c.bf16 %v6093_v60, %v6092_v61  ;;  %v7235_v6 = vpack.c.bf16 %v6103_v0, %v6102_v1 }
 0xc57   :  { %v6096_v50 = vpop.permute.xlu1 %6095 }
 0xc58   :  { %v6098_v2 = vunpack.i.h.bf16 %v6096_v50  ;;  %v6097_v3 = vunpack.i.l.bf16 %v6096_v50  ;;  %5586 = vmatmul.mubr.msk.f32.vlgmr.msra.gmra.mrb[26].mxu0 %vm368_vm2, %v7157_v63  ;;  %5887 = vmatprep.subr.msk.bf16.mxu0 %vm6692_vm3, %v5885_v23 }
 0xc59   :  { %5890 = vmatpush3.bf16.xpose.msk.msra.mxu0 %vm6692_vm3, %v5885_v23  ;;  %5599 = vmatprep.mubr.msk.f32.mxu0 %vm368_vm2, %v7153_v5 }
 0xc5a   :  { %v5891_v52 = vpack.c.bf16 %v6098_v2, %v6097_v3 }
 0xc5b   :  { %v6106_v4 = vpop.permute.xlu1 %6105 }
 0xc5c   :  { %v6108_v36 = vunpack.i.h.bf16 %v6106_v4  ;;  %v6107_v47 = vunpack.i.l.bf16 %v6106_v4  ;;  %5593 = vmatmul.mubr.msk.f32.vlgmr.msra.gmra.mrb[36].mxu1 %vm368_vm2, %v7165_v27  ;;  %5892 = vmatprep.subr.bf16.mxu1 %v5891_v52 }
 0xc5d   :  { %5894 = vmatpush3.bf16.msra.mxu1 %v5891_v52 }
 0xc5e   :  { %v5899_v33 = vpack.c.bf16 %v6108_v36, %v6107_v47  ;;  %5896 = vmatprep.subr.bf16.mxu1 %v7235_v6 }
 0xc5f   :  { %v7296_v59 = vpop.permute.xlu1 %6110 }
 0xc60   :  { %5600 = vmatmul.mubr.msk.f32.vlgmr.msra.gmra.mrb[28].mxu0 %vm368_vm2, %v7177_v29  ;;  %5900 = vmatprep.subr.bf16.mxu0 %v5899_v33 }
 0xc61   :  { %5902 = vmatpush3.bf16.msra.mxu0 %v5899_v33 }
 0xcb7   :  { %v5552_v40 = vpop.f32.mrb[30].mxu1 }
 0xcb8   :  { %v2687_v10 = vpop.f32.mrb[31].mxu1  ;;  %v3308_v56 = vsel %vm1061_vm4, %v5552_v40, -inf }
 0xcb9   :  { %3309 = vmax.xlane.f32.xlu1 %v3308_v56  ;;  %v3305_v54 = vsel %vm1061_vm4, %v2687_v10, -inf }
 0xcba   :  { %3306 = vmax.xlane.f32.xlu0 %v3305_v54 }
 0xcc2   :  { %v5559_v13 = vpop.f32.mrb[22].mxu0 }
 0xcc3   :  { %v2774_v15 = vpop.f32.mrb[23].mxu0  ;;  %v3314_v16 = vsel %vm1061_vm4, %v5559_v13, -inf }
 0xcc4   :  { %3315 = vmax.xlane.f32.xlu1 %v3314_v16  ;;  %v3311_v19 = vsel %vm1061_vm4, %v2774_v15, -inf }
 0xcc5   :  { %3312 = vmax.xlane.f32.xlu0 %v3311_v19 }
 0xd19   :  { %v7246_v5 = vpop.f32.mrb[32].mxu1 }
 0xd1a   :  { %v7248_v63 = vpop.f32.mrb[33].mxu1  ;;  %v3320_v25 = vsel %vm1061_vm4, %v7246_v5, -inf }
 0xd1b   :  { %3321 = vmax.xlane.f32.xlu0 %v3320_v25  ;;  %v3317_v26 = vsel %vm1061_vm4, %v7248_v63, -inf }
 0xd1f   :  { %3318 = vmax.xlane.f32.xlu0 %v3317_v26 }
 0xd23   :  { %v7254_v11 = vpop.f32.mrb[24].mxu0 }
 0xd24   :  { %v7256_v55 = vpop.f32.mrb[25].mxu0  ;;  %v3326_v27 = vsel %vm1061_vm4, %v7254_v11, -inf }
 0xd25   :  { %3327 = vmax.xlane.f32.xlu1 %v3326_v27  ;;  %v3323_v32 = vsel %vm1061_vm4, %v7256_v55, -inf }
 0xd27   :  { %v7260_v29 = vpop.f32.mrb[34].mxu1 }
 0xd28   :  { %v7262_v18 = vpop.f32.mrb[35].mxu1  ;;  %v3332_v34 = vsel %vm1061_vm4, %v7260_v29, -inf }
 0xd29   :  { %3324 = vmax.xlane.f32.xlu1 %v3323_v32  ;;  %3333 = vmax.xlane.f32.xlu0 %v3332_v34  ;;  %v3329_v35 = vsel %vm1061_vm4, %v7262_v18, -inf }
 0xd2b   :  { %v7268_v17 = vpop.f32.mrb[26].mxu0 }
 0xd2c   :  { %v7270_v14 = vpop.f32.mrb[27].mxu0  ;;  %v3338_v22 = vsel %vm1061_vm4, %v7268_v17, -inf }
 0xd2d   :  { %3339 = vmax.xlane.f32.xlu1 %v3338_v22  ;;  %3330 = vmax.xlane.f32.xlu0 %v3329_v35  ;;  %v3335_v38 = vsel %vm1061_vm4, %v7270_v14, -inf }
 0xd2f   :  { %v7276_v45 = vpop.f32.mrb[36].mxu1 }
 0xd30   :  { %v7278_v43 = vpop.f32.mrb[37].mxu1  ;;  %v3344_v41 = vsel %vm1061_vm4, %v7276_v45, -inf }
 0xd31   :  { %3336 = vmax.xlane.f32.xlu1 %v3335_v38  ;;  %3345 = vmax.xlane.f32.xlu0 %v3344_v41  ;;  %v3341_v37 = vsel %vm1061_vm4, %v7278_v43, -inf }
 0xd33   :  { %v7284_v44 = vpop.f32.mrb[28].mxu0 }
 0xd34   :  { %v7286_v48 = vpop.f32.mrb[29].mxu0  ;;  %v3350_v49 = vsel %vm1061_vm4, %v7284_v44, -inf }
 0xd35   :  { %3342 = vmax.xlane.f32.xlu0 %v3341_v37  ;;  %v3347_v7 = vsel %vm1061_vm4, %v7286_v48, -inf }
 0xd36   :  { %3348 = vmax.xlane.f32.xlu1 %v3347_v7 }
 0xd39   :  { %3351 = vmax.xlane.f32.xlu0 %v3350_v49 }
 0xd46   :  { %v3310_v8 = vpop.xlane.xlu1 %3309 }
 0xd47   :  { %6120 = vrot.lane.b32.xlu1 %v7161_v24, %s6349_s29  ;;  %v3307_v39 = vpop.xlane.xlu0 %3306  ;;  %v3354_v12 = vsub.f32 %v5552_v40, %v3310_v8 }
 0xd48   :  { %v3353_v20 = vsub.f32 %v2687_v10, %v3307_v39 }
 0xd49   :  { %v3371_v60 = vmul.f32 1.442695, %v3354_v12 }
 0xd4a   :  { %v3369_v9 = vmul.f32 1.442695, %v3353_v20 }
 0xd4c   :  { %6214 = vpow2.f32 %v3369_v9 }
 0xd4d   :  { %6216 = vpow2.f32 %v3371_v60 }
 0xd4f   :  { %6115 = vrot.lane.b32.xlu0 %v7151_v21, %s6349_s29 }
 0xd51   :  { %v3316_v53 = vpop.xlane.xlu1 %3315 }
 0xd52   :  { %v3356_v58 = vsub.f32 %v5559_v13, %v3316_v53  ;;  %v3313_v46 = vpop.xlane.xlu0 %3312 }
 0xd53   :  { %v3355_v62 = vsub.f32 %v2774_v15, %v3313_v46 }
 0xd54   :  { %v3375_v61 = vmul.f32 1.442695, %v3356_v58 }
 0xd55   :  { %v3373_v24 = vmul.f32 1.442695, %v3355_v62 }
 0xd56   :  { %6218 = vpow2.f32 %v3375_v61  ;;  %v7300_v23 = vpop.eup %6214 }
 0xd57   :  { %6220 = vpow2.f32 %v3373_v24  ;;  %v7302_v50 = vpop.eup %6216  ;;  %v3401_v21 = vsel %vm1061_vm4, %v7300_v23, 0.0 }
 0xd58   :  { %v3404_v1 = vsel %vm1061_vm4, %v7302_v50, 0.0 }
 0xd60   :  { %v7306_v0 = vpop.eup %6218 }
 0xd61   :  { %v3410_v2 = vsel %vm1061_vm4, %v7306_v0, 0.0  ;;  %v7312_v3 = vpop.eup %6220 }
 0xd62   :  { %v3407_v52 = vsel %vm1061_vm4, %v7312_v3, 0.0 }
 0xd6b   :  { %3402 = vadd.xlane.f32.xlu1 %v3401_v21 }
 0xd6e   :  { %3405 = vadd.xlane.f32.xlu0 %v3404_v1 }
 0xd6f   :  { %3411 = vadd.xlane.f32.xlu1 %v3410_v2 }
 0xd73   :  { %3408 = vadd.xlane.f32.xlu1 %v3407_v52 }
 0xda8   :  { %v3322_v4 = vpop.xlane.xlu0 %3321 }
 0xda9   :  { %v3358_v36 = vsub.f32 %v7246_v5, %v3322_v4 }
 0xdab   :  { %v3379_v47 = vmul.f32 1.442695, %v3358_v36 }
 0xdac   :  { %v3319_v33 = vpop.xlane.xlu0 %3318 }
 0xdad   :  { %6222 = vpow2.f32 %v3379_v47  ;;  %v3357_v40 = vsub.f32 %v7248_v63, %v3319_v33 }
 0xdaf   :  { %v3377_v10 = vmul.f32 1.442695, %v3357_v40 }
 0xdb1   :  { %6224 = vpow2.f32 %v3377_v10 }
 0xdb2   :  { %v3328_v56 = vpop.xlane.xlu1 %3327 }
 0xdb3   :  { %v3360_v54 = vsub.f32 %v7254_v11, %v3328_v56 }
 0xdb5   :  { %v3383_v13 = vmul.f32 1.442695, %v3360_v54 }
 0xdb6   :  { %v3325_v15 = vpop.xlane.xlu1 %3324  ;;  %v3334_v16 = vpop.xlane.xlu0 %3333 }
 0xdb7   :  { %v7319_v19 = vpop.eup %6222  ;;  %6226 = vpow2.f32 %v3383_v13  ;;  %v3359_v25 = vsub.f32 %v7256_v55, %v3325_v15  ;;  %v3362_v5 = vsub.f32 %v7260_v29, %v3334_v16 }
 0xdb8   :  { %v3416_v26 = vsel %vm1061_vm4, %v7319_v19, 0.0 }
 0xdb9   :  { %v3381_v27 = vmul.f32 1.442695, %v3359_v25  ;;  %v3387_v63 = vmul.f32 1.442695, %v3362_v5  ;;  %3417 = vadd.xlane.f32.xlu0 %v3416_v26 }
 0xdba   :  { %v3340_v32 = vpop.xlane.xlu1 %3339  ;;  %v3331_v34 = vpop.xlane.xlu0 %3330 }
 0xdbb   :  { %v7325_v22 = vpop.eup %6224  ;;  %6228 = vpow2.f32 %v3381_v27  ;;  %v3364_v11 = vsub.f32 %v7268_v17, %v3340_v32  ;;  %v3361_v35 = vsub.f32 %v7262_v18, %v3331_v34 }
 0xdbc   :  { %6230 = vpow2.f32 %v3387_v63  ;;  %v3413_v55 = vsel %vm1061_vm4, %v7325_v22, 0.0 }
 0xdbd   :  { %v3391_v29 = vmul.f32 1.442695, %v3364_v11  ;;  %v3385_v38 = vmul.f32 1.442695, %v3361_v35  ;;  %3414 = vadd.xlane.f32.xlu0 %v3413_v55  ;;  %v6113_v35 = vunpack.i.h.bf16 %v7296_v59  ;;  %v6112_v55 = vunpack.i.l.bf16 %v7296_v59 }
 0xdbe   :  { %v3337_v41 = vpop.xlane.xlu1 %3336  ;;  %v3346_v37 = vpop.xlane.xlu0 %3345 }
 0xdbf   :  { %6232 = vpow2.f32 %v3391_v29  ;;  %v3363_v7 = vsub.f32 %v7270_v14, %v3337_v41  ;;  %v3366_v49 = vsub.f32 %v7276_v45, %v3346_v37  ;;  %v5903_v29 = vpack.c.bf16 %v6113_v35, %v6112_v55 }
 0xdc0   :  { %6234 = vpow2.f32 %v3385_v38 }
 0xdc1   :  { %v7333_v8 = vpop.eup %6226  ;;  %v3389_v17 = vmul.f32 1.442695, %v3363_v7  ;;  %v3395_v39 = vmul.f32 1.442695, %v3366_v49 }
 0xdc2   :  { %v3343_v18 = vpop.xlane.xlu0 %3342  ;;  %v3422_v20 = vsel %vm1061_vm4, %v7333_v8, 0.0 }
 0xdc3   :  { %6236 = vpow2.f32 %v3389_v17  ;;  %v3365_v53 = vsub.f32 %v7278_v43, %v3343_v18  ;;  %v3349_v12 = vpop.xlane.xlu1 %3348  ;;  %3423 = vadd.xlane.f32.xlu1 %v3422_v20 }
 0xdc4   :  { %6238 = vpow2.f32 %v3395_v39  ;;  %v3367_v9 = vsub.f32 %v7286_v48, %v3349_v12 }
 0xdc5   :  { %v7339_v14 = vpop.eup %6228  ;;  %v3393_v45 = vmul.f32 1.442695, %v3365_v53 }
 0xdc6   :  { %v7341_v58 = vpop.eup %6230  ;;  %v3397_v46 = vmul.f32 1.442695, %v3367_v9  ;;  %v3352_v60 = vpop.xlane.xlu0 %3351  ;;  %v3419_v61 = vsel %vm1061_vm4, %v7339_v14, 0.0 }
 0xdc7   :  { %6240 = vpow2.f32 %v3393_v45  ;;  %v3368_v62 = vsub.f32 %v7284_v44, %v3352_v60  ;;  %3420 = vadd.xlane.f32.xlu1 %v3419_v61  ;;  %v3428_v43 = vsel %vm1061_vm4, %v7341_v58, 0.0  ;;  %v6121_v5 = vpop.permute.xlu1 %6120 }
 0xdc8   :  { %6242 = vpow2.f32 %v3397_v46  ;;  %3429 = vadd.xlane.f32.xlu0 %v3428_v43  ;;  %v6123_v37 = vunpack.i.h.bf16 %v6121_v5  ;;  %v6122_v7 = vunpack.i.l.bf16 %v6121_v5 }
 0xdc9   :  { %v7348_v48 = vpop.eup %6232  ;;  %v3399_v24 = vmul.f32 1.442695, %v3368_v62 }
 0xdca   :  { %v7350_v21 = vpop.eup %6234  ;;  %v6116_v1 = vpop.permute.xlu0 %6115  ;;  %v3434_v2 = vsel %vm1061_vm4, %v7348_v48, 0.0  ;;  %v5911_v59 = vpack.c.bf16 %v6123_v37, %v6122_v7 }
 0xdcb   :  { %6244 = vpow2.f32 %v3399_v24  ;;  %v6118_v52 = vunpack.i.h.bf16 %v6116_v1  ;;  %v6117_v4 = vunpack.i.l.bf16 %v6116_v1  ;;  %3435 = vadd.xlane.f32.xlu1 %v3434_v2  ;;  %v3425_v44 = vsel %vm1061_vm4, %v7350_v21, 0.0 }
 0xdcc   :  { %3426 = vadd.xlane.f32.xlu0 %v3425_v44 }
 0xdcd   :  { %v7356_v36 = vpop.eup %6236  ;;  %v7358_v47 = vpack.c.bf16 %v6118_v52, %v6117_v4 }
 0xdce   :  { %v7360_v33 = vpop.eup %6238  ;;  %v3431_v40 = vsel %vm1061_vm4, %v7356_v36, 0.0 }
 0xdcf   :  { %3432 = vadd.xlane.f32.xlu1 %v3431_v40  ;;  %v3440_v10 = vsel %vm1061_vm4, %v7360_v33, 0.0  ;;  %5908 = vmatprep.subr.bf16.mxu0 %v7358_v47 }
 0xdd0   :  { %3441 = vadd.xlane.f32.xlu0 %v3440_v10 }
 0xdd1   :  { %v7367_v56 = vpop.eup %6240 }
 0xdd2   :  { %v7369_v54 = vpop.eup %6242  ;;  %v3437_v13 = vsel %vm1061_vm4, %v7367_v56, 0.0 }
 0xdd3   :  { %v3443_v15 = vsel %vm1061_vm4, %v7369_v54, 0.0 }
 0xdd4   :  { %3438 = vadd.xlane.f32.xlu0 %v3437_v13  ;;  %3444 = vadd.xlane.f32.xlu1 %v3443_v15 }
 0xdd5   :  { %v7375_v16 = vpop.eup %6244 }
 0xdd6   :  { %v3446_v25 = vsel %vm1061_vm4, %v7375_v16, 0.0 }
 0xdd8   :  { %3447 = vadd.xlane.f32.xlu0 %v3446_v25 }
 0xde5   :  { %6130 = vrot.lane.b32.xlu1 %v7181_v31, %s6349_s29 }
 0xdee   :  { %6125 = vrot.lane.b32.xlu0 %v7169_v28, %s6349_s29 }
 0xdf8   :  { %v3403_v26 = vpop.xlane.xlu1 %3402 }
 0xdf9   :  { %6246 = vrcp.f32 %v3403_v26 }
 0xdfb   :  { %v3406_v27 = vpop.xlane.xlu0 %3405 }
 0xdfc   :  { %6248 = vrcp.f32 %v3406_v27  ;;  %v3412_v63 = vpop.xlane.xlu1 %3411 }
 0xdfd   :  { %6250 = vrcp.f32 %v3412_v63 }
 0xe00   :  { %v3409_v32 = vpop.xlane.xlu1 %3408 }
 0xe01   :  { %6252 = vrcp.f32 %v3409_v32 }
 0xe03   :  { %v6247_v34 = vpop.eup %6246 }
 0xe04   :  { %v3450_v11 = vmul.f32 %v6247_v34, %v7300_v23 }
 0xe06   :  { %v6249_v31 = vpop.eup %6248  ;;  %5606 = vmatprep.mubr.msk.f32.mxu1 %vm1061_vm4, %v3450_v11 }
 0xe07   :  { %v3452_v28 = vmul.f32 %v6249_v31, %v7302_v50  ;;  %v6251_v38 = vpop.eup %6250 }
 0xe08   :  { %v3456_v49 = vmul.f32 %v6251_v38, %v7306_v0  ;;  %v5063_v38 = vld [vmem:[%s7611_s4 + $0x30] sm:$0xff] }
 0xe09   :  { %5607 = vmatmul.mubr.msk.f32.vlgmr.msra.gmra.mrb[38].mxu1 %vm1061_vm4, %v3452_v28 }
 0xe0a   :  { %5898 = vmatpush3.bf16.msra.mxu1 %v7235_v6 }
 0xe0b   :  { %v6253_v41 = vpop.eup %6252  ;;  %5904 = vmatprep.subr.bf16.mxu1 %v5903_v29 }
 0xe0c   :  { %v3454_v23 = vmul.f32 %v6253_v41, %v7312_v3  ;;  %v5064_v41 = vld [vmem:[%s7611_s4 + $0x38] sm:$0xff] }
 0xe0d   :  { %v5927_v37 = vpack.c.bf16 %v5064_v41, %v5063_v38 }
 0xe0e   :  { %5613 = vmatprep.mubr.msk.f32.mxu1 %vm1061_vm4, %v3454_v23 }
 0xe0f   :  { %5614 = vmatmul.mubr.msk.f32.vlgmr.msra.gmra.mrb[40].mxu1 %vm1061_vm4, %v3456_v49 }
 0xe10   :  { %5906 = vmatpush3.bf16.msra.mxu1 %v5903_v29 }
 0xe11   :  { %5912 = vmatprep.subr.bf16.mxu1 %v5911_v59 }
 0xe46   :  { %v3418_v50 = vpop.xlane.xlu0 %3417 }
 0xe47   :  { %6254 = vrcp.f32 %v3418_v50 }
 0xe4a   :  { %v3415_v17 = vpop.xlane.xlu0 %3414 }
 0xe4b   :  { %6256 = vrcp.f32 %v3415_v17 }
 0xe50   :  { %v3424_v6 = vpop.xlane.xlu1 %3423 }
 0xe51   :  { %v6255_v39 = vpop.eup %6254  ;;  %6258 = vrcp.f32 %v3424_v6 }
 0xe52   :  { %v3460_v53 = vmul.f32 %v6255_v39, %v7319_v19 }
 0xe54   :  { %v3421_v18 = vpop.xlane.xlu1 %3420 }
 0xe55   :  { %v6257_v20 = vpop.eup %6256  ;;  %6260 = vrcp.f32 %v3421_v18  ;;  %v3430_v3 = vpop.xlane.xlu0 %3429 }
 0xe56   :  { %v3458_v0 = vmul.f32 %v6257_v20, %v7325_v22  ;;  %6262 = vrcp.f32 %v3430_v3 }
 0xe58   :  { %v3436_v12 = vpop.xlane.xlu1 %3435  ;;  %5620 = vmatprep.mubr.msk.f32.mxu0 %vm1061_vm4, %v3458_v0 }
 0xe59   :  { %v3427_v9 = vpop.xlane.xlu0 %3426  ;;  %5621 = vmatmul.mubr.msk.f32.vlgmr.msra.gmra.mrb[30].mxu0 %vm1061_vm4, %v3460_v53 }
 0xe5a   :  { %6264 = vrcp.f32 %v3427_v9  ;;  %5910 = vmatpush3.bf16.msra.mxu0 %v7358_v47 }
 0xe5b   :  { %6266 = vrcp.f32 %v3436_v12  ;;  %v6259_v60 = vpop.eup %6258 }
 0xe5c   :  { %v3433_v45 = vpop.xlane.xlu1 %3432  ;;  %v3464_v19 = vmul.f32 %v6259_v60, %v7333_v8 }
 0xe5d   :  { %6268 = vrcp.f32 %v3433_v45  ;;  %v3442_v46 = vpop.xlane.xlu0 %3441 }
 0xe5e   :  { %6270 = vrcp.f32 %v3442_v46 }
 0xe5f   :  { %v6261_v61 = vpop.eup %6260 }
 0xe60   :  { %v3462_v22 = vmul.f32 %v6261_v61, %v7339_v14  ;;  %v6263_v24 = vpop.eup %6262 }
 0xe61   :  { %v3439_v62 = vpop.xlane.xlu0 %3438  ;;  %v3445_v43 = vpop.xlane.xlu1 %3444  ;;  %v3468_v14 = vmul.f32 %v6263_v24, %v7341_v58 }
 0xe62   :  { %6272 = vrcp.f32 %v3439_v62  ;;  %5627 = vmatprep.mubr.msk.f32.mxu1 %vm1061_vm4, %v3462_v22 }
 0xe63   :  { %6274 = vrcp.f32 %v3445_v43  ;;  %5628 = vmatmul.mubr.msk.f32.vlgmr.msra.gmra.mrb[42].mxu1 %vm1061_vm4, %v3464_v19 }
 0xe64   :  { %v6265_v1 = vpop.eup %6264  ;;  %5914 = vmatpush3.bf16.msra.mxu1 %v5911_v59 }
 0xe65   :  { %v3448_v2 = vpop.xlane.xlu0 %3447  ;;  %v6131_v52 = vpop.permute.xlu1 %6130  ;;  %v3466_v4 = vmul.f32 %v6265_v1, %v7350_v21 }
 0xe66   :  { %v6267_v44 = vpop.eup %6266  ;;  %6276 = vrcp.f32 %v3448_v2  ;;  %v6133_v8 = vunpack.i.h.bf16 %v6131_v52  ;;  %v6132_v47 = vunpack.i.l.bf16 %v6131_v52 }
 0xe67   :  { %v6269_v40 = vpop.eup %6268  ;;  %5634 = vmatprep.mubr.msk.f32.mxu0 %vm1061_vm4, %v3466_v4  ;;  %v3472_v15 = vmul.f32 %v6267_v44, %v7348_v48 }
 0xe68   :  { %v5919_v10 = vpack.c.bf16 %v6133_v8, %v6132_v47  ;;  %5635 = vmatmul.mubr.msk.f32.vlgmr.msra.gmra.mrb[32].mxu0 %vm1061_vm4, %v3468_v14  ;;  %v3470_v13 = vmul.f32 %v6269_v40, %v7356_v36  ;;  %v6271_v58 = vpop.eup %6270 }
 0xe69   :  { %v6126_v25 = vpop.permute.xlu0 %6125  ;;  %v3476_v34 = vmul.f32 %v6271_v58, %v7360_v33  ;;  %v5061_v33 = vld [vmem:[%s7611_s4 + $0x20] sm:$0xff] }
 0xe6a   :  { %v6128_v5 = vunpack.i.h.bf16 %v6126_v25  ;;  %v6127_v26 = vunpack.i.l.bf16 %v6126_v25  ;;  %5641 = vmatprep.mubr.msk.f32.mxu1 %vm1061_vm4, %v3470_v13  ;;  %5920 = vmatprep.subr.bf16.mxu1 %v5919_v10  ;;  %v5130_v13 = vld [vmem:[%s7614_s7 + $0x9] ss:$0 sm:$0xff] }
 0xe6b   :  { %5642 = vmatmul.mubr.msk.f32.vlgmr.msra.gmra.mrb[44].mxu1 %vm1061_vm4, %v3472_v15 }
 0xe6c   :  { %v6273_v21 = vpop.eup %6272  ;;  %v5915_v27 = vpack.c.bf16 %v6128_v5, %v6127_v26  ;;  %5922 = vmatpush3.bf16.msra.mxu1 %v5919_v10 }
 0xe6d   :  { %v6275_v63 = vpop.eup %6274  ;;  %v3474_v32 = vmul.f32 %v6273_v21, %v7367_v56 }
 0xe6e   :  { %5916 = vmatprep.subr.bf16.mxu0 %v5915_v27  ;;  %v3478_v36 = vmul.f32 %v6275_v63, %v7369_v54 }
 0xe6f   :  { %5918 = vmatpush3.bf16.msra.mxu0 %v5915_v27  ;;  %5648 = vmatprep.mubr.msk.f32.mxu0 %vm1061_vm4, %v3474_v32 }
 0xe70   :  { %v6277_v48 = vpop.eup %6276  ;;  %5655 = vmatprep.mubr.msk.f32.mxu1 %vm1061_vm4, %v3478_v36 }
 0xe71   :  { %v3480_v11 = vmul.f32 %v6277_v48, %v7375_v16  ;;  %v5062_v16 = vld [vmem:[%s7611_s4 + $0x28] sm:$0xff] }
 0xe72   :  { %5649 = vmatmul.mubr.msk.f32.vlgmr.msra.gmra.mrb[34].mxu0 %vm1061_vm4, %v3476_v34  ;;  %v5923_v29 = vpack.c.bf16 %v5062_v16, %v5061_v33 }
 0xe73   :  { %5656 = vmatmul.mubr.msk.f32.vlgmr.msra.gmra.mrb[46].mxu1 %vm1061_vm4, %v3480_v11 }
 0xe74   :  { %5924 = vmatprep.subr.bf16.mxu0 %v5923_v29 }
 0xe75   :  { %5926 = vmatpush3.bf16.msra.mxu0 %v5923_v29 }
 0xe76   :  { %5928 = vmatprep.subr.bf16.mxu0 %v5927_v37 }
 0xe79   :  { %5930 = vmatpush3.bf16.msra.mxu0 %v5927_v37 }
 0xedc   :  { %v5608_v35 = vpop.f32.mrb[38].mxu1 }
 0xedd   :  { %v3559_v55 = vpop.f32.mrb[39].mxu1 }
 0xee2   :  { %v5615_v56 = vpop.f32.mrb[40].mxu1 }
 0xee3   :  { %v3646_v31 = vpop.f32.mrb[41].mxu1 }
 0xf2c   :  { %v5622_v28 = vpop.f32.mrb[30].mxu0 }
 0xf2d   :  { %4183 = vrot.lane.b32.xlu1 %v5622_v28, %s6350_s30  ;;  %v3733_v54 = vpop.f32.mrb[31].mxu0 }
 0xf2e   :  { %4181 = vrot.lane.b32.xlu0 %v3733_v54, %s6350_s30 }
 0xf36   :  { %v5629_v7 = vpop.f32.mrb[42].mxu1 }
 0xf37   :  { %v3820_v23 = vpop.f32.mrb[43].mxu1  ;;  %4187 = vrot.lane.b32.xlu1 %v5629_v7, %s6350_s30 }
 0xf38   :  { %4185 = vrot.lane.b32.xlu0 %v3820_v23, %s6350_s30 }
 0xf3b   :  { %v5636_v49 = vpop.f32.mrb[32].mxu0 }
 0xf3c   :  { %4199 = vrot.lane.b32.xlu1 %v5636_v49, %s6351_s28  ;;  %v3907_v59 = vpop.f32.mrb[33].mxu0 }
 0xf3d   :  { %4197 = vrot.lane.b32.xlu0 %v3907_v59, %s6351_s28 }
 0xf3e   :  { %v5643_v50 = vpop.f32.mrb[44].mxu1 }
 0xf3f   :  { %v3994_v17 = vpop.f32.mrb[45].mxu1 }
 0xf40   :  { %4203 = vrot.lane.b32.xlu1 %v5643_v50, %s6351_s28 }
 0xf41   :  { %4201 = vrot.lane.b32.xlu0 %v3994_v17, %s6351_s28 }
 0xf45   :  { %v5650_v6 = vpop.f32.mrb[34].mxu0 }
 0xf46   :  { %v5657_v39 = vpop.f32.mrb[46].mxu1  ;;  %4215 = vrot.lane.b32.xlu1 %v5650_v6, %s6352_s10  ;;  %v4081_v18 = vpop.f32.mrb[35].mxu0 }
 0xf47   :  { %v4168_v20 = vpop.f32.mrb[47].mxu1  ;;  %4213 = vrot.lane.b32.xlu0 %v4081_v18, %s6352_s10  ;;  %v5066_v18 = vld [vmem:[%s7612_s5 + $0x28] sm:$0xff] }
 0xf4a   :  { %4219 = vrot.lane.b32.xlu1 %v5657_v39, %s6352_s10  ;;  %v5065_v39 = vld [vmem:[%s7612_s5 + $0x20] sm:$0xff] }
 0xf4b   :  { %4217 = vrot.lane.b32.xlu0 %v4168_v20, %s6352_s10  ;;  %v5931_v20 = vpack.c.bf16 %v5066_v18, %v5065_v39 }
 0xf4d   :  { %5932 = vmatprep.subr.bf16.mxu1 %v5931_v20 }
 0xf4e   :  { %5934 = vmatpush3.bf16.msra.mxu1 %v5931_v20 }
 0xf9f   :  { %v4184_v3 = vpop.permute.xlu1 %4183 }
 0xfa0   :  { %v4182_v0 = vpop.permute.xlu0 %4181  ;;  %v4226_v19 = vsel %vm368_vm2, %v5608_v35, %v4184_v3  ;;  %v5067_v3 = vld [vmem:[%s7612_s5 + $0x30] sm:$0xff] }
 0xfa1   :  { %v4225_v61 = vsel %vm368_vm2, %v3559_v55, %v4182_v0  ;;  %v5068_v0 = vld [vmem:[%s7612_s5 + $0x38] sm:$0xff] }
 0xfa9   :  { %v4188_v53 = vpop.permute.xlu1 %4187 }
 0xfaa   :  { %v4186_v12 = vpop.permute.xlu0 %4185  ;;  %v4228_v44 = vsel %vm368_vm2, %v5615_v56, %v4188_v53  ;;  %v5935_v53 = vpack.c.bf16 %v5068_v0, %v5067_v3 }
 0xfab   :  { %v4227_v52 = vsel %vm368_vm2, %v3646_v31, %v4186_v12  ;;  %v5069_v12 = vld [vmem:[%s7613_s6 + $0x40] sm:$0xff] }
 0xfac   :  { %5936 = vmatprep.subr.bf16.mxu1 %v5935_v53 }
 0xfad   :  { %5938 = vmatpush3.bf16.msra.mxu1 %v5935_v53 }
 0xfae   :  { %v4200_v9 = vpop.permute.xlu1 %4199 }
 0xfaf   :  { %v4198_v45 = vpop.permute.xlu0 %4197  ;;  %v4230_v24 = vsel %vm1061_vm4, %v4226_v19, %v4200_v9  ;;  %v5070_v9 = vld [vmem:[%s7613_s6 + $0x48] sm:$0xff] }
 0xfb0   :  { %v4229_v62 = vsel %vm1061_vm4, %v4225_v61, %v4198_v45  ;;  %v5071_v45 = vld [vmem:[%s7613_s6 + $0x50] sm:$0xff]  ;;  %v5074_v19 = vld [vmem:[%s7613_s6 + $0x68] sm:$0xff] }
 0xfb2   :  { %v4204_v46 = vpop.permute.xlu1 %4203 }
 0xfb3   :  { %v4202_v60 = vpop.permute.xlu0 %4201  ;;  %v4232_v47 = vsel %vm1061_vm4, %v4228_v44, %v4204_v46  ;;  %v5939_v46 = vpack.c.bf16 %v5070_v9, %v5069_v12 }
 0xfb4   :  { %v4231_v14 = vsel %vm1061_vm4, %v4227_v52, %v4202_v60  ;;  %v5072_v60 = vld [vmem:[%s7613_s6 + $0x58] sm:$0xff] }
 0xfb5   :  { %v5943_v61 = vpack.c.bf16 %v5072_v60, %v5071_v45  ;;  %5940 = vmatprep.subr.bf16.mxu0 %v5939_v46 }
 0xfb8   :  { %v4216_v22 = vpop.permute.xlu1 %4215 }
 0xfb9   :  { %v4214_v43 = vpop.permute.xlu0 %4213  ;;  %v4234_v2 = vsel %vm1990_vm5, %v4230_v24, %v4216_v22  ;;  %v5073_v22 = vld [vmem:[%s7613_s6 + $0x60] sm:$0xff] }
 0xfba   :  { %v4233_v1 = vsel %vm1990_vm5, %v4229_v62, %v4214_v43  ;;  %v5947_v62 = vpack.c.bf16 %v5074_v19, %v5073_v22 }
 0xfbb   :  { %5666 = vmatprep.mubr.msk.f32.mxu0 %vm238_vm1, %v4233_v1 }
 0xfbc   :  { %v4220_v4 = vpop.permute.xlu1 %4219  ;;  %5667 = vmatmul.mubr.msk.f32.vlgmr.msra.gmra.mrb[36].mxu0 %vm238_vm1, %v4234_v2 }
 0xfbd   :  { %v4218_v8 = vpop.permute.xlu0 %4217  ;;  %v4236_v10 = vsel %vm1990_vm5, %v4232_v47, %v4220_v4  ;;  %5942 = vmatpush3.bf16.msra.mxu0 %v5939_v46 }
 0xfbe   :  { %v4235_v40 = vsel %vm1990_vm5, %v4231_v14, %v4218_v8  ;;  %5944 = vmatprep.subr.bf16.mxu0 %v5943_v61 }
 0xfbf   :  { %5669 = vmatprep.mubr.msk.f32.mxu0 %vm238_vm1, %v4235_v40 }
 0xfc0   :  { %5670 = vmatmul.mubr.msk.f32.gmra.mrb[38].mxu0 %vm238_vm1, %v4236_v10 }
 0xfc1   :  { %5946 = vmatpush3.bf16.msra.mxu0 %v5943_v61 }
 0xfc2   :  { %5948 = vmatprep.subr.bf16.mxu0 %v5947_v62 }
 0xfc5   :  { %5950 = vmatpush3.bf16.msra.mxu0 %v5947_v62 }
0x108f   :  { %v5668_v15 = vpop.f32.mrb[36].mxu0 }
0x1090   :  { %v4326_v25 = vadd.f32 %v5668_v15, %v5130_v13  ;;  %v4320_v5 = vpop.f32.mrb[37].mxu0  ;;  %v5135_v15 = vld [vmem:[%s7614_s7 + $0xc] ss:$0 sm:$0xff] }
0x1091   :  { %v4321_v26 = vadd.f32 %v5130_v13, %v4320_v5 }
0x1092   :  { %v4340_v58 = vadd.f32 %v4326_v25, %v7106_v57 }
0x1093   :  { %v4339_v21 = vadd.f32 %v4321_v26, %v7104_v51  ;;  %v5671_v27 = vpop.f32.mrb[38].mxu0 }
0x1094   :  { %v4330_v63 = vpop.f32.mrb[39].mxu0  ;;  %v4348_v32 = vsel %vm238_vm1, %v4340_v58, 0.0  ;;  %v4336_v36 = vadd.f32 %v5671_v27, %v5130_v13 }
0x1095   :  { %v4331_v48 = vadd.f32 %v5130_v13, %v4330_v63  ;;  %4349 = vadd.xlane.f32.xlu1 %v4348_v32  ;;  %v4345_v34 = vsel %vm238_vm1, %v4339_v21, 0.0 }
0x1096   :  { %4346 = vadd.xlane.f32.xlu0 %v4345_v34  ;;  %v4342_v35 = vadd.f32 %v4336_v36, %v7114_v30 }
0x1097   :  { %v4341_v11 = vadd.f32 %v4331_v48, %v7112_v42 }
0x1098   :  { %v4354_v57 = vsel %vm238_vm1, %v4342_v35, 0.0 }
0x1099   :  { %v4351_v55 = vsel %vm238_vm1, %v4341_v11, 0.0 }
0x109a   :  { %4352 = vadd.xlane.f32.xlu0 %v4351_v55 }
0x109e   :  { %4355 = vadd.xlane.f32.xlu0 %v4354_v57 }
0x1122   :  { %v4350_v51 = vpop.xlane.xlu1 %4349 }
0x1123   :  { %v4358_v56 = vmul.f32 0.03125, %v4350_v51  ;;  %v4347_v31 = vpop.xlane.xlu0 %4346 }
0x1124   :  { %v4357_v28 = vmul.f32 0.03125, %v4347_v31  ;;  %v5076_v31 = vld [vmem:[%s7613_s6 + $0x78] sm:$0xff] }
0x1125   :  { %v7470_v54 = vsub.f32 %v4340_v58, %v4358_v56  ;;  %v5136_v58 = vld [vmem:[%s7614_s7 + $0xd] ss:$0 sm:$0xff]  ;;  %v5075_v56 = vld [vmem:[%s7613_s6 + $0x70] sm:$0xff] }
0x1126   :  { %v7472_v33 = vsub.f32 %v4339_v21, %v4357_v28  ;;  %v5951_v28 = vpack.c.bf16 %v5076_v31, %v5075_v56 }
0x1127   :  { %v4353_v16 = vpop.xlane.xlu0 %4352  ;;  %v4366_v42 = vmul.f32 %v7470_v54, %v7470_v54 }
0x1128   :  { %v4359_v29 = vmul.f32 0.03125, %v4353_v16  ;;  %v4365_v30 = vmul.f32 %v7472_v33, %v7472_v33  ;;  %5952 = vmatprep.subr.bf16.mxu0 %v5951_v28 }
0x1129   :  { %v4372_v38 = vsel %vm238_vm1, %v4366_v42, 0.0  ;;  %5954 = vmatpush3.bf16.msra.mxu0 %v5951_v28  ;;  %v5147_v28 = vld [vmem:[%s7614_s7 + $0xe] ss:$0 sm:$0xff] }
0x112a   :  { %v7479_v41 = vsub.f32 %v4341_v11, %v4359_v29  ;;  %4373 = vadd.xlane.f32.xlu0 %v4372_v38  ;;  %v4369_v37 = vsel %vm238_vm1, %v4365_v30, 0.0 }
0x112b   :  { %4370 = vadd.xlane.f32.xlu1 %v4369_v37  ;;  %v4356_v7 = vpop.xlane.xlu0 %4355 }
0x112c   :  { %v4360_v23 = vmul.f32 0.03125, %v4356_v7  ;;  %v4367_v49 = vmul.f32 %v7479_v41, %v7479_v41 }
0x112e   :  { %v7484_v59 = vsub.f32 %v4342_v35, %v4360_v23  ;;  %v4375_v50 = vsel %vm238_vm1, %v4367_v49, 0.0 }
0x112f   :  { %4376 = vadd.xlane.f32.xlu1 %v4375_v50  ;;  %v5142_v50 = vld [vmem:[%s7614_s7 + $0xb] ss:$0 sm:$0xff] }
0x1130   :  { %v4368_v17 = vmul.f32 %v7484_v59, %v7484_v59 }
0x1132   :  { %v4378_v6 = vsel %vm238_vm1, %v4368_v17, 0.0 }
0x1133   :  { %4379 = vadd.xlane.f32.xlu0 %v4378_v6 }
0x11b7   :  { %v4374_v43 = vpop.xlane.xlu0 %4373 }
0x11b8   :  { %v4382_v24 = vmul.f32 0.03125, %v4374_v43  ;;  %v4371_v1 = vpop.xlane.xlu1 %4370 }
0x11b9   :  { %v4381_v2 = vmul.f32 0.03125, %v4371_v1 }
0x11ba   :  { %v4386_v52 = vadd.f32 1e-05, %v4382_v24 }
0x11bb   :  { %v4385_v4 = vadd.f32 1e-05, %v4381_v2 }
0x11bc   :  { %6278 = vrsqrt.f32 %v4386_v52  ;;  %v4377_v44 = vpop.xlane.xlu1 %4376 }
0x11bd   :  { %6280 = vrsqrt.f32 %v4385_v4  ;;  %v4383_v14 = vmul.f32 0.03125, %v4377_v44 }
0x11bf   :  { %v4387_v8 = vadd.f32 1e-05, %v4383_v14 }
0x11c0   :  { %v4380_v47 = vpop.xlane.xlu0 %4379 }
0x11c1   :  { %6282 = vrsqrt.f32 %v4387_v8  ;;  %v4384_v40 = vmul.f32 0.03125, %v4380_v47 }
0x11c3   :  { %v4388_v10 = vadd.f32 1e-05, %v4384_v40 }
0x11c5   :  { %6284 = vrsqrt.f32 %v4388_v10 }
0x11c6   :  { %v6279_v13 = vpop.eup %6278 }
0x11c7   :  { %v6281_v25 = vpop.eup %6280  ;;  %v4394_v5 = vmul.f32 %v6279_v13, %v7470_v54  ;;  %v5137_v54 = vld [vmem:[%s7614_s7 + $0xa] ss:$0 sm:$0xff] }
0x11c8   :  { %v4393_v26 = vmul.f32 %v6281_v25, %v7472_v33 }
0x11c9   :  { %v4402_v21 = vmul.f32 %v5135_v15, %v4394_v5 }
0x11ca   :  { %v4401_v27 = vmul.f32 %v5135_v15, %v4393_v26 }
0x11cb   :  { %v6283_v63 = vpop.eup %6282  ;;  %v4410_v48 = vadd.f32 %v5136_v58, %v4402_v21 }
0x11cc   :  { %v4409_v32 = vadd.f32 %v5136_v58, %v4401_v27  ;;  %v4395_v36 = vmul.f32 %v6283_v63, %v7479_v41 }
0x11ce   :  { %5680 = vmatprep.mubr.msk.f32.mxu1 %vm238_vm1, %v4409_v32  ;;  %v4403_v34 = vmul.f32 %v5135_v15, %v4395_v36 }
0x11cf   :  { %v6285_v11 = vpop.eup %6284  ;;  %5681 = vmatmul.mubr.msk.f32.vlgmr.msra.gmra.mrb[48].mxu1 %vm238_vm1, %v4410_v48 }
0x11d0   :  { %v4411_v35 = vadd.f32 %v5136_v58, %v4403_v34  ;;  %v4396_v55 = vmul.f32 %v6285_v11, %v7484_v59 }
0x11d2   :  { %5683 = vmatprep.mubr.msk.f32.mxu1 %vm238_vm1, %v4411_v35  ;;  %v4404_v57 = vmul.f32 %v5135_v15, %v4396_v55 }
0x11d4   :  { %v4412_v51 = vadd.f32 %v5136_v58, %v4404_v57 }
0x11d6   :  { %5684 = vmatmul.mubr.msk.f32.gmra.mrb[50].mxu1 %vm238_vm1, %v4412_v51 }
0x12a2   :  { %v5682_v33 = vpop.f32.mrb[48].mxu1 }
0x12a3   :  { %v4502_v16 = vadd.f32 %v5682_v33, %v5137_v54  ;;  %v4496_v42 = vpop.f32.mrb[49].mxu1 }
0x12a4   :  { %v4497_v29 = vadd.f32 %v5137_v54, %v4496_v42 }
0x12a5   :  { %v4516_v38 = vmax.f32 %v4502_v16, 0.0  ;;  %v5148_v16 = vld [vmem:[%s7614_s7 + $0xf] ss:$0 sm:$0xff] }
0x12a6   :  { %v4515_v30 = vmax.f32 %v4497_v29, 0.0 }
0x12a8   :  { %5702 = vmatprep.mubr.msk.f32.mxu0 %vm2283_vm6, %v4515_v30 }
0x12a9   :  { %v5685_v41 = vpop.f32.mrb[50].mxu1  ;;  %5703 = vmatmul.mubr.msk.f32.vlgmr.msra.gmra.mrb[40].mxu0 %vm2283_vm6, %v4516_v38 }
0x12aa   :  { %v4512_v37 = vadd.f32 %v5685_v41, %v5137_v54  ;;  %v4506_v7 = vpop.f32.mrb[51].mxu1 }
0x12ab   :  { %v4507_v23 = vadd.f32 %v5137_v54, %v4506_v7 }
0x12ac   :  { %v4518_v59 = vmax.f32 %v4512_v37, 0.0 }
0x12ad   :  { %v4517_v49 = vmax.f32 %v4507_v23, 0.0 }
0x12af   :  { %5705 = vmatprep.mubr.msk.f32.mxu0 %vm2283_vm6, %v4517_v49 }
0x12b0   :  { %5706 = vmatmul.mubr.msk.f32.gmra.mrb[42].mxu0 %vm2283_vm6, %v4518_v59 }
0x137c   :  { %v5704_v17 = vpop.f32.mrb[40].mxu0 }
0x137d   :  { %v4608_v6 = vadd.f32 %v5704_v17, %v5142_v50  ;;  %v4602_v39 = vpop.f32.mrb[41].mxu0 }
0x137e   :  { %v4603_v18 = vadd.f32 %v5142_v50, %v4602_v39 }
0x137f   :  { %v4622_v20 = vadd.f32 %v4608_v6, %v4410_v48 }
0x1380   :  { %v4621_v3 = vadd.f32 %v4603_v18, %v4409_v32 }
0x1381   :  { %v4630_v0 = vsel %vm238_vm1, %v4622_v20, 0.0 }
0x1382   :  { %4631 = vadd.xlane.f32.xlu0 %v4630_v0  ;;  %v4627_v53 = vsel %vm238_vm1, %v4621_v3, 0.0 }
0x1383   :  { %4628 = vadd.xlane.f32.xlu1 %v4627_v53  ;;  %v5707_v12 = vpop.f32.mrb[42].mxu0 }
0x1384   :  { %v4618_v9 = vadd.f32 %v5707_v12, %v5142_v50  ;;  %v4612_v45 = vpop.f32.mrb[43].mxu0 }
0x1385   :  { %v4613_v46 = vadd.f32 %v5142_v50, %v4612_v45 }
0x1386   :  { %v4624_v60 = vadd.f32 %v4618_v9, %v4412_v51 }
0x1387   :  { %v4623_v61 = vadd.f32 %v4613_v46, %v4411_v35 }
0x1388   :  { %v4636_v22 = vsel %vm238_vm1, %v4624_v60, 0.0 }
0x1389   :  { %4637 = vadd.xlane.f32.xlu0 %v4636_v22  ;;  %v4633_v19 = vsel %vm238_vm1, %v4623_v61, 0.0 }
0x138a   :  { %4634 = vadd.xlane.f32.xlu1 %v4633_v19 }
0x140f   :  { %v4632_v62 = vpop.xlane.xlu0 %4631 }
0x1410   :  { %v4640_v43 = vmul.f32 0.03125, %v4632_v62  ;;  %v4629_v24 = vpop.xlane.xlu1 %4628 }
0x1411   :  { %v4639_v1 = vmul.f32 0.03125, %v4629_v24 }
0x1412   :  { %v4644_v2 = vsub.f32 %v4622_v20, %v4640_v43 }
0x1413   :  { %v4643_v52 = vsub.f32 %v4621_v3, %v4639_v1 }
0x1414   :  { %v4648_v4 = vmul.f32 %v4644_v2, %v4644_v2 }
0x1415   :  { %v4647_v44 = vmul.f32 %v4643_v52, %v4643_v52 }
0x1416   :  { %v4638_v14 = vpop.xlane.xlu0 %4637  ;;  %v4654_v8 = vsel %vm238_vm1, %v4648_v4, 0.0 }
0x1417   :  { %v4642_v47 = vmul.f32 0.03125, %v4638_v14  ;;  %v4635_v40 = vpop.xlane.xlu1 %4634  ;;  %4655 = vadd.xlane.f32.xlu0 %v4654_v8  ;;  %v4651_v10 = vsel %vm238_vm1, %v4647_v44, 0.0 }
0x1418   :  { %v4641_v13 = vmul.f32 0.03125, %v4635_v40  ;;  %4652 = vadd.xlane.f32.xlu1 %v4651_v10 }
0x1419   :  { %v4646_v15 = vsub.f32 %v4624_v60, %v4642_v47  ;;  %v4786_v47 = vld [vmem:[%s7614_s7 + $0x13] sm:$0x1] }
0x141a   :  { %v4645_v25 = vsub.f32 %v4623_v61, %v4641_v13  ;;  %5958 = vpush %v4786_v47 }
0x141b   :  { %v4650_v5 = vmul.f32 %v4646_v15, %v4646_v15 }
0x141c   :  { %v4649_v26 = vmul.f32 %v4645_v25, %v4645_v25 }
0x141d   :  { %v4660_v58 = vsel %vm238_vm1, %v4650_v5, 0.0 }
0x141e   :  { %4661 = vadd.xlane.f32.xlu0 %v4660_v58  ;;  %v4657_v21 = vsel %vm238_vm1, %v4649_v26, 0.0 }
0x141f   :  { %4658 = vadd.xlane.f32.xlu1 %v4657_v21 }
0x144b   :  { %s5959_s26 = spop %5958 }
0x14a4   :  { %v4656_v27 = vpop.xlane.xlu0 %4655 }
0x14a5   :  { %v4664_v63 = vmul.f32 0.03125, %v4656_v27  ;;  %v4653_v32 = vpop.xlane.xlu1 %4652 }
0x14a6   :  { %v4663_v36 = vmul.f32 0.03125, %v4653_v32 }
0x14a7   :  { %v4668_v48 = vadd.f32 1e-05, %v4664_v63 }
0x14a8   :  { %v4667_v34 = vadd.f32 1e-05, %v4663_v36 }
0x14a9   :  { %6286 = vrsqrt.f32 %v4668_v48  ;;  %v5149_v48 = vld [vmem:[%s7614_s7 + $0x10] ss:$0 sm:$0xff] }
0x14aa   :  { %6288 = vrsqrt.f32 %v4667_v34 }
0x14ab   :  { %v4662_v11 = vpop.xlane.xlu0 %4661 }
0x14ac   :  { %v4666_v35 = vmul.f32 0.03125, %v4662_v11  ;;  %v4659_v55 = vpop.xlane.xlu1 %4658 }
0x14ad   :  { %v4665_v57 = vmul.f32 0.03125, %v4659_v55 }
0x14ae   :  { %v4670_v51 = vadd.f32 1e-05, %v4666_v35  ;;  %v5150_v35 = vld [vmem:[%s7614_s7 + $0x11] ss:$0 sm:$0xff] }
0x14af   :  { %v4669_v56 = vadd.f32 1e-05, %v4665_v57 }
0x14b0   :  { %6290 = vrsqrt.f32 %v4670_v51  ;;  %v5151_v51 = vld [vmem:[%s7614_s7 + $0x12] ss:$0 sm:$0xff] }
0x14b1   :  { %6292 = vrsqrt.f32 %v4669_v56 }
0x14b3   :  { %v6287_v31 = vpop.eup %6286 }
0x14b4   :  { %v6289_v54 = vpop.eup %6288  ;;  %v4676_v33 = vmul.f32 %v6287_v31, %v4644_v2 }
0x14b5   :  { %v4675_v42 = vmul.f32 %v6289_v54, %v4643_v52 }
0x14b6   :  { %v4684_v29 = vmul.f32 %v5147_v28, %v4676_v33 }
0x14b7   :  { %v4683_v30 = vmul.f32 %v5147_v28, %v4675_v42 }
0x14b8   :  { %v4692_v38 = vadd.f32 %v5148_v16, %v4684_v29 }
0x14b9   :  { %v4691_v41 = vadd.f32 %v5148_v16, %v4683_v30 }
0x14ba   :  { %v6291_v37 = vpop.eup %6290  ;;  %v4700_v7 = vsel %vm238_vm1, %v4692_v38, 0.0 }
0x14bb   :  { %v6293_v23 = vpop.eup %6292  ;;  %4701 = vadd.xlane.f32.xlu0 %v4700_v7  ;;  %v4697_v49 = vsel %vm238_vm1, %v4691_v41, 0.0  ;;  %v4678_v59 = vmul.f32 %v6291_v37, %v4646_v15 }
0x14bc   :  { %4698 = vadd.xlane.f32.xlu1 %v4697_v49  ;;  %v4677_v50 = vmul.f32 %v6293_v23, %v4645_v25 }
0x14bd   :  { %v4686_v17 = vmul.f32 %v5147_v28, %v4678_v59 }
0x14be   :  { %v4685_v6 = vmul.f32 %v5147_v28, %v4677_v50 }
0x14bf   :  { %v4694_v39 = vadd.f32 %v5148_v16, %v4686_v17 }
0x14c0   :  { %v4693_v18 = vadd.f32 %v5148_v16, %v4685_v6 }
0x14c1   :  { %v4706_v20 = vsel %vm238_vm1, %v4694_v39, 0.0 }
0x14c2   :  { %4707 = vadd.xlane.f32.xlu0 %v4706_v20  ;;  %v4703_v3 = vsel %vm238_vm1, %v4693_v18, 0.0  ;;  %v6353_v20 = vmov 0.0|0.0  }
0x14c3   :  { %4704 = vadd.xlane.f32.xlu1 %v4703_v3  ;;  %5955 = vmatprep.subr.bf16.mxu1 %v6353_v20 }
0x1548   :  { %v4702_v0 = vpop.xlane.xlu0 %4701 }
0x1549   :  { %v4710_v53 = vmul.f32 0.03125, %v4702_v0  ;;  %v4699_v12 = vpop.xlane.xlu1 %4698  ;;  %v4795_v0 = vld [vmem:[%s7615_s8] sm:$0xff] }
0x154a   :  { %v4709_v9 = vmul.f32 0.03125, %v4699_v12 }
0x154b   :  { %v4714_v45 = vsub.f32 %v4692_v38, %v4710_v53  ;;  %v4796_v53 = vld [vmem:[%s7615_s8 + $0x8] sm:$0xff]  ;;  %s6357_s8 = smov [#allocation6]  }
0x154c   :  { %v4713_v46 = vsub.f32 %v4691_v41, %v4709_v9  ;;  %v5956_v12 = vpack.c.bf16 %v4796_v53, %v4795_v0  ;;  %s4913_s29 = sshll.u32 %s6357_s8, 4  ;;  %s4914_s29 = int_to_ptr.vmem [resolvable:$true] %s4913_s29 }
0x154d   :  { %v4718_v60 = vmul.f32 %v4714_v45, %v4714_v45  ;;  %s6318_s27 = scalar_lea.vmem %s4914_s29, 32  ;;  %p6323_p6 = scmp.lt.s32.totalorder %s4914_s29, %s4914_s29 }
0x154e   :  { %v4717_v61 = vmul.f32 %v4713_v46, %v4713_v46  ;;  %5957 = vmatpush3.bf16.msra.mxu1 %v5956_v12  ;;  %p6319_p5 = scmp.ne.s32.totalorder %s4914_s29, %s6318_s27  ;;  %p6324_p7 = scmp.lt.s32.totalorder %s6318_s27, %s6318_s27 }
0x154f   :  { %v4708_v22 = vpop.xlane.xlu0 %4707  ;;  %v4724_v19 = vsel %vm238_vm1, %v4718_v60, 0.0 }
0x1550   :  { %v4712_v62 = vmul.f32 0.03125, %v4708_v22  ;;  %v4705_v43 = vpop.xlane.xlu1 %4704  ;;  %4725 = vadd.xlane.f32.xlu0 %v4724_v19  ;;  %v4721_v24 = vsel %vm238_vm1, %v4717_v61, 0.0  ;;  %v4789_v61 = vstv %s5959_s26  ;;  %p6325_p8 = por %p6324_p7, %p6323_p6 }
0x1551   :  { %v4711_v1 = vmul.f32 0.03125, %v4705_v43  ;;  %4722 = vadd.xlane.f32.xlu1 %v4721_v24 }
0x1552   :  { %v4716_v2 = vsub.f32 %v4694_v39, %v4712_v62  ;;  %v4797_v39 = vlaneseq  ;;  %p6326_p9 = pnand %p6325_p8, %p6319_p5 }
0x1553   :  { %v4715_v52 = vsub.f32 %v4693_v18, %v4711_v1 }
0x1554   :  { %v4720_v4 = vmul.f32 %v4716_v2, %v4716_v2  ;;  %v4798_v18 = vshrl.u32 %v4797_v39, 7 }
0x1555   :  { %v4719_v44 = vmul.f32 %v4715_v52, %v4715_v52 }
0x1556   :  { %v4730_v14 = vsel %vm238_vm1, %v4720_v4, 0.0  ;;  %v4799_v3 = vsub.s32 0, %v4798_v18 }
0x1557   :  { %4731 = vadd.xlane.f32.xlu0 %v4730_v14  ;;  %v4727_v8 = vsel %vm238_vm1, %v4719_v44, 0.0 }
0x1558   :  { %4728 = vadd.xlane.f32.xlu1 %v4727_v8  ;;  %v4800_v9 = vrot.slane %v4786_v47, %v4799_v3 }
0x15dd   :  { %v4726_v40 = vpop.xlane.xlu0 %4725 }
0x15de   :  { %v4734_v10 = vmul.f32 0.03125, %v4726_v40  ;;  %v4723_v13 = vpop.xlane.xlu1 %4722 }
0x15df   :  { %v4733_v15 = vmul.f32 0.03125, %v4723_v13 }
0x15e0   :  { %v4738_v25 = vadd.f32 1e-05, %v4734_v10 }
0x15e1   :  { %v4737_v5 = vadd.f32 1e-05, %v4733_v15 }
0x15e2   :  { %6294 = vrsqrt.f32 %v4738_v25 }
0x15e3   :  { %6296 = vrsqrt.f32 %v4737_v5 }
0x15e4   :  { %v4732_v26 = vpop.xlane.xlu0 %4731 }
0x15e5   :  { %v4736_v58 = vmul.f32 0.03125, %v4732_v26  ;;  %v4729_v21 = vpop.xlane.xlu1 %4728 }
0x15e6   :  { %v4735_v27 = vmul.f32 0.03125, %v4729_v21 }
0x15e7   :  { %v4740_v63 = vadd.f32 1e-05, %v4736_v58 }
0x15e8   :  { %v4739_v32 = vadd.f32 1e-05, %v4735_v27 }
0x15e9   :  { %6298 = vrsqrt.f32 %v4740_v63 }
0x15ea   :  { %6300 = vrsqrt.f32 %v4739_v32 }
0x15ec   :  { %v6295_v36 = vpop.eup %6294 }
0x15ed   :  { %v6297_v34 = vpop.eup %6296  ;;  %v4746_v11 = vmul.f32 %v6295_v36, %v4714_v45  ;;  %v6355_v45 = vmov 0.0  }
0x15ee   :  { %v4745_v55 = vmul.f32 %v6297_v34, %v4713_v46  ;;  %5712 = vmatprep.mubr.msk.f32.mxu1 %vm6354_vm7, %v6355_v45  ;;  %v4806_v46 = vand.u32 127, %v4797_v39 }
0x15ef   :  { %v4754_v57 = vmul.f32 %v5149_v48, %v4746_v11 }
0x15f0   :  { %v4753_v56 = vmul.f32 %v5149_v48, %v4745_v55  ;;  %v4811_v60 = vadd.s32 4294967288, %v4806_v46  ;;  %v4809_v24 = vsub.s32 %v4806_v46, %v4798_v18 }
0x15f1   :  { %v4762_v31 = vadd.f32 %v5150_v35, %v4754_v57 }
0x15f2   :  { %v4761_v28 = vadd.f32 %v5150_v35, %v4753_v56  ;;  %v4814_v62 = vsub.s32 %v4811_v60, %v4798_v18 }
0x15f3   :  { %v6299_v54 = vpop.eup %6298  ;;  %v4771_v33 = vmul.f32 %v5151_v51, %v4762_v31 }
0x15f4   :  { %v6301_v16 = vpop.eup %6300  ;;  %v4770_v42 = vmul.f32 %v5151_v51, %v4761_v28  ;;  %v4748_v29 = vmul.f32 %v6299_v54, %v4716_v2 }
0x15f5   :  { %v4777_v30 = vsel %vm238_vm1, %v4771_v33, 0.0  ;;  %v4747_v38 = vmul.f32 %v6301_v16, %v4715_v52 }
0x15f6   :  { %4778 = vadd.xlane.f32.xlu0 %v4777_v30  ;;  %v4774_v41 = vsel %vm238_vm1, %v4770_v42, 0.0  ;;  %v4756_v37 = vmul.f32 %v5149_v48, %v4748_v29 }
0x15f7   :  { %4775 = vadd.xlane.f32.xlu1 %v4774_v41  ;;  %v4755_v7 = vmul.f32 %v5149_v48, %v4747_v38 }
0x15f8   :  { %v4764_v23 = vadd.f32 %v5150_v35, %v4756_v37 }
0x15f9   :  { %v4763_v49 = vadd.f32 %v5150_v35, %v4755_v7 }
0x15fa   :  { %v4773_v59 = vmul.f32 %v5151_v51, %v4764_v23 }
0x15fb   :  { %v4772_v50 = vmul.f32 %v5151_v51, %v4763_v49 }
0x15fc   :  { %v4783_v17 = vsel %vm238_vm1, %v4773_v59, 0.0 }
0x15fd   :  { %4784 = vadd.xlane.f32.xlu0 %v4783_v17  ;;  %v4780_v6 = vsel %vm238_vm1, %v4772_v50, 0.0 }
0x15fe   :  { %4781 = vadd.xlane.f32.xlu1 %v4780_v6 }
0x160f   :  { %4830 = vrot.lane.b32.xlu1 %v4800_v9, %s6356_s17 }
0x1683   :  { %v4779_v22 = vpop.xlane.xlu0 %4778 }
0x1684   :  { %v4776_v19 = vpop.xlane.xlu1 %4775  ;;  %v4792_v43 = vadd.f32 %v4789_v61, %v4779_v22 }
0x1685   :  { %v4791_v1 = vadd.f32 %v4789_v61, %v4776_v19 }
0x1686   :  { %v4815_v44 = vrot.slane %v4792_v43, %v4814_v62 }
0x1687   :  { %v4810_v14 = vrot.slane %v4791_v1, %v4809_v24 }
0x1689   :  { %v4817_v10 = vsel %vm4816_vm8, %v4815_v44, %v4810_v14 }
0x168a   :  { %v4785_v2 = vpop.xlane.xlu0 %4784 }
0x168b   :  { %v4794_v52 = vadd.f32 %v4789_v61, %v4785_v2  ;;  %v4782_v4 = vpop.xlane.xlu1 %4781 }
0x168c   :  { %v4793_v8 = vadd.f32 %v4789_v61, %v4782_v4 }
0x168d   :  { %v4825_v47 = vrot.slane %v4794_v52, %v4814_v62 }
0x168e   :  { %v4821_v40 = vrot.slane %v4793_v8, %v4809_v24 }
0x168f   :  { %v4831_v25 = vpop.permute.xlu1 %4830 }
0x1690   :  { %v4826_v13 = vsel %vm4816_vm8, %v4825_v47, %v4821_v40 }
0x1691   :  { %v4828_v15 = vsel %vm4827_vm9, %v4826_v13, %v4817_v10 }
0x1692   :  { %5713 = vmatmul.mubr.msk.f32.vlgmr.msra.gmra.mrb[52].mxu1 %vm1061_vm4, %v4828_v15 }
0x1765   :  { %v4901_v5 = vpop.f32.mrb[52].mxu1 }
0x1766   :  { %v4902_v26 = vadd.f32 %v4901_v5, %v4831_v25  ;;  %v5714_v58 = vpop.f32.mrb[53].mxu1 }
0x1768   :  { %4906 = vst.msk [vmem:[#allocation6] sm:$0x3] %vm4905_vm10, %v4902_v26 }
0x1769   :  { %6329 = shalt.err (!%p6326_p9)
}
0x176a   :  { %s6330_s4 = scalar_lea.hbm %s7616_s9, 32 }
0x176b   :  { %p6331_p10 = scmp.ne.s32.totalorder %s7616_s9, %s6330_s4  ;;  %p6334_p11 = scmp.lt.u32.totalorder %s6330_s4, %s7616_s9 }
0x176d   :  { %p6336_p12 = pnand %p6334_p11, %p6331_p10 }
0x176f   :  { %6339 = shalt.err (!%p6336_p12)
}
0x1770   :  { %4916 = dma.vmem_to_hbm [thread:$0]  %s4914_s29, 32, %s7616_s9, [#allocation4]  }
0x1771   :  { %6342 = dma.done.wait [#allocation4], 32  }
0x1772   :  { %6343 = vsyncadd [#allocation4], 4294967264 }
0x1773   :  { %4920 = vsyncpa [#allocation4], 1 }
0x1774   :  { %4921 = vsyncpa [#allocation5], 1 }

</bundles_post_ra>
